<compile_context>
chip_gen: v6e
topology: v6e:2x2x1
jax: 0.10.0
libtpu: 0.0.40
codegen_flags: <defaults>
</compile_context>

<pallas_src>
import functools

import jax
import jax.numpy as jnp
import numpy as np
from jax import lax
from jax.experimental import pallas as pl
from jax.experimental.pallas import tpu as pltpu

_LANE = 128
_SUBLANE_TILE = 8                       # (8, 128) f32 = exactly one vreg
_LANES_PER_TILE = _SUBLANE_TILE * _LANE  # 1024 lanes per grid step


def _loss_kernel(states_ref, refs_ref, accel_ref, steer_ref, out_ref,
                 tan_dt_ref, *, horizon, dt, dist_scale, ang_scale, unrolled):
    # states_ref: (4, 8, 128)   VMEM   [x, y, psi, v]
    # refs_ref:   (3, 8, 128)   VMEM   [x_ref, y_ref, psi_ref]
    # accel_ref:  (H, 8, 128)   VMEM
    # steer_ref:  (H, 8, 128)   VMEM
    # out_ref:    (1, 1)        SMEM   per-tile partial cost (pre-scaled)
    # tan_dt_ref: (H, 8, 128)   VMEM scratch  tan(steer) * dt/2

    # reference components (constant across the rollout)
    rx = refs_ref[0]
    ry = refs_ref[1]
    rpsi = refs_ref[2]

    # Bulk precompute of the steering term (off the serial psi chain).
    # Exact divide on purpose — see correctness note about approx reciprocal.
    st = steer_ref[...]
    tan_dt_ref[...] = (jnp.sin(st) / jnp.cos(st)) * (0.5 * dt)

    # initial state
    x = states_ref[0]
    y = states_ref[1]
    psi = states_ref[2]
    v = states_ref[3]

    # cost contribution of the initial state (state_histories[0]);
    # running accumulators live in vregs, one cross-lane reduction at the end.
    dx = x - rx
    dy = y - ry
    dist_acc = jnp.sqrt(dx * dx + dy * dy)   # padded lanes: sqrt(0) = 0
    ang_acc = jnp.abs(psi - rpsi)

    def step(i, carry):
        x, y, psi, v, dist_acc, ang_acc = carry
        a_dt = accel_ref[i] * dt         # one vmul, spare VALU slot
        t_dt = tan_dt_ref[i]
        v_dt = v * dt                    # hoisted, reused by x_n / y_n
        x_n = x + v_dt * jnp.cos(psi)
        y_n = y + v_dt * jnp.sin(psi)
        psi_n = psi + v * t_dt
        v_n = v + a_dt
        dxn = x_n - rx
        dyn = y_n - ry
        dist_acc = dist_acc + jnp.sqrt(dxn * dxn + dyn * dyn)
        ang_acc = ang_acc + jnp.abs(psi_n - rpsi)
        return x_n, y_n, psi_n, v_n, dist_acc, ang_acc

    carry = (x, y, psi, v, dist_acc, ang_acc)
    if unrolled:
        # small horizon: static unroll — carries are one vreg each at this
        # tile size, so no spill pressure
        for i in range(horizon):
            carry = step(i, carry)
    else:
        # large horizon: bounded live ranges, scheduler-visible loop
        carry = lax.fori_loop(0, horizon, step, carry, unroll=4)
    _, _, _, _, dist_acc, ang_acc = carry

    # one cross-lane reduction per accumulator + scalar fma into SMEM
    out_ref[0, 0] = (jnp.sum(dist_acc) * dist_scale
                     + jnp.sum(ang_acc) * ang_scale)


def multi_vehicle_loss(states, refs, controls, *, horizon, num_vehicle,
                       distance_cost=10.0, angle_cost=5.0, velocity_cost=1.0,
                       dt=0.2):
    """JAX/Pallas equivalent of Loss(horizon, num_vehicle, ...).forward.

    Note: velocity_cost is accepted but unused — this matches the reference
    PyTorch forward, which never applies it.
    """
    B = states.shape[0]
    assert states.shape[1] == num_vehicle and states.shape[2] == 4
    assert refs.shape[1] == num_vehicle and refs.shape[2] == 3
    assert controls.shape[0] == B and controls.shape[1] == horizon
    assert controls.shape[2] == num_vehicle and controls.shape[3] == 2

    n = B * num_vehicle
    num_tiles = max(1, pl.cdiv(n, _LANES_PER_TILE))
    n_pad = num_tiles * _LANES_PER_TILE
    r_total = num_tiles * _SUBLANE_TILE

    # Component-major, lane-dense layout (cheap glue at these sizes; see the
    # TODO at the top about producer-side layout for large problems).
    s = jnp.transpose(states.astype(jnp.float32), (2, 0, 1)).reshape(4, n)
    r = jnp.transpose(refs.astype(jnp.float32), (2, 0, 1)).reshape(3, n)
    c = jnp.transpose(controls.astype(jnp.float32), (3, 1, 0, 2)).reshape(
        2, horizon, n)

    pad = n_pad - n
    if pad:
        # zero padding: padded lanes roll out to zeros and contribute 0 cost
        s = jnp.pad(s, ((0, 0), (0, pad)))
        r = jnp.pad(r, ((0, 0), (0, pad)))
        c = jnp.pad(c, ((0, 0), (0, 0), (0, pad)))

    # fold lanes into full (8, 128) vreg slabs
    s = s.reshape(4, r_total, _LANE)
    r = r.reshape(3, r_total, _LANE)
    accel = c[0].reshape(horizon, r_total, _LANE)
    steer = c[1].reshape(horizon, r_total, _LANE)

    n_elems = float((horizon + 1) * n)     # mean over the *unpadded* history
    kernel = functools.partial(
        _loss_kernel,
        horizon=horizon,
        dt=float(dt),
        dist_scale=float(distance_cost) / n_elems,
        ang_scale=float(angle_cost) / n_elems,
        unrolled=(horizon <= 32),
    )

    partials = pl.pallas_call(
        kernel,
        out_shape=jax.ShapeDtypeStruct((num_tiles, 1), jnp.float32),
        grid_spec=pltpu.PrefetchScalarGridSpec(
            num_scalar_prefetch=0,
            grid=(num_tiles,),
            in_specs=[
                pl.BlockSpec((4, _SUBLANE_TILE, _LANE), lambda t: (0, t, 0)),
                pl.BlockSpec((3, _SUBLANE_TILE, _LANE), lambda t: (0, t, 0)),
                pl.BlockSpec((horizon, _SUBLANE_TILE, _LANE),
                             lambda t: (0, t, 0)),
                pl.BlockSpec((horizon, _SUBLANE_TILE, _LANE),
                             lambda t: (0, t, 0)),
            ],
            out_specs=pl.BlockSpec((1, 1), lambda t: (t, 0),
                                   memory_space=pltpu.SMEM),
            scratch_shapes=[
                pltpu.VMEM((horizon, _SUBLANE_TILE, _LANE), jnp.float32),
            ],
        ),
        compiler_params=pltpu.CompilerParams(
            dimension_semantics=("parallel",)),
    )(s, r, accel, steer)

    return jnp.sum(partials)


def _reference_loss(states, refs, controls, *, horizon,
                    distance_cost=10.0, angle_cost=5.0, dt=0.2):
    """Pure-JAX port of the PyTorch forward for validation."""
    hist = [states]
    cur = states
    for i in range(horizon):
        ci = controls[:, i]
        x_t = cur[:, :, 0] + cur[:, :, 3] * jnp.cos(cur[:, :, 2]) * dt
        y_t = cur[:, :, 1] + cur[:, :, 3] * jnp.sin(cur[:, :, 2]) * dt
        psi_t = cur[:, :, 2] + cur[:, :, 3] * dt * jnp.tan(ci[:, :, 1]) / 2.0
        v_t = cur[:, :, 3] + ci[:, :, 0] * dt
        cur = jnp.stack([x_t, y_t, psi_t, v_t], axis=2)
        hist.append(cur)
    sh = jnp.stack(hist, axis=0)                          # (H+1, B, V, 4)
    dist = jnp.linalg.norm(sh[:, :, :, :2] - refs[:, :, :2], axis=3)
    ang = jnp.abs(sh[:, :, :, 2] - refs[:, :, 2])
    return jnp.mean(dist) * distance_cost + jnp.mean(ang) * angle_cost


if __name__ == "__main__":
    # Small, deterministic example shapes consistent with the module.
    B, H, V = 2, 8, 4  # batch, horizon, num_vehicle
    key = jax.random.PRNGKey(0)
    k1, k2, k3 = jax.random.split(key, 3)
    states = jax.random.normal(k1, (B, V, 4), dtype=jnp.float32)
    refs = jax.random.normal(k2, (B, V, 3), dtype=jnp.float32)
    # keep steering angles modest so tan() is well-behaved
    controls = 0.3 * jax.random.normal(k3, (B, H, V, 2), dtype=jnp.float32)

    loss = multi_vehicle_loss(
        states, refs, controls,
        horizon=H, num_vehicle=V,
        distance_cost=10.0, angle_cost=5.0, velocity_cost=1.0,
    )
    loss = jax.block_until_ready(loss)

    ref = jax.block_until_ready(
        _reference_loss(states, refs, controls, horizon=H,
                        distance_cost=10.0, angle_cost=5.0)
    )
    np.testing.assert_allclose(np.asarray(loss), np.asarray(ref),
                               rtol=1e-4, atol=1e-4)
    print("KERNEL_OK")
</pallas_src>

<mosaic_0001>
module attributes {stable_mosaic.version = 11 : i64} {
  func.func @_loss_kernel(%arg0: i32, %arg1: memref<4x8x128xf32, #tpu.memory_space<vmem>>, %arg2: memref<3x8x128xf32, #tpu.memory_space<vmem>>, %arg3: memref<8x8x128xf32, #tpu.memory_space<vmem>>, %arg4: memref<8x8x128xf32, #tpu.memory_space<vmem>>, %arg5: memref<1x1xf32, #tpu.memory_space<smem>>, %arg6: memref<8x8x128xf32, #tpu.memory_space<vmem>>) attributes {dimension_semantics = [#tpu.dimension_semantics<parallel>], iteration_bounds = array<i64: 1>, scalar_prefetch = 0 : i64, scratch_operands = 1 : i64, tpu.core_type = #tpu.core_type<tc>, window_params = [{transform_indices = @transform_0, window_bounds = array<i64: 4, 8, 128>}, {transform_indices = @transform_1, window_bounds = array<i64: 3, 8, 128>}, {transform_indices = @transform_2, window_bounds = array<i64: 8, 8, 128>}, {transform_indices = @transform_3, window_bounds = array<i64: 8, 8, 128>}, {transform_indices = @transform_4, window_bounds = array<i64: 1, 1>}]} {
    %c0 = arith.constant 0 : index
    %c0_0 = arith.constant 0 : index
    %c0_1 = arith.constant 0 : index
    %0 = vector.load %arg2[%c0, %c0_0, %c0_1] : memref<3x8x128xf32, #tpu.memory_space<vmem>>, vector<1x8x128xf32>
    %1 = vector.shape_cast %0 : vector<1x8x128xf32> to vector<8x128xf32>
    %c1 = arith.constant 1 : index
    %c0_2 = arith.constant 0 : index
    %c0_3 = arith.constant 0 : index
    %2 = vector.load %arg2[%c1, %c0_2, %c0_3] : memref<3x8x128xf32, #tpu.memory_space<vmem>>, vector<1x8x128xf32>
    %3 = vector.shape_cast %2 : vector<1x8x128xf32> to vector<8x128xf32>
    %c2 = arith.constant 2 : index
    %c0_4 = arith.constant 0 : index
    %c0_5 = arith.constant 0 : index
    %4 = vector.load %arg2[%c2, %c0_4, %c0_5] : memref<3x8x128xf32, #tpu.memory_space<vmem>>, vector<1x8x128xf32>
    %5 = vector.shape_cast %4 : vector<1x8x128xf32> to vector<8x128xf32>
    %c0_6 = arith.constant 0 : index
    %c0_7 = arith.constant 0 : index
    %c0_8 = arith.constant 0 : index
    %6 = vector.load %arg4[%c0_6, %c0_7, %c0_8] : memref<8x8x128xf32, #tpu.memory_space<vmem>>, vector<8x8x128xf32>
    %7 = math.sin %6 : vector<8x8x128xf32>
    %8 = math.cos %6 : vector<8x8x128xf32>
    %9 = arith.divf %7, %8 : vector<8x8x128xf32>
    %cst = arith.constant 1.000000e-01 : f32
    %10 = vector.broadcast %cst : f32 to vector<8x8x128xf32>
    %11 = arith.mulf %9, %10 : vector<8x8x128xf32>
    %c0_9 = arith.constant 0 : index
    %c0_10 = arith.constant 0 : index
    %c0_11 = arith.constant 0 : index
    %12 = vector.load %arg6[%c0_9, %c0_10, %c0_11] : memref<8x8x128xf32, #tpu.memory_space<vmem>>, vector<8x8x128xf32>
    tpu.vector_store %arg6[%c0_9, %c0_10, %c0_11], %11 {strides = array<i32>} : memref<8x8x128xf32, #tpu.memory_space<vmem>>, vector<8x8x128xf32>,
    %c0_12 = arith.constant 0 : index
    %c0_13 = arith.constant 0 : index
    %c0_14 = arith.constant 0 : index
    %13 = vector.load %arg1[%c0_12, %c0_13, %c0_14] : memref<4x8x128xf32, #tpu.memory_space<vmem>>, vector<1x8x128xf32>
    %14 = vector.shape_cast %13 : vector<1x8x128xf32> to vector<8x128xf32>
    %c1_15 = arith.constant 1 : index
    %c0_16 = arith.constant 0 : index
    %c0_17 = arith.constant 0 : index
    %15 = vector.load %arg1[%c1_15, %c0_16, %c0_17] : memref<4x8x128xf32, #tpu.memory_space<vmem>>, vector<1x8x128xf32>
    %16 = vector.shape_cast %15 : vector<1x8x128xf32> to vector<8x128xf32>
    %c2_18 = arith.constant 2 : index
    %c0_19 = arith.constant 0 : index
    %c0_20 = arith.constant 0 : index
    %17 = vector.load %arg1[%c2_18, %c0_19, %c0_20] : memref<4x8x128xf32, #tpu.memory_space<vmem>>, vector<1x8x128xf32>
    %18 = vector.shape_cast %17 : vector<1x8x128xf32> to vector<8x128xf32>
    %c3 = arith.constant 3 : index
    %c0_21 = arith.constant 0 : index
    %c0_22 = arith.constant 0 : index
    %19 = vector.load %arg1[%c3, %c0_21, %c0_22] : memref<4x8x128xf32, #tpu.memory_space<vmem>>, vector<1x8x128xf32>
    %20 = vector.shape_cast %19 : vector<1x8x128xf32> to vector<8x128xf32>
    %21 = arith.subf %14, %1 : vector<8x128xf32>
    %22 = arith.subf %16, %3 : vector<8x128xf32>
    %23 = arith.mulf %21, %21 : vector<8x128xf32>
    %24 = arith.mulf %22, %22 : vector<8x128xf32>
    %25 = arith.addf %23, %24 : vector<8x128xf32>
    %26 = math.sqrt %25 : vector<8x128xf32>
    %27 = arith.subf %18, %5 : vector<8x128xf32>
    %28 = math.absf %27 : vector<8x128xf32>
    %c0_23 = arith.constant 0 : index
    %c0_24 = arith.constant 0 : index
    %c0_25 = arith.constant 0 : index
    %29 = vector.load %arg3[%c0_23, %c0_24, %c0_25] : memref<8x8x128xf32, #tpu.memory_space<vmem>>, vector<1x8x128xf32>
    %30 = vector.shape_cast %29 : vector<1x8x128xf32> to vector<8x128xf32>
    %cst_26 = arith.constant 2.000000e-01 : f32
    %31 = vector.broadcast %cst_26 : f32 to vector<8x128xf32>
    %32 = arith.mulf %30, %31 : vector<8x128xf32>
    %c0_27 = arith.constant 0 : index
    %c0_28 = arith.constant 0 : index
    %c0_29 = arith.constant 0 : index
    %33 = vector.load %arg6[%c0_27, %c0_28, %c0_29] : memref<8x8x128xf32, #tpu.memory_space<vmem>>, vector<1x8x128xf32>
    %34 = vector.shape_cast %33 : vector<1x8x128xf32> to vector<8x128xf32>
    %cst_30 = arith.constant 2.000000e-01 : f32
    %35 = vector.broadcast %cst_30 : f32 to vector<8x128xf32>
    %36 = arith.mulf %20, %35 : vector<8x128xf32>
    %37 = math.cos %18 : vector<8x128xf32>
    %38 = arith.mulf %36, %37 : vector<8x128xf32>
    %39 = arith.addf %14, %38 : vector<8x128xf32>
    %40 = math.sin %18 : vector<8x128xf32>
    %41 = arith.mulf %36, %40 : vector<8x128xf32>
    %42 = arith.addf %16, %41 : vector<8x128xf32>
    %43 = arith.mulf %20, %34 : vector<8x128xf32>
    %44 = arith.addf %18, %43 : vector<8x128xf32>
    %45 = arith.addf %20, %32 : vector<8x128xf32>
    %46 = arith.subf %39, %1 : vector<8x128xf32>
    %47 = arith.subf %42, %3 : vector<8x128xf32>
    %48 = arith.mulf %46, %46 : vector<8x128xf32>
    %49 = arith.mulf %47, %47 : vector<8x128xf32>
    %50 = arith.addf %48, %49 : vector<8x128xf32>
    %51 = math.sqrt %50 : vector<8x128xf32>
    %52 = arith.addf %26, %51 : vector<8x128xf32>
    %53 = arith.subf %44, %5 : vector<8x128xf32>
    %54 = math.absf %53 : vector<8x128xf32>
    %55 = arith.addf %28, %54 : vector<8x128xf32>
    %c1_31 = arith.constant 1 : index
    %c0_32 = arith.constant 0 : index
    %c0_33 = arith.constant 0 : index
    %56 = vector.load %arg3[%c1_31, %c0_32, %c0_33] : memref<8x8x128xf32, #tpu.memory_space<vmem>>, vector<1x8x128xf32>
    %57 = vector.shape_cast %56 : vector<1x8x128xf32> to vector<8x128xf32>
    %cst_34 = arith.constant 2.000000e-01 : f32
    %58 = vector.broadcast %cst_34 : f32 to vector<8x128xf32>
    %59 = arith.mulf %57, %58 : vector<8x128xf32>
    %c1_35 = arith.constant 1 : index
    %c0_36 = arith.constant 0 : index
    %c0_37 = arith.constant 0 : index
    %60 = vector.load %arg6[%c1_35, %c0_36, %c0_37] : memref<8x8x128xf32, #tpu.memory_space<vmem>>, vector<1x8x128xf32>
    %61 = vector.shape_cast %60 : vector<1x8x128xf32> to vector<8x128xf32>
    %cst_38 = arith.constant 2.000000e-01 : f32
    %62 = vector.broadcast %cst_38 : f32 to vector<8x128xf32>
    %63 = arith.mulf %45, %62 : vector<8x128xf32>
    %64 = math.cos %44 : vector<8x128xf32>
    %65 = arith.mulf %63, %64 : vector<8x128xf32>
    %66 = arith.addf %39, %65 : vector<8x128xf32>
    %67 = math.sin %44 : vector<8x128xf32>
    %68 = arith.mulf %63, %67 : vector<8x128xf32>
    %69 = arith.addf %42, %68 : vector<8x128xf32>
    %70 = arith.mulf %45, %61 : vector<8x128xf32>
    %71 = arith.addf %44, %70 : vector<8x128xf32>
    %72 = arith.addf %45, %59 : vector<8x128xf32>
    %73 = arith.subf %66, %1 : vector<8x128xf32>
    %74 = arith.subf %69, %3 : vector<8x128xf32>
    %75 = arith.mulf %73, %73 : vector<8x128xf32>
    %76 = arith.mulf %74, %74 : vector<8x128xf32>
    %77 = arith.addf %75, %76 : vector<8x128xf32>
    %78 = math.sqrt %77 : vector<8x128xf32>
    %79 = arith.addf %52, %78 : vector<8x128xf32>
    %80 = arith.subf %71, %5 : vector<8x128xf32>
    %81 = math.absf %80 : vector<8x128xf32>
    %82 = arith.addf %55, %81 : vector<8x128xf32>
    %c2_39 = arith.constant 2 : index
    %c0_40 = arith.constant 0 : index
    %c0_41 = arith.constant 0 : index
    %83 = vector.load %arg3[%c2_39, %c0_40, %c0_41] : memref<8x8x128xf32, #tpu.memory_space<vmem>>, vector<1x8x128xf32>
    %84 = vector.shape_cast %83 : vector<1x8x128xf32> to vector<8x128xf32>
    %cst_42 = arith.constant 2.000000e-01 : f32
    %85 = vector.broadcast %cst_42 : f32 to vector<8x128xf32>
    %86 = arith.mulf %84, %85 : vector<8x128xf32>
    %c2_43 = arith.constant 2 : index
    %c0_44 = arith.constant 0 : index
    %c0_45 = arith.constant 0 : index
    %87 = vector.load %arg6[%c2_43, %c0_44, %c0_45] : memref<8x8x128xf32, #tpu.memory_space<vmem>>, vector<1x8x128xf32>
    %88 = vector.shape_cast %87 : vector<1x8x128xf32> to vector<8x128xf32>
    %cst_46 = arith.constant 2.000000e-01 : f32
    %89 = vector.broadcast %cst_46 : f32 to vector<8x128xf32>
    %90 = arith.mulf %72, %89 : vector<8x128xf32>
    %91 = math.cos %71 : vector<8x128xf32>
    %92 = arith.mulf %90, %91 : vector<8x128xf32>
    %93 = arith.addf %66, %92 : vector<8x128xf32>
    %94 = math.sin %71 : vector<8x128xf32>
    %95 = arith.mulf %90, %94 : vector<8x128xf32>
    %96 = arith.addf %69, %95 : vector<8x128xf32>
    %97 = arith.mulf %72, %88 : vector<8x128xf32>
    %98 = arith.addf %71, %97 : vector<8x128xf32>
    %99 = arith.addf %72, %86 : vector<8x128xf32>
    %100 = arith.subf %93, %1 : vector<8x128xf32>
    %101 = arith.subf %96, %3 : vector<8x128xf32>
    %102 = arith.mulf %100, %100 : vector<8x128xf32>
    %103 = arith.mulf %101, %101 : vector<8x128xf32>
    %104 = arith.addf %102, %103 : vector<8x128xf32>
    %105 = math.sqrt %104 : vector<8x128xf32>
    %106 = arith.addf %79, %105 : vector<8x128xf32>
    %107 = arith.subf %98, %5 : vector<8x128xf32>
    %108 = math.absf %107 : vector<8x128xf32>
    %109 = arith.addf %82, %108 : vector<8x128xf32>
    %c3_47 = arith.constant 3 : index
    %c0_48 = arith.constant 0 : index
    %c0_49 = arith.constant 0 : index
    %110 = vector.load %arg3[%c3_47, %c0_48, %c0_49] : memref<8x8x128xf32, #tpu.memory_space<vmem>>, vector<1x8x128xf32>
    %111 = vector.shape_cast %110 : vector<1x8x128xf32> to vector<8x128xf32>
    %cst_50 = arith.constant 2.000000e-01 : f32
    %112 = vector.broadcast %cst_50 : f32 to vector<8x128xf32>
    %113 = arith.mulf %111, %112 : vector<8x128xf32>
    %c3_51 = arith.constant 3 : index
    %c0_52 = arith.constant 0 : index
    %c0_53 = arith.constant 0 : index
    %114 = vector.load %arg6[%c3_51, %c0_52, %c0_53] : memref<8x8x128xf32, #tpu.memory_space<vmem>>, vector<1x8x128xf32>
    %115 = vector.shape_cast %114 : vector<1x8x128xf32> to vector<8x128xf32>
    %cst_54 = arith.constant 2.000000e-01 : f32
    %116 = vector.broadcast %cst_54 : f32 to vector<8x128xf32>
    %117 = arith.mulf %99, %116 : vector<8x128xf32>
    %118 = math.cos %98 : vector<8x128xf32>
    %119 = arith.mulf %117, %118 : vector<8x128xf32>
    %120 = arith.addf %93, %119 : vector<8x128xf32>
    %121 = math.sin %98 : vector<8x128xf32>
    %122 = arith.mulf %117, %121 : vector<8x128xf32>
    %123 = arith.addf %96, %122 : vector<8x128xf32>
    %124 = arith.mulf %99, %115 : vector<8x128xf32>
    %125 = arith.addf %98, %124 : vector<8x128xf32>
    %126 = arith.addf %99, %113 : vector<8x128xf32>
    %127 = arith.subf %120, %1 : vector<8x128xf32>
    %128 = arith.subf %123, %3 : vector<8x128xf32>
    %129 = arith.mulf %127, %127 : vector<8x128xf32>
    %130 = arith.mulf %128, %128 : vector<8x128xf32>
    %131 = arith.addf %129, %130 : vector<8x128xf32>
    %132 = math.sqrt %131 : vector<8x128xf32>
    %133 = arith.addf %106, %132 : vector<8x128xf32>
    %134 = arith.subf %125, %5 : vector<8x128xf32>
    %135 = math.absf %134 : vector<8x128xf32>
    %136 = arith.addf %109, %135 : vector<8x128xf32>
    %c4 = arith.constant 4 : index
    %c0_55 = arith.constant 0 : index
    %c0_56 = arith.constant 0 : index
    %137 = vector.load %arg3[%c4, %c0_55, %c0_56] : memref<8x8x128xf32, #tpu.memory_space<vmem>>, vector<1x8x128xf32>
    %138 = vector.shape_cast %137 : vector<1x8x128xf32> to vector<8x128xf32>
    %cst_57 = arith.constant 2.000000e-01 : f32
    %139 = vector.broadcast %cst_57 : f32 to vector<8x128xf32>
    %140 = arith.mulf %138, %139 : vector<8x128xf32>
    %c4_58 = arith.constant 4 : index
    %c0_59 = arith.constant 0 : index
    %c0_60 = arith.constant 0 : index
    %141 = vector.load %arg6[%c4_58, %c0_59, %c0_60] : memref<8x8x128xf32, #tpu.memory_space<vmem>>, vector<1x8x128xf32>
    %142 = vector.shape_cast %141 : vector<1x8x128xf32> to vector<8x128xf32>
    %cst_61 = arith.constant 2.000000e-01 : f32
    %143 = vector.broadcast %cst_61 : f32 to vector<8x128xf32>
    %144 = arith.mulf %126, %143 : vector<8x128xf32>
    %145 = math.cos %125 : vector<8x128xf32>
    %146 = arith.mulf %144, %145 : vector<8x128xf32>
    %147 = arith.addf %120, %146 : vector<8x128xf32>
    %148 = math.sin %125 : vector<8x128xf32>
    %149 = arith.mulf %144, %148 : vector<8x128xf32>
    %150 = arith.addf %123, %149 : vector<8x128xf32>
    %151 = arith.mulf %126, %142 : vector<8x128xf32>
    %152 = arith.addf %125, %151 : vector<8x128xf32>
    %153 = arith.addf %126, %140 : vector<8x128xf32>
    %154 = arith.subf %147, %1 : vector<8x128xf32>
    %155 = arith.subf %150, %3 : vector<8x128xf32>
    %156 = arith.mulf %154, %154 : vector<8x128xf32>
    %157 = arith.mulf %155, %155 : vector<8x128xf32>
    %158 = arith.addf %156, %157 : vector<8x128xf32>
    %159 = math.sqrt %158 : vector<8x128xf32>
    %160 = arith.addf %133, %159 : vector<8x128xf32>
    %161 = arith.subf %152, %5 : vector<8x128xf32>
    %162 = math.absf %161 : vector<8x128xf32>
    %163 = arith.addf %136, %162 : vector<8x128xf32>
    %c5 = arith.constant 5 : index
    %c0_62 = arith.constant 0 : index
    %c0_63 = arith.constant 0 : index
    %164 = vector.load %arg3[%c5, %c0_62, %c0_63] : memref<8x8x128xf32, #tpu.memory_space<vmem>>, vector<1x8x128xf32>
    %165 = vector.shape_cast %164 : vector<1x8x128xf32> to vector<8x128xf32>
    %cst_64 = arith.constant 2.000000e-01 : f32
    %166 = vector.broadcast %cst_64 : f32 to vector<8x128xf32>
    %167 = arith.mulf %165, %166 : vector<8x128xf32>
    %c5_65 = arith.constant 5 : index
    %c0_66 = arith.constant 0 : index
    %c0_67 = arith.constant 0 : index
    %168 = vector.load %arg6[%c5_65, %c0_66, %c0_67] : memref<8x8x128xf32, #tpu.memory_space<vmem>>, vector<1x8x128xf32>
    %169 = vector.shape_cast %168 : vector<1x8x128xf32> to vector<8x128xf32>
    %cst_68 = arith.constant 2.000000e-01 : f32
    %170 = vector.broadcast %cst_68 : f32 to vector<8x128xf32>
    %171 = arith.mulf %153, %170 : vector<8x128xf32>
    %172 = math.cos %152 : vector<8x128xf32>
    %173 = arith.mulf %171, %172 : vector<8x128xf32>
    %174 = arith.addf %147, %173 : vector<8x128xf32>
    %175 = math.sin %152 : vector<8x128xf32>
    %176 = arith.mulf %171, %175 : vector<8x128xf32>
    %177 = arith.addf %150, %176 : vector<8x128xf32>
    %178 = arith.mulf %153, %169 : vector<8x128xf32>
    %179 = arith.addf %152, %178 : vector<8x128xf32>
    %180 = arith.addf %153, %167 : vector<8x128xf32>
    %181 = arith.subf %174, %1 : vector<8x128xf32>
    %182 = arith.subf %177, %3 : vector<8x128xf32>
    %183 = arith.mulf %181, %181 : vector<8x128xf32>
    %184 = arith.mulf %182, %182 : vector<8x128xf32>
    %185 = arith.addf %183, %184 : vector<8x128xf32>
    %186 = math.sqrt %185 : vector<8x128xf32>
    %187 = arith.addf %160, %186 : vector<8x128xf32>
    %188 = arith.subf %179, %5 : vector<8x128xf32>
    %189 = math.absf %188 : vector<8x128xf32>
    %190 = arith.addf %163, %189 : vector<8x128xf32>
    %c6 = arith.constant 6 : index
    %c0_69 = arith.constant 0 : index
    %c0_70 = arith.constant 0 : index
    %191 = vector.load %arg3[%c6, %c0_69, %c0_70] : memref<8x8x128xf32, #tpu.memory_space<vmem>>, vector<1x8x128xf32>
    %192 = vector.shape_cast %191 : vector<1x8x128xf32> to vector<8x128xf32>
    %cst_71 = arith.constant 2.000000e-01 : f32
    %193 = vector.broadcast %cst_71 : f32 to vector<8x128xf32>
    %194 = arith.mulf %192, %193 : vector<8x128xf32>
    %c6_72 = arith.constant 6 : index
    %c0_73 = arith.constant 0 : index
    %c0_74 = arith.constant 0 : index
    %195 = vector.load %arg6[%c6_72, %c0_73, %c0_74] : memref<8x8x128xf32, #tpu.memory_space<vmem>>, vector<1x8x128xf32>
    %196 = vector.shape_cast %195 : vector<1x8x128xf32> to vector<8x128xf32>
    %cst_75 = arith.constant 2.000000e-01 : f32
    %197 = vector.broadcast %cst_75 : f32 to vector<8x128xf32>
    %198 = arith.mulf %180, %197 : vector<8x128xf32>
    %199 = math.cos %179 : vector<8x128xf32>
    %200 = arith.mulf %198, %199 : vector<8x128xf32>
    %201 = arith.addf %174, %200 : vector<8x128xf32>
    %202 = math.sin %179 : vector<8x128xf32>
    %203 = arith.mulf %198, %202 : vector<8x128xf32>
    %204 = arith.addf %177, %203 : vector<8x128xf32>
    %205 = arith.mulf %180, %196 : vector<8x128xf32>
    %206 = arith.addf %179, %205 : vector<8x128xf32>
    %207 = arith.addf %180, %194 : vector<8x128xf32>
    %208 = arith.subf %201, %1 : vector<8x128xf32>
    %209 = arith.subf %204, %3 : vector<8x128xf32>
    %210 = arith.mulf %208, %208 : vector<8x128xf32>
    %211 = arith.mulf %209, %209 : vector<8x128xf32>
    %212 = arith.addf %210, %211 : vector<8x128xf32>
    %213 = math.sqrt %212 : vector<8x128xf32>
    %214 = arith.addf %187, %213 : vector<8x128xf32>
    %215 = arith.subf %206, %5 : vector<8x128xf32>
    %216 = math.absf %215 : vector<8x128xf32>
    %217 = arith.addf %190, %216 : vector<8x128xf32>
    %c7 = arith.constant 7 : index
    %c0_76 = arith.constant 0 : index
    %c0_77 = arith.constant 0 : index
    %218 = vector.load %arg6[%c7, %c0_76, %c0_77] : memref<8x8x128xf32, #tpu.memory_space<vmem>>, vector<1x8x128xf32>
    %219 = vector.shape_cast %218 : vector<1x8x128xf32> to vector<8x128xf32>
    %cst_78 = arith.constant 2.000000e-01 : f32
    %220 = vector.broadcast %cst_78 : f32 to vector<8x128xf32>
    %221 = arith.mulf %207, %220 : vector<8x128xf32>
    %222 = math.cos %206 : vector<8x128xf32>
    %223 = arith.mulf %221, %222 : vector<8x128xf32>
    %224 = arith.addf %201, %223 : vector<8x128xf32>
    %225 = math.sin %206 : vector<8x128xf32>
    %226 = arith.mulf %221, %225 : vector<8x128xf32>
    %227 = arith.addf %204, %226 : vector<8x128xf32>
    %228 = arith.mulf %207, %219 : vector<8x128xf32>
    %229 = arith.addf %206, %228 : vector<8x128xf32>
    %230 = arith.subf %224, %1 : vector<8x128xf32>
    %231 = arith.subf %227, %3 : vector<8x128xf32>
    %232 = arith.mulf %230, %230 : vector<8x128xf32>
    %233 = arith.mulf %231, %231 : vector<8x128xf32>
    %234 = arith.addf %232, %233 : vector<8x128xf32>
    %235 = math.sqrt %234 : vector<8x128xf32>
    %236 = arith.addf %214, %235 : vector<8x128xf32>
    %237 = arith.subf %229, %5 : vector<8x128xf32>
    %238 = math.absf %237 : vector<8x128xf32>
    %239 = arith.addf %217, %238 : vector<8x128xf32>
    %240 = vector.shape_cast %236 : vector<8x128xf32> to vector<1x8x128xf32>
    %cst_79 = arith.constant dense<0.000000e+00> : vector<1xf32>
    %241 = vector.multi_reduction <add>, %240, %cst_79 [1, 2] : vector<1x8x128xf32> to vector<1xf32>
    %242 = vector.shape_cast %241 : vector<1xf32> to vector<1x1x1xf32>
    %243 = vector.extract %242[0, 0, 0] : f32 from vector<1x1x1xf32>
    %cst_80 = arith.constant 0.138888896 : f32
    %244 = arith.mulf %243, %cst_80 : f32
    %245 = vector.shape_cast %239 : vector<8x128xf32> to vector<1x8x128xf32>
    %cst_81 = arith.constant dense<0.000000e+00> : vector<1xf32>
    %246 = vector.multi_reduction <add>, %245, %cst_81 [1, 2] : vector<1x8x128xf32> to vector<1xf32>
    %247 = vector.shape_cast %246 : vector<1xf32> to vector<1x1x1xf32>
    %248 = vector.extract %247[0, 0, 0] : f32 from vector<1x1x1xf32>
    %cst_82 = arith.constant 0.0694444477 : f32
    %249 = arith.mulf %248, %cst_82 : f32
    %250 = arith.addf %244, %249 : f32
    %c0_83 = arith.constant 0 : index
    %c0_84 = arith.constant 0 : index
    %251 = memref.load %arg5[%c0_83, %c0_84] : memref<1x1xf32, #tpu.memory_space<smem>>
    memref.store %250, %arg5[%c0_83, %c0_84] : memref<1x1xf32, #tpu.memory_space<smem>>
    return
  }
  func.func @transform_0(%arg0: i32) -> (i32, i32, i32) {
    %c0_i32 = arith.constant 0 : i32
    %c0_i32_0 = arith.constant 0 : i32
    %c0_i32_1 = arith.constant 0 : i32
    return %c0_i32, %arg0, %c0_i32_0 : i32, i32, i32
  }
  func.func @transform_1(%arg0: i32) -> (i32, i32, i32) {
    %c0_i32 = arith.constant 0 : i32
    %c0_i32_0 = arith.constant 0 : i32
    %c0_i32_1 = arith.constant 0 : i32
    return %c0_i32, %arg0, %c0_i32_0 : i32, i32, i32
  }
  func.func @transform_2(%arg0: i32) -> (i32, i32, i32) {
    %c0_i32 = arith.constant 0 : i32
    %c0_i32_0 = arith.constant 0 : i32
    %c0_i32_1 = arith.constant 0 : i32
    return %c0_i32, %arg0, %c0_i32_0 : i32, i32, i32
  }
  func.func @transform_3(%arg0: i32) -> (i32, i32, i32) {
    %c0_i32 = arith.constant 0 : i32
    %c0_i32_0 = arith.constant 0 : i32
    %c0_i32_1 = arith.constant 0 : i32
    return %c0_i32, %arg0, %c0_i32_0 : i32, i32, i32
  }
  func.func @transform_4(%arg0: i32) -> (i32, i32) {
    %c0_i32 = arith.constant 0 : i32
    %c0_i32_0 = arith.constant 0 : i32
    return %arg0, %c0_i32 : i32, i32
  }
}

</mosaic_0001>

<bundles_post_ra>
// kernel: tpu_custom_call.1
= control target key start
LH: loop header
LB: loop body
LE: loop exit
PB: predicated region body
PF: predicated region fallthrough
CT: control target
= control target key end

     0   :  { %9 = vsyncpa [#allocation4], 0  ;;  %s6188_s0 = inlined_call_operand.hbm [shape: f32[4,8,128], index: 0, kind: input, shape index: {}]   ;;  %s6189_s1 = inlined_call_operand.hbm [shape: f32[3,8,128], index: 1, kind: input, shape index: {}]   ;;  %s6190_s2 = inlined_call_operand.hbm [shape: f32[8,8,128], index: 2, kind: input, shape index: {}]   ;;  %s6191_s3 = inlined_call_operand.hbm [shape: f32[8,8,128], index: 3, kind: input, shape index: {}]   ;;  %s6192_s4 = inlined_call_operand.hbm [shape: f32[1,1], index: 4, kind: output, shape index: {}]  }
   0x1   :  { %10 = vsyncpa [#allocation7], 0 }
   0x2   :  { %11 = vsyncpa [#allocation10], 0 }
   0x3   :  { %12 = vsyncpa [#allocation5], 0  ;;  %s4128_s15 = smov [#allocation6]   ;;  %s4129_s17 = smov [#allocation3]  }
   0x4   :  { %s30_s16 = sshll.u32 %s4128_s15, 4  ;;  %s18_s18 = sshll.u32 %s4129_s17, 4  ;;  %s31_s16 = int_to_ptr.vmem [resolvable:$true] %s30_s16  ;;  %s19_s18 = int_to_ptr.vmem [resolvable:$true] %s18_s18 }
   0x5   :  { %s4040_s19 = scalar_lea.vmem %s31_s16, 384  ;;  %p4045_p1 = scmp.lt.s32.totalorder %s31_s16, %s31_s16 }
   0x6   :  { %p4041_p0 = scmp.ne.s32.totalorder %s31_s16, %s4040_s19  ;;  %p4046_p2 = scmp.lt.s32.totalorder %s4040_s19, %s4040_s19 }
   0x8   :  { %p4047_p3 = por %p4046_p2, %p4045_p1 }
   0xa   :  { %p4048_p4 = pnand %p4047_p3, %p4041_p0 }
   0xc   :  { %4051 = shalt.err (!%p4048_p4)
}
   0xd   :  { %s4130_s20 = smov 128   ;;  %s4131_s21 = smov 8  }
   0xe   :  { %36 = dma.hbm_to_vmem [thread:$0]  %s6189_s1, 384, %s31_s16, [#allocation7], %s4130_s20, %s4130_s20, %s4131_s21  }
   0xf   :  { %s4060_s24 = scalar_lea.vmem %s19_s18, 512  ;;  %p4065_p6 = scmp.lt.s32.totalorder %s19_s18, %s19_s18 }
  0x10   :  { %p4061_p5 = scmp.ne.s32.totalorder %s19_s18, %s4060_s24  ;;  %p4066_p7 = scmp.lt.s32.totalorder %s4060_s24, %s4060_s24 }
  0x12   :  { %p4067_p8 = por %p4066_p7, %p4065_p6 }
  0x14   :  { %p4068_p9 = pnand %p4067_p8, %p4061_p5 }
  0x16   :  { %4071 = shalt.err (!%p4068_p9)
}
  0x17   :  { %24 = dma.hbm_to_vmem [thread:$0]  %s6188_s0, 512, %s19_s18, [#allocation4], %s4130_s20, %s4130_s20, %s4131_s21  }
  0x18   :  { %s4132_s27 = smov [#allocation8]   ;;  %s4133_s29 = smov [#allocation9]  }
  0x19   :  { %s42_s28 = sshll.u32 %s4132_s27, 4  ;;  %s54_s30 = sshll.u32 %s4133_s29, 4  ;;  %s43_s28 = int_to_ptr.vmem [resolvable:$true] %s42_s28  ;;  %s55_s30 = int_to_ptr.vmem [resolvable:$true] %s54_s30 }
  0x1a   :  { %s4080_s1 = scalar_lea.vmem %s43_s28, 1024  ;;  %p4085_p11 = scmp.lt.s32.totalorder %s43_s28, %s43_s28 }
  0x1b   :  { %p4081_p10 = scmp.ne.s32.totalorder %s43_s28, %s4080_s1  ;;  %p4086_p12 = scmp.lt.s32.totalorder %s4080_s1, %s4080_s1 }
  0x1d   :  { %p4087_p13 = por %p4086_p12, %p4085_p11 }
  0x1f   :  { %p4088_p0 = pnand %p4087_p13, %p4081_p10 }
  0x21   :  { %4091 = shalt.err (!%p4088_p0)
}
  0x22   :  { %48 = dma.hbm_to_vmem [thread:$0]  %s6190_s2, 1024, %s43_s28, [#allocation7], %s4130_s20, %s4130_s20, %s4131_s21  }
  0x23   :  { %s4100_s0 = scalar_lea.vmem %s55_s30, 1024  ;;  %p4105_p2 = scmp.lt.s32.totalorder %s55_s30, %s55_s30 }
  0x24   :  { %p4101_p1 = scmp.ne.s32.totalorder %s55_s30, %s4100_s0  ;;  %p4106_p3 = scmp.lt.s32.totalorder %s4100_s0, %s4100_s0 }
  0x26   :  { %p4107_p4 = por %p4106_p3, %p4105_p2 }
  0x28   :  { %p4108_p5 = pnand %p4107_p4, %p4101_p1 }
  0x2a   :  { %4111 = shalt.err (!%p4108_p5)
}
  0x2b   :  { %60 = dma.hbm_to_vmem [thread:$0]  %s6191_s3, 1024, %s55_s30, [#allocation10], %s4130_s20, %s4130_s20, %s4131_s21  }
  0x2c   :  { %4120 = dma.done.wait [#allocation4], 512  }
  0x2d   :  { %4121 = vsyncadd [#allocation4], 4294966784 }
  0x2e   :  { %4122 = dma.done.wait [#allocation7], 1408  }
  0x2f   :  { %4123 = vsyncadd [#allocation7], 4294965888 }
  0x30   :  { %4124 = dma.done.wait [#allocation10], 1024  }
  0x31   :  { %4125 = vsyncadd [#allocation10], 4294966272  ;;  %v4190_v0 = vld [vmem:[#allocation9] sm:$0xff]  ;;  %v4192_v1 = vld [vmem:[#allocation9 + $0x8] sm:$0xff]  ;;  %v4134_v29 = vmov 683565275  }
  0x32   :  { %v86_v2 = vand.u32 2147483647, %v4190_v0  ;;  %v4195_v3 = vld [vmem:[#allocation9 + $0x10] sm:$0xff]  ;;  %v89_v4 = vand.u32 2139095040, %v4190_v0  ;;  %v190_v5 = vand.u32 2147483647, %v4192_v1 }
  0x33   :  { %v193_v6 = vand.u32 2139095040, %v4192_v1  ;;  %v297_v11 = vand.u32 2139095040, %v4195_v3  ;;  %v4135_v31 = vmov 2475754826   ;;  %v4136_v33 = vmov 2131351028  }
  0x34   :  { %v90_v7 = vshrl.u32 %v89_v4, 23  ;;  %v93_v8 = vand.u32 8388607, %v86_v2  ;;  %v197_v10 = vand.u32 8388607, %v190_v5  ;;  %s4140_s12 = smov [#allocation11]  }
  0x35   :  { %v194_v9 = vshrl.u32 %v193_v6, 23  ;;  %v298_v14 = vshrl.u32 %v297_v11, 23  ;;  %v4137_v35 = vmov 2102212464   ;;  %v4138_v37 = vmov 920167782  }
  0x36   :  { %v3716_v12 = vadd.s32 4294967169, %v90_v7  ;;  %v94_v16 = vor.u32 8388608, %v93_v8  ;;  %v198_v17 = vor.u32 8388608, %v197_v10  ;;  %v4139_v45 = vmov 1326507024  }
  0x37   :  { %v3720_v13 = vadd.s32 4294967169, %v194_v9  ;;  %v3724_v19 = vadd.s32 4294967169, %v298_v14 }
  0x38   :  { %v96_v15 = vadd.s32 1, %v3716_v12  ;;  %v4205_v24 = vshll.u32 %v94_v16, 8  ;;  %v4207_v26 = vshll.u32 %v198_v17, 8 }
  0x39   :  { %v200_v18 = vadd.s32 1, %v3720_v13  ;;  %v4209_v27 = vadd.s32 1, %v3724_v19 }
  0x3a   :  { %vm97_vm0 = vcmp.gt.s32.totalorder %v96_v15, 0 }
  0x3b   :  { %v98_v20 = vsel %vm97_vm0, %v96_v15, 0  ;;  %vm201_vm1 = vcmp.gt.s32.totalorder %v200_v18, 0  ;;  %vm305_vm6 = vcmp.gt.s32.totalorder %v4209_v27, 0 }
  0x3c   :  { %v99_v21 = vshrl.u32 %v98_v20, 5  ;;  %v100_v22 = vand.u32 31, %v98_v20  ;;  %v202_v23 = vsel %vm201_vm1, %v200_v18, 0 }
  0x3d   :  { %v204_v25 = vand.u32 31, %v202_v23  ;;  %v4216_v39 = vshrl.u32 %v202_v23, 5 }
  0x3e   :  { %v101_v28 = vsub.s32 32, %v100_v22  ;;  %v103_v30 = vshll.u32 %v4134_v29, %v100_v22  ;;  %v106_v32 = vshll.u32 %v4135_v31, %v100_v22  ;;  %v109_v34 = vshll.u32 %v4136_v33, %v100_v22 }
  0x3f   :  { %v112_v36 = vshll.u32 %v4137_v35, %v100_v22  ;;  %v115_v38 = vshll.u32 %v4138_v37, %v100_v22  ;;  %vm118_vm2 = vcmp.lt.s32.totalorder %v99_v21, 1  ;;  %vm119_vm3 = vcmp.lt.s32.totalorder %v99_v21, 2 }
  0x40   :  { %v102_v40 = vshrl.u32 %v4134_v29, %v101_v28  ;;  %v104_v41 = vshrl.u32 %v4135_v31, %v101_v28  ;;  %v107_v42 = vshrl.u32 %v4136_v33, %v101_v28  ;;  %v110_v43 = vshrl.u32 %v4137_v35, %v101_v28 }
  0x41   :  { %v113_v44 = vshrl.u32 %v4138_v37, %v101_v28  ;;  %v116_v46 = vshrl.u32 %v4139_v45, %v101_v28  ;;  %vm121_vm4 = vcmp.lt.s32.totalorder %v99_v21, 4  ;;  %v205_v50 = vsub.s32 32, %v204_v25 }
  0x42   :  { %v105_v47 = vor.u32 %v104_v41, %v103_v30  ;;  %v108_v48 = vor.u32 %v107_v42, %v106_v32  ;;  %v111_v49 = vor.u32 %v110_v43, %v109_v34  ;;  %vm120_vm5 = vcmp.lt.s32.totalorder %v99_v21, 3 }
  0x43   :  { %v114_v51 = vor.u32 %v113_v44, %v112_v36  ;;  %v117_v52 = vor.u32 %v116_v46, %v115_v38  ;;  %v207_v53 = vshll.u32 %v4134_v29, %v204_v25  ;;  %v210_v61 = vshll.u32 %v4135_v31, %v204_v25 }
  0x44   :  { %v122_v54 = vsel %vm118_vm2, %v102_v40, %v105_v47  ;;  %v123_v55 = vsel %vm121_vm4, %v111_v49, 2102212464  ;;  %v126_v56 = vsel %vm118_vm2, %v105_v47, %v108_v48  ;;  %v130_v57 = vsel %vm118_vm2, %v108_v48, %v111_v49 }
  0x45   :  { %v124_v58 = vsel %vm120_vm5, %v108_v48, %v123_v55  ;;  %v127_v59 = vsel %vm121_vm4, %v114_v51, 920167782  ;;  %v131_v60 = vsel %vm121_vm4, %v117_v52, 1326507024  ;;  %v206_v4 = vshrl.u32 %v4134_v29, %v205_v50 }
  0x46   :  { %v128_v62 = vsel %vm120_vm5, %v111_v49, %v127_v59  ;;  %v132_v63 = vsel %vm120_vm5, %v114_v51, %v131_v60  ;;  %v208_v6 = vshrl.u32 %v4135_v31, %v205_v50  ;;  %v125_v7 = vsel %vm119_vm3, %v122_v54, %v124_v58  ;;  %v4267_v51 = vld [vmem:[#allocation9 + $0x18] sm:$0xff] }
  0x47   :  { %v129_v8 = vsel %vm119_vm3, %v126_v56, %v128_v62  ;;  %v133_v9 = vsel %vm119_vm3, %v130_v57, %v132_v63  ;;  %v211_v10 = vshrl.u32 %v4136_v33, %v205_v50  ;;  %v213_v17 = vshll.u32 %v4136_v33, %v204_v25 }
  0x48   :  { %v4237_v11 = vmul.u32.u64.low %v4205_v24, %v133_v9  ;;  %v4238_v12 = vmul.u32.u64.high %v4205_v24, %v133_v9, %v4237_v11  ;;  %v4241_v13 = vmul.u32.u64.low %v4205_v24, %v129_v8  ;;  %v4242_v14 = vmul.u32.u64.high %v4205_v24, %v129_v8, %v4241_v13 }
  0x49   :  { %v209_v15 = vor.u32 %v208_v6, %v207_v53  ;;  %v212_v16 = vor.u32 %v211_v10, %v210_v61  ;;  %v214_v18 = vshrl.u32 %v4137_v35, %v205_v50  ;;  %v216_v19 = vshll.u32 %v4137_v35, %v204_v25 }
  0x4a   :  { %v217_v20 = vshrl.u32 %v4138_v37, %v205_v50  ;;  %v219_v21 = vshll.u32 %v4138_v37, %v204_v25  ;;  %v220_v22 = vshrl.u32 %v4139_v45, %v205_v50  ;;  %v141_v23 = vmul.u32 %v4205_v24, %v125_v7 }
  0x4b   :  { %v215_v28 = vor.u32 %v214_v18, %v213_v17  ;;  %vm222_vm7 = vcmp.lt.s32.totalorder %v4216_v39, 1  ;;  %vm223_vm8 = vcmp.lt.s32.totalorder %v4216_v39, 2  ;;  %vm143_vm9 = vc.u32 %v4238_v12, %v4241_v13 }
  0x4c   :  { %v144_v30 = vadd.s32 1, %v4242_v14  ;;  %v218_v32 = vor.u32 %v217_v20, %v216_v19  ;;  %vm224_vm10 = vcmp.lt.s32.totalorder %v4216_v39, 3  ;;  %v221_v34 = vor.u32 %v220_v22, %v219_v21 }
  0x4d   :  { %vm225_vm11 = vcmp.lt.s32.totalorder %v4216_v39, 4  ;;  %v226_v25 = vsel %vm222_vm7, %v206_v4, %v209_v15  ;;  %v230_v36 = vsel %vm222_vm7, %v209_v15, %v212_v16  ;;  %v234_v41 = vsel %vm222_vm7, %v212_v16, %v215_v28 }
  0x4e   :  { %v145_v24 = vsel %vm143_vm9, %v144_v30, %v4242_v14  ;;  %v227_v38 = vsel %vm225_vm11, %v215_v28, 2102212464  ;;  %v231_v40 = vsel %vm225_vm11, %v218_v32, 920167782  ;;  %v235_v46 = vsel %vm225_vm11, %v221_v34, 1326507024 }
  0x4f   :  { %v146_v42 = vadd.s32 %v145_v24, %v141_v23  ;;  %v228_v43 = vsel %vm224_vm10, %v212_v16, %v227_v38  ;;  %v232_v44 = vsel %vm224_vm10, %v215_v28, %v231_v40  ;;  %v236_v49 = vsel %vm224_vm10, %v218_v32, %v235_v46 }
  0x50   :  { %v229_v47 = vsel %vm223_vm8, %v226_v25, %v228_v43  ;;  %v233_v48 = vsel %vm223_vm8, %v230_v36, %v232_v44  ;;  %v306_v50 = vsel %vm305_vm6, %v4209_v27, 0  ;;  %v237_v53 = vsel %vm223_vm8, %v234_v41, %v236_v49 }
  0x51   :  { %v147_v52 = vadd.s32 536870912, %v146_v42  ;;  %v4272_v54 = vmul.u32.u64.low %v4207_v26, %v233_v48  ;;  %v4273_v55 = vmul.u32.u64.high %v4207_v26, %v233_v48, %v4272_v54  ;;  %v308_v59 = vand.u32 31, %v306_v50 }
  0x52   :  { %v4277_v56 = vmul.u32.u64.low %v4207_v26, %v237_v53  ;;  %v4278_v57 = vmul.u32.u64.high %v4207_v26, %v237_v53, %v4277_v56  ;;  %v245_v27 = vmul.u32 %v4207_v26, %v229_v47  ;;  %v401_v60 = vand.u32 2139095040, %v4267_v51 }
  0x53   :  { %v4280_v58 = vshrl.u32 %v147_v52, 30  ;;  %v248_v39 = vadd.s32 1, %v4273_v55  ;;  %v309_v62 = vsub.s32 32, %v308_v59  ;;  %v294_v6 = vand.u32 2147483647, %v4195_v3 }
  0x54   :  { %vm247_vm12 = vc.u32 %v4278_v57, %v4272_v54  ;;  %v307_v8 = vshrl.u32 %v306_v50, 5  ;;  %v402_v9 = vshrl.u32 %v401_v60, 23  ;;  %v311_v10 = vshll.u32 %v4134_v29, %v308_v59 }
  0x55   :  { %v149_v61 = vshll.u32 %v4280_v58, 30  ;;  %v249_v4 = vsel %vm247_vm12, %v248_v39, %v4273_v55  ;;  %v312_v11 = vshrl.u32 %v4135_v31, %v309_v62  ;;  %v314_v14 = vshll.u32 %v4135_v31, %v308_v59 }
  0x56   :  { %v250_v7 = vadd.s32 %v249_v4, %v245_v27  ;;  %v315_v15 = vshrl.u32 %v4136_v33, %v309_v62  ;;  %v317_v16 = vshll.u32 %v4136_v33, %v308_v59  ;;  %v318_v17 = vshrl.u32 %v4137_v35, %v309_v62 }
  0x57   :  { %v4288_v63 = vsub.s32 %v146_v42, %v149_v61  ;;  %v320_v18 = vshll.u32 %v4137_v35, %v308_v59  ;;  %v301_v19 = vand.u32 8388607, %v294_v6  ;;  %v321_v20 = vshrl.u32 %v4138_v37, %v309_v62 }
  0x58   :  { %v251_v22 = vadd.s32 536870912, %v250_v7  ;;  %v323_v23 = vshll.u32 %v4138_v37, %v308_v59  ;;  %v324_v28 = vshrl.u32 %v4139_v45, %v309_v62  ;;  %vm329_vm13 = vcmp.lt.s32.totalorder %v307_v8, 4 }
  0x59   :  { %v152_v26 = vsub.s32 0, %v4288_v63  ;;  %v3728_v30 = vadd.s32 4294967169, %v402_v9  ;;  %v313_v32 = vor.u32 %v312_v11, %v311_v10  ;;  %v316_v34 = vor.u32 %v315_v15, %v314_v14 }
  0x5a   :  { %v319_v25 = vor.u32 %v318_v17, %v317_v16  ;;  %v322_v36 = vor.u32 %v321_v20, %v320_v18  ;;  %v302_v24 = vor.u32 8388608, %v301_v19  ;;  %v325_v38 = vor.u32 %v324_v28, %v323_v23 }
  0x5b   :  { %v3717_v21 = vmin.u32 %v152_v26, %v4288_v63  ;;  %vm326_vm14 = vcmp.lt.s32.totalorder %v307_v8, 1  ;;  %vm328_vm15 = vcmp.lt.s32.totalorder %v307_v8, 3  ;;  %v4306_v41 = vshrl.u32 %v251_v22, 30 }
  0x5c   :  { %v310_v42 = vshrl.u32 %v4134_v29, %v309_v62  ;;  %v335_v43 = vsel %vm329_vm13, %v322_v36, 920167782  ;;  %vm327_vm0 = vcmp.lt.s32.totalorder %v307_v8, 2  ;;  %v408_v44 = vadd.s32 1, %v3728_v30 }
  0x5d   :  { %v154_v40 = vclz %v3717_v21  ;;  %v331_v46 = vsel %vm329_vm13, %v319_v25, 2102212464  ;;  %v334_v47 = vsel %vm326_vm14, %v313_v32, %v316_v34  ;;  %v336_v48 = vsel %vm328_vm15, %v319_v25, %v335_v43 }
  0x5e   :  { %v338_v49 = vsel %vm326_vm14, %v316_v34, %v319_v25  ;;  %v339_v50 = vsel %vm329_vm13, %v325_v38, 1326507024  ;;  %v342_v52 = vshll.u32 %v302_v24, 8  ;;  %v253_v55 = vshll.u32 %v4306_v41, 30 }
  0x5f   :  { %v3718_v53 = vadd.s32 4294967294, %v154_v40  ;;  %v330_v56 = vsel %vm326_vm14, %v310_v42, %v313_v32  ;;  %v340_v59 = vsel %vm328_vm15, %v322_v36, %v339_v50  ;;  %v332_v27 = vsel %vm328_vm15, %v316_v34, %v331_v46 }
  0x60   :  { %v337_v60 = vsel %vm327_vm0, %v334_v47, %v336_v48  ;;  %v341_v61 = vsel %vm327_vm0, %v338_v49, %v340_v59  ;;  %vm409_vm1 = vcmp.gt.s32.totalorder %v408_v44, 0  ;;  %v333_v4 = vsel %vm327_vm0, %v330_v56, %v332_v27 }
  0x61   :  { %v4321_v39 = vmul.u32.u64.low %v342_v52, %v341_v61  ;;  %v4322_v62 = vmul.u32.u64.high %v342_v52, %v341_v61, %v4321_v39  ;;  %v4325_v9 = vmul.u32.u64.low %v342_v52, %v337_v60  ;;  %v4326_v26 = vmul.u32.u64.high %v342_v52, %v337_v60, %v4325_v9 }
  0x62   :  { %v410_v10 = vsel %vm409_vm1, %v408_v44, 0  ;;  %vm3719_vm2 = vcmp.lt.s32.totalorder %v3718_v53, 0  ;;  %v4329_v11 = vsub.s32 %v250_v7, %v253_v55  ;;  %v349_v15 = vmul.u32 %v342_v52, %v333_v4 }
  0x63   :  { %v412_v14 = vand.u32 31, %v410_v10  ;;  %vm351_vm3 = vc.u32 %v4322_v62, %v4325_v9  ;;  %v398_v16 = vand.u32 2147483647, %v4267_v51  ;;  %v157_v17 = vsel %vm3719_vm2, 0, %v3718_v53 }
  0x64   :  { %v352_v18 = vadd.s32 1, %v4326_v26  ;;  %v256_v8 = vsub.s32 0, %v4329_v11  ;;  %v162_v21 = vsub.s32 4294967266, %v157_v17  ;;  %v411_v36 = vshrl.u32 %v410_v10, 5 }
  0x65   :  { %v413_v19 = vsub.s32 32, %v412_v14  ;;  %v405_v7 = vand.u32 8388607, %v398_v16  ;;  %v415_v23 = vshll.u32 %v4134_v29, %v412_v14  ;;  %v418_v30 = vshll.u32 %v4135_v31, %v412_v14 }
  0x66   :  { %v353_v20 = vsel %vm351_vm3, %v352_v18, %v4326_v26  ;;  %v3721_v34 = vmin.u32 %v256_v8, %v4329_v11  ;;  %v424_v24 = vshll.u32 %v4137_v35, %v412_v14  ;;  %v142_v38 = vadd.s32 %v4241_v13, %v4238_v12 }
  0x67   :  { %v354_v22 = vadd.s32 %v353_v20, %v349_v15  ;;  %v416_v28 = vshrl.u32 %v4135_v31, %v413_v19  ;;  %v419_v32 = vshrl.u32 %v4136_v33, %v413_v19  ;;  %v158_v40 = vsub.s32 32, %v157_v17 }
  0x68   :  { %v421_v42 = vshll.u32 %v4136_v33, %v412_v14  ;;  %v422_v43 = vshrl.u32 %v4137_v35, %v413_v19  ;;  %v163_v44 = vadd.s32 127, %v162_v21  ;;  %v406_v47 = vor.u32 8388608, %v405_v7 }
  0x69   :  { %v355_v25 = vadd.s32 536870912, %v354_v22  ;;  %v425_v48 = vshrl.u32 %v4138_v37, %v413_v19  ;;  %v417_v49 = vor.u32 %v416_v28, %v415_v23  ;;  %v420_v50 = vor.u32 %v419_v32, %v418_v30 }
  0x6a   :  { %v427_v52 = vshll.u32 %v4138_v37, %v412_v14  ;;  %v428_v53 = vshrl.u32 %v4139_v45, %v413_v19  ;;  %v258_v55 = vclz %v3721_v34  ;;  %vm430_vm4 = vcmp.lt.s32.totalorder %v411_v36, 1 }
  0x6b   :  { %v4349_v46 = vshrl.u32 %v355_v25, 30  ;;  %v426_v13 = vor.u32 %v425_v48, %v424_v24  ;;  %v159_v56 = vshll.u32 %v4288_v63, %v157_v17  ;;  %v160_v59 = vshrl.u32 %v142_v38, %v158_v40  ;;  %v4363_v17 = vld [vmem:[#allocation9 + $0x20] sm:$0xff] }
  0x6c   :  { %v423_v27 = vor.u32 %v422_v43, %v421_v42  ;;  %v414_v60 = vshrl.u32 %v4134_v29, %v413_v19  ;;  %vm432_vm5 = vcmp.lt.s32.totalorder %v411_v36, 3  ;;  %vm433_vm6 = vcmp.lt.s32.totalorder %v411_v36, 4 }
  0x6d   :  { %v357_v12 = vshll.u32 %v4349_v46, 30  ;;  %v446_v61 = vshll.u32 %v406_v47, 8  ;;  %v429_v39 = vor.u32 %v428_v53, %v427_v52  ;;  %vm431_vm7 = vcmp.lt.s32.totalorder %v411_v36, 2 }
  0x6e   :  { %v435_v4 = vsel %vm433_vm6, %v423_v27, 2102212464  ;;  %v438_v26 = vsel %vm430_vm4, %v417_v49, %v420_v50  ;;  %v164_v10 = vshll.u32 %v163_v44, 23  ;;  %v3722_v14 = vadd.s32 4294967294, %v258_v55 }
  0x6f   :  { %v4359_v15 = vsub.s32 %v354_v22, %v357_v12  ;;  %v439_v18 = vsel %vm433_vm6, %v426_v13, 920167782  ;;  %v434_v8 = vsel %vm430_vm4, %v414_v60, %v417_v49  ;;  %v436_v19 = vsel %vm432_vm5, %v420_v50, %v435_v4 }
  0x70   :  { %v440_v63 = vsel %vm432_vm5, %v423_v27, %v439_v18  ;;  %v442_v21 = vsel %vm430_vm4, %v420_v50, %v423_v27  ;;  %v443_v7 = vsel %vm433_vm6, %v429_v39, 1326507024  ;;  %v161_v22 = vor.u32 %v160_v59, %v159_v56 }
  0x71   :  { %v441_v20 = vsel %vm431_vm7, %v438_v26, %v440_v63  ;;  %v165_v30 = vor.u32 4788187, %v164_v10  ;;  %vm3723_vm8 = vcmp.lt.s32.totalorder %v3722_v14, 0  ;;  %v360_v32 = vsub.s32 0, %v4359_v15 }
  0x72   :  { %v4370_v23 = vmul.u32.u64.low %v446_v61, %v441_v20  ;;  %v4371_v28 = vmul.u32.u64.high %v446_v61, %v441_v20, %v4370_v23  ;;  %v444_v34 = vsel %vm432_vm5, %v426_v13, %v443_v7  ;;  %v505_v25 = vand.u32 2139095040, %v4363_v17 }
  0x73   :  { %v437_v24 = vsel %vm431_vm7, %v434_v8, %v436_v19  ;;  %v445_v38 = vsel %vm431_vm7, %v442_v21, %v444_v34  ;;  %v261_v40 = vsel %vm3723_vm8, 0, %v3722_v14  ;;  %v166_v47 = vand.u32 2147483647, %v165_v30  ;;  %v4488_v19 = vld [vmem:[#allocation9 + $0x30] sm:$0xff] }
  0x74   :  { %v4379_v42 = vmul.u32.u64.low %v446_v61, %v445_v38  ;;  %v4380_v43 = vmul.u32.u64.high %v446_v61, %v445_v38, %v4379_v42  ;;  %v506_v44 = vshrl.u32 %v505_v25, 23  ;;  %v168_v48 = vcvt.s32.f32 %v161_v22 }
  0x75   :  { %v3725_v49 = vmin.u32 %v360_v32, %v4359_v15  ;;  %v456_v50 = vadd.s32 1, %v4371_v28  ;;  %v453_v52 = vmul.u32 %v446_v61, %v437_v24  ;;  %v172_v55 = vsub.s32 4, %v4280_v58 }
  0x76   :  { %v3732_v53 = vadd.s32 4294967169, %v506_v44  ;;  %v266_v12 = vsub.s32 4294967266, %v261_v40  ;;  %v246_v36 = vadd.s32 %v4272_v54, %v4278_v57  ;;  %v262_v13 = vsub.s32 32, %v261_v40 }
  0x77   :  { %vm455_vm9 = vc.u32 %v4380_v43, %v4370_v23  ;;  %v169_v59 = vmul.f32 %v168_v48, %v166_v47  ;;  %v362_v27 = vclz %v3725_v49  ;;  %vm88_vm10 = vcmp.lt.s32.totalorder %v4190_v0, 0 }
  0x78   :  { %v512_v56 = vadd.s32 1, %v3732_v53  ;;  %v457_v60 = vsel %vm455_vm9, %v456_v50, %v4371_v28  ;;  %v173_v61 = vsel %vm88_vm10, %v172_v55, %v4280_v58  ;;  %v267_v4 = vadd.s32 127, %v266_v12 }
  0x79   :  { %v458_v39 = vadd.s32 %v457_v60, %v453_v52  ;;  %v502_v54 = vand.u32 2147483647, %v4363_v17  ;;  %v263_v26 = vshll.u32 %v4329_v11, %v261_v40  ;;  %v264_v10 = vshrl.u32 %v246_v36, %v262_v13  ;;  %v4434_v52 = vld [vmem:[#allocation9 + $0x28] sm:$0xff] }
  0x7a   :  { %vm513_vm11 = vcmp.gt.s32.totalorder %v512_v56, 0  ;;  %v170_v63 = vxor.u32 2147483648, %v169_v59  ;;  %v3726_v8 = vadd.s32 4294967294, %v362_v27  ;;  %vm4398_vm12 = vcmp.le.f32.partialorder %v86_v2, 0.7853982 }
  0x7b   :  { %v514_v57 = vsel %vm513_vm11, %v512_v56, 0  ;;  %v459_v14 = vadd.s32 536870912, %v458_v39  ;;  %v4406_v21 = vsel %vm4398_vm12, 0, %v173_v61  ;;  %v268_v7 = vshll.u32 %v267_v4, 23 }
  0x7c   :  { %v516_v18 = vand.u32 31, %v514_v57  ;;  %v4408_v11 = vor.u32 %v264_v10, %v263_v26  ;;  %v276_v28 = vsub.s32 4, %v4306_v41  ;;  %v509_v2 = vand.u32 8388607, %v502_v54 }
  0x7d   :  { %v4402_v20 = vshrl.u32 %v459_v14, 30  ;;  %v4416_v30 = vsel %vm88_vm10, %v170_v63, %v169_v59  ;;  %v350_v32 = vadd.s32 %v4325_v9, %v4322_v62  ;;  %vm3727_vm13 = vcmp.lt.s32.totalorder %v3726_v8, 0 }
  0x7e   :  { %v517_v58 = vsub.s32 32, %v516_v18  ;;  %v519_v34 = vshll.u32 %v4134_v29, %v516_v18  ;;  %v522_v38 = vshll.u32 %v4135_v31, %v516_v18  ;;  %v4426_v42 = vor.u32 4788187, %v268_v7 }
  0x7f   :  { %v461_v22 = vshll.u32 %v4402_v20, 30  ;;  %v515_v44 = vshrl.u32 %v514_v57, 5  ;;  %v525_v47 = vshll.u32 %v4136_v33, %v516_v18  ;;  %v272_v62 = vcvt.s32.f32 %v4408_v11 }
  0x80   :  { %v520_v24 = vshrl.u32 %v4135_v31, %v517_v58  ;;  %v523_v40 = vshrl.u32 %v4136_v33, %v517_v58  ;;  %v526_v48 = vshrl.u32 %v4137_v35, %v517_v58  ;;  %v4431_v9 = vsel %vm3727_vm13, 0, %v3726_v8 }
  0x81   :  { %v4421_v25 = vsub.s32 %v458_v39, %v461_v22  ;;  %v510_v50 = vor.u32 8388608, %v509_v2  ;;  %v518_v53 = vshrl.u32 %v4134_v29, %v517_v58  ;;  %v528_v55 = vshll.u32 %v4137_v35, %v516_v18 }
  0x82   :  { %v529_v12 = vshrl.u32 %v4138_v37, %v517_v58  ;;  %v531_v36 = vshll.u32 %v4138_v37, %v516_v18  ;;  %v521_v56 = vor.u32 %v520_v24, %v519_v34  ;;  %v524_v59 = vor.u32 %v523_v40, %v522_v38 }
  0x83   :  { %v464_v49 = vsub.s32 0, %v4421_v25  ;;  %v532_v27 = vshrl.u32 %v4139_v45, %v517_v58  ;;  %v366_v60 = vsub.s32 32, %v4431_v9  ;;  %v527_v39 = vor.u32 %v526_v48, %v525_v47 }
  0x84   :  { %v530_v61 = vor.u32 %v529_v12, %v528_v55  ;;  %vm534_vm14 = vcmp.lt.s32.totalorder %v515_v44, 1  ;;  %v370_v4 = vsub.s32 4294967266, %v4431_v9  ;;  %v550_v26 = vshll.u32 %v510_v50, 8 }
  0x85   :  { %v3729_v13 = vmin.u32 %v464_v49, %v4421_v25  ;;  %v609_v10 = vand.u32 2139095040, %v4434_v52  ;;  %vm192_vm15 = vcmp.lt.s32.totalorder %v4192_v1, 0  ;;  %v533_v14 = vor.u32 %v532_v27, %v531_v36 }
  0x86   :  { %vm535_vm0 = vcmp.lt.s32.totalorder %v515_v44, 2  ;;  %vm536_vm1 = vcmp.lt.s32.totalorder %v515_v44, 3  ;;  %vm537_vm2 = vcmp.lt.s32.totalorder %v515_v44, 4  ;;  %v538_v63 = vsel %vm534_vm14, %v518_v53, %v521_v56 }
  0x87   :  { %v466_v57 = vclz %v3729_v13  ;;  %v539_v8 = vsel %vm537_vm2, %v527_v39, 2102212464  ;;  %v542_v58 = vsel %vm534_vm14, %v521_v56, %v524_v59  ;;  %v543_v11 = vsel %vm537_vm2, %v530_v61, 920167782 }
  0x88   :  { %v540_v7 = vsel %vm536_vm1, %v524_v59, %v539_v8  ;;  %v546_v22 = vsel %vm534_vm14, %v524_v59, %v527_v39  ;;  %v547_v2 = vsel %vm537_vm2, %v533_v14, 1326507024  ;;  %v371_v34 = vadd.s32 127, %v370_v4 }
  0x89   :  { %v3730_v18 = vadd.s32 4294967294, %v466_v57  ;;  %v544_v24 = vsel %vm536_vm1, %v527_v39, %v543_v11  ;;  %v548_v38 = vsel %vm536_vm1, %v530_v61, %v547_v2  ;;  %v270_v40 = vand.u32 2147483647, %v4426_v42 }
  0x8a   :  { %v545_v48 = vsel %vm535_vm0, %v542_v58, %v544_v24  ;;  %v549_v49 = vsel %vm535_vm0, %v546_v22, %v548_v38  ;;  %v367_v50 = vshll.u32 %v4359_v15, %v4431_v9  ;;  %v368_v53 = vshrl.u32 %v350_v32, %v366_v60 }
  0x8b   :  { %vm3731_vm3 = vcmp.lt.s32.totalorder %v3730_v18, 0  ;;  %v541_v55 = vsel %vm535_vm0, %v538_v63, %v540_v7  ;;  %v610_v12 = vshrl.u32 %v609_v10, 23  ;;  %v372_v42 = vshll.u32 %v371_v34, 23 }
  0x8c   :  { %v469_v47 = vsel %vm3731_vm3, 0, %v3730_v18  ;;  %v4455_v36 = vmul.u32.u64.low %v550_v26, %v549_v49  ;;  %v4456_v13 = vmul.u32.u64.high %v550_v26, %v549_v49, %v4455_v36  ;;  %v606_v39 = vand.u32 2147483647, %v4434_v52 }
  0x8d   :  { %v4458_v56 = vmul.u32.u64.low %v550_v26, %v545_v48  ;;  %v4459_v59 = vmul.u32.u64.high %v550_v26, %v545_v48, %v4458_v56  ;;  %v474_v27 = vsub.s32 4294967266, %v469_v47  ;;  %v3736_v61 = vadd.s32 4294967169, %v610_v12 }
  0x8e   :  { %v179_v4 = vadd.s32 3, %v4406_v21  ;;  %vm4466_vm4 = vcmp.le.f32.partialorder %v190_v5, 0.7853982  ;;  %v454_v32 = vadd.s32 %v4370_v23, %v4380_v43  ;;  %v470_v44 = vsub.s32 32, %v469_v47 }
  0x8f   :  { %v174_v9 = vsel %vm4398_vm12, %v4190_v0, %v4416_v30  ;;  %v277_v60 = vsel %vm192_vm15, %v276_v28, %v4306_v41  ;;  %v557_v57 = vmul.u32 %v550_v26, %v541_v55  ;;  %v616_v5 = vadd.s32 1, %v3736_v61 }
  0x90   :  { %v4481_v10 = vmul.f32 %v272_v62, %v270_v40  ;;  %v369_v14 = vor.u32 %v368_v53, %v367_v50  ;;  %vm559_vm5 = vc.u32 %v4456_v13, %v4458_v56  ;;  %v560_v23 = vadd.s32 1, %v4459_v59 }
  0x91   :  { %v373_v43 = vor.u32 4788187, %v372_v42  ;;  %v475_v18 = vadd.s32 127, %v474_v27  ;;  %v613_v0 = vand.u32 8388607, %v606_v39  ;;  %vm617_vm6 = vcmp.gt.s32.totalorder %v616_v5, 0 }
  0x92   :  { %v471_v41 = vshll.u32 %v4421_v25, %v469_v47  ;;  %v472_v28 = vshrl.u32 %v454_v32, %v470_v44  ;;  %v561_v30 = vsel %vm559_vm5, %v560_v23, %v4459_v59  ;;  %v618_v62 = vsel %vm617_vm6, %v616_v5, 0 }
  0x93   :  { %3925 = vcosq.f32 %v174_v9  ;;  %v4492_v26 = vand.u32 3, %v179_v4  ;;  %v4496_v63 = vsel %vm4466_vm4, 0, %v277_v60  ;;  %v562_v8 = vadd.s32 %v561_v30, %v557_v57 }
  0x94   :  { %3927 = vsinq.f32 %v174_v9  ;;  %v274_v58 = vxor.u32 2147483648, %v4481_v10  ;;  %v4500_v7 = vadd.s32 3, %v4496_v63  ;;  %v620_v11 = vand.u32 31, %v618_v62 }
  0x95   :  { %v376_v25 = vcvt.s32.f32 %v369_v14  ;;  %v476_v22 = vshll.u32 %v475_v18, 23  ;;  %v563_v2 = vadd.s32 536870912, %v562_v8  ;;  %v713_v34 = vand.u32 2139095040, %v4488_v19 }
  0x96   :  { %v374_v24 = vand.u32 2147483647, %v373_v43  ;;  %v473_v38 = vor.u32 %v472_v28, %v471_v41  ;;  %v614_v40 = vor.u32 8388608, %v613_v0  ;;  %v621_v47 = vsub.s32 32, %v620_v11 }
  0x97   :  { %v4503_v48 = vshrl.u32 %v563_v2, 30  ;;  %v619_v49 = vshrl.u32 %v618_v62, 5  ;;  %v623_v50 = vshll.u32 %v4134_v29, %v620_v11  ;;  %v626_v53 = vshll.u32 %v4135_v31, %v620_v11 }
  0x98   :  { %v624_v55 = vshrl.u32 %v4135_v31, %v621_v47  ;;  %v627_v12 = vshrl.u32 %v4136_v33, %v621_v47  ;;  %v629_v36 = vshll.u32 %v4136_v33, %v620_v11  ;;  %v630_v59 = vshrl.u32 %v4137_v35, %v621_v47 }
  0x99   :  { %v477_v42 = vor.u32 4788187, %v476_v22  ;;  %v565_v27 = vshll.u32 %v4503_v48, 30  ;;  %v632_v61 = vshll.u32 %v4137_v35, %v620_v11  ;;  %v714_v4 = vshrl.u32 %v713_v34, 23 }
  0x9a   :  { %v377_v32 = vmul.f32 %v376_v25, %v374_v24  ;;  %v480_v44 = vcvt.s32.f32 %v473_v38  ;;  %v622_v9 = vshrl.u32 %v4134_v29, %v621_v47  ;;  %v4514_v60 = vshll.u32 %v614_v40, 8 }
  0x9b   :  { %vm296_vm7 = vcmp.lt.s32.totalorder %v4195_v3, 0  ;;  %v4517_v57 = vsub.s32 %v562_v8, %v565_v27  ;;  %v625_v5 = vor.u32 %v624_v55, %v623_v50  ;;  %v628_v14 = vor.u32 %v627_v12, %v626_v53 }
  0x9c   :  { %v633_v23 = vshrl.u32 %v4138_v37, %v621_v47  ;;  %v631_v43 = vor.u32 %v630_v59, %v629_v36  ;;  %v635_v18 = vshll.u32 %v4138_v37, %v620_v11  ;;  %v636_v0 = vshrl.u32 %v4139_v45, %v621_v47 }
  0x9d   :  { %vm638_vm8 = vcmp.lt.s32.totalorder %v619_v49, 1  ;;  %v478_v41 = vand.u32 2147483647, %v477_v42  ;;  %v568_v28 = vsub.s32 0, %v4517_v57  ;;  %v3740_v62 = vadd.s32 4294967169, %v714_v4 }
  0x9e   :  { %v634_v30 = vor.u32 %v633_v23, %v632_v61  ;;  %vm4525_vm9 = vcmp.le.f32.partialorder %v294_v6, 0.7853982  ;;  %v637_v25 = vor.u32 %v636_v0, %v635_v18  ;;  %vm639_vm10 = vcmp.lt.s32.totalorder %v619_v49, 2 }
  0x9f   :  { %vm640_vm11 = vcmp.lt.s32.totalorder %v619_v49, 3  ;;  %vm641_vm12 = vcmp.lt.s32.totalorder %v619_v49, 4  ;;  %v3733_v11 = vmin.u32 %v568_v28, %v4517_v57  ;;  %v642_v22 = vsel %vm638_vm8, %v622_v9, %v625_v5 }
  0xa0   :  { %v643_v2 = vsel %vm641_vm12, %v631_v43, 2102212464  ;;  %v646_v34 = vsel %vm638_vm8, %v625_v5, %v628_v14  ;;  %v4532_v24 = vpop.eup %3925  ;;  %v647_v40 = vsel %vm641_vm12, %v634_v30, 920167782  ;;  %v650_v6 = vsel %vm638_vm8, %v628_v14, %v631_v43 }
  0xa1   :  { %v644_v38 = vsel %vm640_vm11, %v628_v14, %v643_v2  ;;  %v651_v47 = vsel %vm641_vm12, %v637_v25, 1326507024  ;;  %v4536_v50 = vpop.eup %3927  ;;  %v275_v53 = vsel %vm192_vm15, %v274_v58, %v4481_v10  ;;  %v378_v55 = vxor.u32 2147483648, %v377_v32 }
  0xa2   :  { %v380_v12 = vsub.s32 4, %v4349_v46  ;;  %vm400_vm13 = vcmp.lt.s32.totalorder %v4267_v51, 0  ;;  %v570_v36 = vclz %v3733_v11  ;;  %v481_v59 = vmul.f32 %v480_v44, %v478_v41 }
  0xa3   :  { %v648_v42 = vsel %vm640_vm11, %v631_v43, %v647_v40  ;;  %v652_v27 = vsel %vm640_vm11, %v634_v30, %v651_v47  ;;  %v720_v61 = vadd.s32 1, %v3740_v62  ;;  %v645_v9 = vsel %vm639_vm10, %v642_v22, %v644_v38 }
  0xa4   :  { %v3734_v4 = vadd.s32 4294967294, %v570_v36  ;;  %v649_v5 = vsel %vm639_vm10, %v646_v34, %v648_v42  ;;  %v653_v14 = vsel %vm639_vm10, %v650_v6, %v652_v27  ;;  %v278_v44 = vsel %vm4466_vm4, %v4192_v1, %v275_v53 }
  0xa5   :  { %v4549_v10 = vmul.u32.u64.low %v4514_v60, %v653_v14  ;;  %v4550_v58 = vmul.u32.u64.high %v4514_v60, %v653_v14, %v4549_v10  ;;  %v4553_v23 = vmul.u32.u64.low %v4514_v60, %v649_v5  ;;  %v4554_v18 = vmul.u32.u64.high %v4514_v60, %v649_v5, %v4553_v23 }
  0xa6   :  { %v381_v43 = vsel %vm296_vm7, %v380_v12, %v4349_v46  ;;  %vm3735_vm14 = vcmp.lt.s32.totalorder %v3734_v4, 0  ;;  %vm721_vm15 = vcmp.gt.s32.totalorder %v720_v61, 0  ;;  %v379_v49 = vsel %vm296_vm7, %v378_v55, %v377_v32 }
  0xa7   :  { %vm4567_vm0 = vcmp.le.f32.partialorder %v398_v16, 0.7853982  ;;  %v558_v41 = vadd.s32 %v4458_v56, %v4456_v13  ;;  %v573_v15 = vsel %vm3735_vm14, 0, %v3734_v4  ;;  %v722_v1 = vsel %vm721_vm15, %v720_v61, 0 }
  0xa8   :  { %v574_v28 = vsub.s32 32, %v573_v15  ;;  %v578_v30 = vsub.s32 4294967266, %v573_v15  ;;  %v661_v46 = vmul.u32 %v4514_v60, %v645_v9  ;;  %v710_v62 = vand.u32 2147483647, %v4488_v19 }
  0xa9   :  { %v482_v25 = vxor.u32 2147483648, %v481_v59  ;;  %vm663_vm1 = vc.u32 %v4550_v58, %v4553_v23  ;;  %v664_v16 = vadd.s32 1, %v4554_v18  ;;  %v724_v32 = vand.u32 31, %v722_v1 }
  0xaa   :  { %3929 = vcosq.f32 %v278_v44  ;;  %v4579_v11 = vand.u32 3, %v4500_v7  ;;  %v382_v13 = vsel %vm4525_vm9, %v4195_v3, %v379_v49  ;;  %v579_v56 = vadd.s32 127, %v578_v30 }
  0xab   :  { %v575_v60 = vshll.u32 %v4517_v57, %v573_v15  ;;  %v576_v22 = vshrl.u32 %v558_v41, %v574_v28  ;;  %v665_v2 = vsel %vm663_vm1, %v664_v16, %v4554_v18  ;;  %v725_v34 = vsub.s32 32, %v724_v32 }
  0xac   :  { %3931 = vsinq.f32 %v278_v44  ;;  %v4588_v38 = vsel %vm4525_vm9, 0, %v381_v43  ;;  %v580_v40 = vshll.u32 %v579_v56, 23  ;;  %v666_v6 = vadd.s32 %v665_v2, %v661_v46 }
  0xad   :  { %3933 = vcosq.f32 %v382_v13  ;;  %v387_v7 = vadd.s32 3, %v4588_v38  ;;  %v483_v3 = vsel %vm400_vm13, %v482_v25, %v481_v59  ;;  %v717_v57 = vand.u32 8388607, %v710_v62 }
  0xae   :  { %v667_v47 = vadd.s32 536870912, %v666_v6  ;;  %v727_v53 = vshll.u32 %v4134_v29, %v724_v32  ;;  %v728_v55 = vshrl.u32 %v4135_v31, %v725_v34  ;;  %v730_v8 = vshll.u32 %v4135_v31, %v724_v32 }
  0xaf   :  { %v577_v12 = vor.u32 %v576_v22, %v575_v60  ;;  %v581_v36 = vor.u32 4788187, %v580_v40  ;;  %v4598_v42 = vshrl.u32 %v722_v1, 5  ;;  %v731_v27 = vshrl.u32 %v4136_v33, %v725_v34 }
  0xb0   :  { %v4601_v61 = vshrl.u32 %v667_v47, 30  ;;  %v733_v59 = vshll.u32 %v4136_v33, %v724_v32  ;;  %v734_v4 = vshrl.u32 %v4137_v35, %v725_v34  ;;  %v736_v9 = vshll.u32 %v4137_v35, %v724_v32 }
  0xb1   :  { %v718_v5 = vor.u32 8388608, %v717_v57  ;;  %v737_v14 = vshrl.u32 %v4138_v37, %v725_v34  ;;  %v739_v10 = vshll.u32 %v4138_v37, %v724_v32  ;;  %v740_v18 = vshrl.u32 %v4139_v45, %v725_v34 }
  0xb2   :  { %vm185_vm2 = vcmp.eq.s32.totalorder %v4492_v26, 2  ;;  %v486_v44 = vsel %vm4567_vm0, %v4267_v51, %v483_v3  ;;  %v669_v43 = vshll.u32 %v4601_v61, 30  ;;  %v729_v49 = vor.u32 %v728_v55, %v727_v53 }
  0xb3   :  { %v732_v41 = vor.u32 %v731_v27, %v730_v8  ;;  %vm182_vm3 = vcmp.eq.s32.totalorder %v4492_v26, 0  ;;  %v582_v15 = vand.u32 2147483647, %v581_v36  ;;  %v584_v1 = vcvt.s32.f32 %v577_v12 }
  0xb4   :  { %v738_v28 = vor.u32 %v737_v14, %v736_v9  ;;  %vm742_vm4 = vcmp.lt.s32.totalorder %v4598_v42, 1  ;;  %vm504_vm5 = vcmp.lt.s32.totalorder %v4363_v17, 0  ;;  %v4617_v30 = vsub.s32 %v666_v6, %v669_v43 }
  0xb5   :  { %v726_v46 = vshrl.u32 %v4134_v29, %v725_v34  ;;  %v735_v25 = vor.u32 %v734_v4, %v733_v59  ;;  %vm745_vm6 = vcmp.lt.s32.totalorder %v4598_v42, 4  ;;  %3935 = vsinq.f32 %v382_v13 }
  0xb6   :  { %v484_v16 = vsub.s32 4, %v4402_v20  ;;  %v741_v32 = vor.u32 %v740_v18, %v739_v10  ;;  %vm744_vm7 = vcmp.lt.s32.totalorder %v4598_v42, 3  ;;  %vm181_vm8 = vcmp.lt.s32.totalorder %v4492_v26, 2 }
  0xb7   :  { %v672_v56 = vsub.s32 0, %v4617_v30  ;;  %vm743_vm9 = vcmp.lt.s32.totalorder %v4598_v42, 2  ;;  %v747_v60 = vsel %vm745_vm6, %v735_v25, 2102212464  ;;  %v750_v22 = vsel %vm742_vm4, %v729_v49, %v732_v41  ;;  %v4630_v2 = vpop.eup %3929 }
  0xb8   :  { %3937 = vcosq.f32 %v486_v44  ;;  %v585_v13 = vmul.f32 %v584_v1, %v582_v15  ;;  %v751_v34 = vsel %vm745_vm6, %v738_v28, 920167782  ;;  %v758_v40 = vshll.u32 %v718_v5, 8  ;;  %v4659_v5 = vld [vmem:[#allocation9] sm:$0xff] }
  0xb9   :  { %3939 = vsinq.f32 %v486_v44  ;;  %v3737_v6 = vmin.u32 %v672_v56, %v4617_v30  ;;  %v746_v3 = vsel %vm742_vm4, %v726_v46, %v729_v49  ;;  %v752_v57 = vsel %vm744_vm7, %v735_v25, %v751_v34  ;;  %v4639_v47 = vpop.eup %3931 }
  0xba   :  { %vm286_vm10 = vcmp.eq.s32.totalorder %v4579_v11, 0  ;;  %vm289_vm11 = vcmp.eq.s32.totalorder %v4579_v11, 2  ;;  %v748_v53 = vsel %vm744_vm7, %v732_v41, %v747_v60  ;;  %v753_v55 = vsel %vm743_vm9, %v750_v22, %v752_v57  ;;  %v4651_v36 = vpop.eup %3933 }
  0xbb   :  { %v754_v8 = vsel %vm742_vm4, %v732_v41, %v735_v25  ;;  %v755_v12 = vsel %vm745_vm6, %v741_v32, 1326507024  ;;  %v186_v27 = vxor.u32 2147483648, %v4532_v24  ;;  %v4654_v59 = vand.u32 3, %v387_v7 }
  0xbc   :  { %v485_v4 = vsel %vm400_vm13, %v484_v16, %v4402_v20  ;;  %v674_v9 = vclz %v3737_v6  ;;  %vm178_vm12 = vweird.f32 %v4659_v5  ;;  %v586_v14 = vxor.u32 2147483648, %v585_v13 }
  0xbd   :  { %v756_v10 = vsel %vm744_vm7, %v738_v28, %v755_v12  ;;  %v4664_v18 = vmul.u32.u64.low %v758_v40, %v753_v55  ;;  %v4665_v44 = vmul.u32.u64.high %v758_v40, %v753_v55, %v4664_v18  ;;  %v183_v7 = vxor.u32 2147483648, %v4536_v50 }
  0xbe   :  { %v3738_v43 = vadd.s32 4294967294, %v674_v9  ;;  %v749_v49 = vsel %vm743_vm9, %v746_v3, %v748_v53  ;;  %v757_v20 = vsel %vm743_vm9, %v754_v8, %v756_v10  ;;  %v187_v41 = vsel %vm185_vm2, %v186_v27, %v4536_v50 }
  0xbf   :  { %vm4680_vm13 = vcmp.le.f32.partialorder %v502_v54, 0.7853982  ;;  %v4684_v1 = vmul.u32.u64.low %v758_v40, %v757_v20  ;;  %v4685_v28 = vmul.u32.u64.high %v758_v40, %v757_v20, %v4684_v1  ;;  %v184_v42 = vsel %vm182_vm3, %v4532_v24, %v183_v7  ;;  %v4751_v20 = vld [vmem:[#allocation9 + $0x10] sm:$0xff] }
  0xc0   :  { %v4694_v46 = vsel %vm4567_vm0, 0, %v485_v4  ;;  %v588_v25 = vsub.s32 4, %v4503_v48  ;;  %vm3739_vm14 = vcmp.lt.s32.totalorder %v3738_v43, 0  ;;  %v587_v54 = vsel %vm504_vm5, %v586_v14, %v585_v13  ;;  %v4741_v14 = vld [vmem:[#allocation9 + $0x8] sm:$0xff] }
  0xc1   :  { %v677_v16 = vsel %vm3739_vm14, 0, %v3738_v43  ;;  %v765_v32 = vmul.u32 %v758_v40, %v749_v49  ;;  %v768_v56 = vadd.s32 1, %v4665_v44  ;;  %vm285_vm15 = vcmp.lt.s32.totalorder %v4579_v11, 2 }
  0xc2   :  { %vm390_vm1 = vcmp.eq.s32.totalorder %v4654_v59, 0  ;;  %vm393_vm2 = vcmp.eq.s32.totalorder %v4654_v59, 2  ;;  %v491_v0 = vadd.s32 3, %v4694_v46  ;;  %v682_v60 = vsub.s32 4294967266, %v677_v16  ;;  %v4710_v40 = vpop.eup %3935 }
  0xc3   :  { %v188_v22 = vsel %vm181_vm8, %v184_v42, %v187_v41  ;;  %v287_v34 = vxor.u32 2147483648, %v4639_v47  ;;  %v290_v13 = vxor.u32 2147483648, %v4630_v2  ;;  %vm767_vm0 = vc.u32 %v4685_v28, %v4664_v18 }
  0xc4   :  { %vm389_vm3 = vcmp.lt.s32.totalorder %v4654_v59, 2  ;;  %v589_v6 = vsel %vm504_vm5, %v588_v25, %v4503_v48  ;;  %v590_v26 = vsel %vm4680_vm13, %v4363_v17, %v587_v54  ;;  %v769_v3 = vsel %vm767_vm0, %v768_v56, %v4665_v44 }
  0xc5   :  { %v1011_v57 = vand.u32 3, %v4406_v21  ;;  %v662_v53 = vadd.s32 %v4553_v23, %v4550_v58  ;;  %v678_v55 = vsub.s32 32, %v677_v16  ;;  %v683_v8 = vadd.s32 127, %v682_v60  ;;  %v4723_v4 = vpop.eup %3937 }
  0xc6   :  { %v770_v12 = vadd.s32 %v769_v3, %v765_v32  ;;  %v4727_v9 = vsel %vm178_vm12, nan, %v188_v22  ;;  %v288_v48 = vsel %vm286_vm10, %v4630_v2, %v287_v34  ;;  %v291_v21 = vsel %vm289_vm11, %v290_v13, %v4639_v47  ;;  %v4739_v23 = vpop.eup %3939 }
  0xc7   :  { %v492_v58 = vand.u32 3, %v491_v0  ;;  %vm282_vm4 = vweird.f32 %v4741_v14  ;;  %v391_v10 = vxor.u32 2147483648, %v4710_v40  ;;  %v394_v44 = vxor.u32 2147483648, %v4651_v36 }
  0xc8   :  { %3941 = vcosq.f32 %v590_v26  ;;  %vm608_vm5 = vcmp.lt.s32.totalorder %v4434_v52, 0  ;;  %v771_v43 = vadd.s32 536870912, %v770_v12  ;;  %v4749_v49 = vsel %vm4680_vm13, 0, %v589_v6 }
  0xc9   :  { %3943 = vsinq.f32 %v590_v26  ;;  %vm1013_vm6 = vcmp.eq.s32.totalorder %v1011_v57, 0  ;;  %vm1016_vm7 = vcmp.eq.s32.totalorder %v1011_v57, 2  ;;  %vm386_vm8 = vweird.f32 %v4751_v20 }
  0xca   :  { %v679_v41 = vshll.u32 %v4617_v30, %v677_v16  ;;  %v680_v1 = vshrl.u32 %v662_v53, %v678_v55  ;;  %v684_v42 = vshll.u32 %v683_v8, 23  ;;  %v4755_v25 = vshrl.u32 %v771_v43, 30 }
  0xcb   :  { %v395_v15 = vsel %vm393_vm2, %v394_v44, %v4710_v40  ;;  %vm494_vm9 = vcmp.eq.s32.totalorder %v492_v58, 0  ;;  %vm497_vm10 = vcmp.eq.s32.totalorder %v492_v58, 2  ;;  %v595_v54 = vadd.s32 3, %v4749_v49 }
  0xcc   :  { %v392_v30 = vsel %vm390_vm1, %v4651_v36, %v391_v10  ;;  %vm6193_vm11 = vweird.f32 %v4267_v51  ;;  %v495_v16 = vxor.u32 2147483648, %v4739_v23  ;;  %v498_v32 = vxor.u32 2147483648, %v4723_v4 }
  0xcd   :  { %v773_v56 = vshll.u32 %v4755_v25, 30  ;;  %v692_v0 = vsub.s32 4, %v4601_v61  ;;  %vm1012_vm13 = vcmp.lt.s32.totalorder %v1011_v57, 2  ;;  %v1015_v60 = vsel %vm1013_vm6, %v4532_v24, %v183_v7 }
  0xce   :  { %v1018_v22 = vsel %vm1016_vm7, %v186_v27, %v4536_v50  ;;  %v292_v6 = vsel %vm285_vm15, %v288_v48, %v291_v21  ;;  %v681_v26 = vor.u32 %v680_v1, %v679_v41  ;;  %v685_v3 = vor.u32 4788187, %v684_v42 }
  0xcf   :  { %v4783_v53 = vsub.s32 %v770_v12, %v773_v56  ;;  %vm493_vm14 = vcmp.lt.s32.totalorder %v492_v58, 2  ;;  %v496_v55 = vsel %vm494_vm9, %v4723_v4, %v495_v16  ;;  %v499_v24 = vsel %vm497_vm10, %v498_v32, %v4739_v23 }
  0xd0   :  { %v4793_v7 = vand.u32 3, %v595_v54  ;;  %v396_v50 = vsel %vm389_vm3, %v392_v30, %v395_v15  ;;  %v1019_v27 = vsel %vm1012_vm13, %v1015_v60, %v1018_v22  ;;  %v1114_v57 = vand.u32 3, %v4496_v63 }
  0xd1   :  { %v776_v11 = vsub.s32 0, %v4783_v53  ;;  %v4801_v8 = vsel %vm282_vm4, nan, %v292_v6  ;;  %vm4805_vm15 = vcmp.le.f32.partialorder %v606_v39, 0.7853982  ;;  %v693_v59 = vsel %vm608_vm5, %v692_v0, %v4601_v61 }
  0xd2   :  { %v1217_v48 = vand.u32 3, %v4588_v38  ;;  %v500_v21 = vsel %vm493_vm14, %v496_v55, %v499_v24  ;;  %v686_v58 = vand.u32 2147483647, %v685_v3  ;;  %v688_v43 = vcvt.s32.f32 %v681_v26 }
  0xd3   :  { %v3741_v63 = vmin.u32 %v776_v11, %v4783_v53  ;;  %v4816_v41 = vsel %vm386_vm8, nan, %v396_v50  ;;  %vm598_vm1 = vcmp.eq.s32.totalorder %v4793_v7, 0  ;;  %vm601_vm2 = vcmp.eq.s32.totalorder %v4793_v7, 2 }
  0xd4   :  { %v1020_v39 = vsel %vm178_vm12, nan, %v1019_v27  ;;  %vm597_vm0 = vcmp.lt.s32.totalorder %v4793_v7, 2  ;;  %v4825_v38 = vsel %vm4805_vm15, 0, %v693_v59  ;;  %vm1116_vm3 = vcmp.eq.s32.totalorder %v1114_v57, 0 }
  0xd5   :  { %v778_v61 = vclz %v3741_v63  ;;  %vm1119_vm6 = vcmp.eq.s32.totalorder %v1114_v57, 2  ;;  %v3942_v1 = vpop.eup %3941  ;;  %v4829_v42 = vsel %vm6193_vm11, nan, %v500_v21  ;;  %v699_v15 = vadd.s32 3, %v4825_v38 }
  0xd6   :  { %vm1219_vm7 = vcmp.eq.s32.totalorder %v1217_v48, 0  ;;  %vm1222_vm9 = vcmp.eq.s32.totalorder %v1217_v48, 2  ;;  %v3944_v5 = vpop.eup %3943  ;;  %v689_v54 = vmul.f32 %v688_v43, %v686_v58  ;;  %vm1115_vm12 = vcmp.lt.s32.totalorder %v1114_v57, 2 }
  0xd7   :  { %v3742_v30 = vadd.s32 4294967294, %v778_v61  ;;  %3945 = vrcp.f32 %v1020_v39  ;;  %vm712_vm10 = vcmp.lt.s32.totalorder %v4488_v19, 0  ;;  %v766_v56 = vadd.s32 %v4664_v18, %v4685_v28  ;;  %v4848_v28 = vld [vmem:[#allocation3 + $0x10] sm:$0xff] }
  0xd8   :  { %v1118_v0 = vsel %vm1116_vm3, %v4630_v2, %v287_v34  ;;  %v1121_v60 = vsel %vm1119_vm6, %v290_v13, %v4639_v47  ;;  %v1320_v22 = vand.u32 3, %v4694_v46  ;;  %vm1218_vm14 = vcmp.lt.s32.totalorder %v1217_v48, 2 }
  0xd9   :  { %vm3743_vm13 = vcmp.lt.s32.totalorder %v3742_v30, 0  ;;  %v1221_v6 = vsel %vm1219_vm7, %v4651_v36, %v391_v10  ;;  %v1224_v18 = vsel %vm1222_vm9, %v394_v44, %v4710_v40  ;;  %v599_v26 = vxor.u32 2147483648, %v3944_v5 }
  0xda   :  { %v602_v34 = vxor.u32 2147483648, %v3942_v1  ;;  %v781_v3 = vsel %vm3743_vm13, 0, %v3742_v30  ;;  %v1423_v2 = vand.u32 3, %v4749_v49  ;;  %v690_v47 = vxor.u32 2147483648, %v689_v54 }
  0xdb   :  { %vm4853_vm3 = vcmp.le.f32.partialorder %v710_v62, 0.7853982  ;;  %v782_v13 = vsub.s32 32, %v781_v3  ;;  %v783_v10 = vshll.u32 %v4783_v53, %v781_v3  ;;  %v786_v55 = vsub.s32 4294967266, %v781_v3  ;;  %v4907_v3 = vld [vmem:[#allocation3 + $0x8] sm:$0xff] }
  0xdc   :  { %vm594_vm6 = vweird.f32 %v4363_v17  ;;  %v603_v36 = vsel %vm601_vm2, %v602_v34, %v3944_v5  ;;  %vm1322_vm7 = vcmp.eq.s32.totalorder %v1320_v22, 0  ;;  %vm1325_vm9 = vcmp.eq.s32.totalorder %v1320_v22, 2 }
  0xdd   :  { %v1802_v40 = vand.u32 2139095040, %v4848_v28  ;;  %v600_v44 = vsel %vm598_vm1, %v3942_v1, %v599_v26  ;;  %v784_v62 = vshrl.u32 %v766_v56, %v782_v13  ;;  %v787_v49 = vadd.s32 127, %v786_v55 }
  0xde   :  { %v796_v24 = vsub.s32 4, %v4755_v25  ;;  %v1122_v50 = vsel %vm1115_vm12, %v1118_v0, %v1121_v60  ;;  %v1225_v53 = vsel %vm1218_vm14, %v1221_v6, %v1224_v18  ;;  %vm1425_vm13 = vcmp.eq.s32.totalorder %v1423_v2, 0  ;;  %v4888_v0 = vld [vmem:[#allocation6] sm:$0xff] }
  0xdf   :  { %vm1428_vm11 = vcmp.eq.s32.totalorder %v1423_v2, 2  ;;  %v691_v11 = vsel %vm608_vm5, %v690_v47, %v689_v54  ;;  %v785_v27 = vor.u32 %v784_v62, %v783_v10  ;;  %v788_v59 = vshll.u32 %v787_v49, 23 }
  0xe0   :  { %v1803_v21 = vshrl.u32 %v1802_v40, 23  ;;  %v604_v58 = vsel %vm597_vm0, %v600_v44, %v603_v36  ;;  %vm1321_vm1 = vcmp.lt.s32.totalorder %v1320_v22, 2  ;;  %v1324_v57 = vsel %vm1322_vm7, %v4723_v4, %v495_v16 }
  0xe1   :  { %v1327_v48 = vsel %vm1325_vm9, %v498_v32, %v4739_v23  ;;  %v789_v43 = vor.u32 4788187, %v788_v59  ;;  %v797_v63 = vsel %vm712_vm10, %v796_v24, %v4755_v25  ;;  %vm1424_vm5 = vcmp.lt.s32.totalorder %v1423_v2, 2  ;;  %v4890_v25 = vld [vmem:[#allocation6 + $0x8] sm:$0xff] }
  0xe2   :  { %v3780_v39 = vadd.s32 4294967169, %v1803_v21  ;;  %v694_v7 = vsel %vm4805_vm15, %v4434_v52, %v691_v11  ;;  %v1427_v61 = vsel %vm1425_vm13, %v3942_v1, %v599_v26  ;;  %v1430_v54 = vsel %vm1428_vm11, %v602_v34, %v3944_v5  ;;  %v1795_v26 = vld [vmem:[#allocation8] sm:$0xff]  ;;  %v4905_v34 = vld [vmem:[#allocation3] sm:$0xff] }
  0xe3   :  { %v1799_v16 = vand.u32 2147483647, %v4848_v28  ;;  %v790_v30 = vand.u32 2147483647, %v789_v43  ;;  %v792_v56 = vcvt.s32.f32 %v785_v27  ;;  %v1123_v4 = vsel %vm282_vm4, nan, %v1122_v50 }
  0xe4   :  { %v1809_v23 = vadd.s32 1, %v3780_v39  ;;  %v3946_v32 = vpop.eup %3945  ;;  %v4892_v60 = vand.u32 3, %v699_v15  ;;  %v799_v12 = vsel %vm4853_vm3, 0, %v797_v63  ;;  %v1226_v1 = vsel %vm386_vm8, nan, %v1225_v53 }
  0xe5   :  { %v1328_v5 = vsel %vm1321_vm1, %v1324_v57, %v1327_v48  ;;  %v4901_v14 = vsel %vm594_vm6, nan, %v604_v58  ;;  %3947 = vcosq.f32 %v694_v7  ;;  %v803_v6 = vadd.s32 3, %v799_v12 }
  0xe6   :  { %v1431_v18 = vsel %vm1424_vm5, %v1427_v61, %v1430_v54  ;;  %v1743_v15 = vmul.f32 %v3946_v32, %v4727_v9  ;;  %3949 = vrcp.f32 %v1123_v4  ;;  %v1806_v20 = vand.u32 8388607, %v1799_v16 }
  0xe7   :  { %vm1810_vm4 = vcmp.gt.s32.totalorder %v1809_v23, 0  ;;  %v793_v22 = vmul.f32 %v792_v56, %v790_v30  ;;  %vm6211_vm8 = vweird.f32 %v4267_v51  ;;  %v1781_v2 = vsub.f32 %v4905_v34, %v4888_v0  ;;  %v4926_v51 = vld [vmem:[#allocation3 + $0x18] sm:$0xff] }
  0xe8   :  { %v1329_v47 = vsel %vm6211_vm8, nan, %v1328_v5  ;;  %v1782_v13 = vsub.f32 %v4907_v3, %v4890_v25  ;;  %3951 = vsinq.f32 %v694_v7  ;;  %v1432_v9 = vsel %vm594_vm6, nan, %v1431_v18 }
  0xe9   :  { %v4920_v10 = vand.u32 3, %v4825_v38  ;;  %v1796_v55 = vmul.f32 0.2, %v1795_v26  ;;  %v4922_v36 = vand.u32 3, %v803_v6  ;;  %v4924_v40 = vand.u32 3, %v799_v12 }
  0xea   :  { %3953 = vrcp.f32 %v1226_v1  ;;  %v1811_v44 = vsel %vm1810_vm4, %v1809_v23, 0  ;;  %v1758_v62 = vmul.f32 0.1, %v1743_v15  ;;  %v1807_v49 = vor.u32 8388608, %v1806_v20  ;;  %v2030_v15 = vld [vmem:[#allocation8 + $0x8] sm:$0xff] }
  0xeb   :  { %3955 = vrcp.f32 %v1329_v47  ;;  %v1813_v24 = vand.u32 31, %v1811_v44  ;;  %v794_v50 = vxor.u32 2147483648, %v793_v22  ;;  %v4928_v17 = vmul.f32 %v1781_v2, %v1781_v2 }
  0xec   :  { %3957 = vrcp.f32 %v1432_v9  ;;  %v1784_v53 = vmul.f32 %v1782_v13, %v1782_v13  ;;  %v1812_v38 = vshrl.u32 %v1811_v44, 5  ;;  %v4932_v59 = vadd.f32 %v1796_v55, %v4926_v51 }
  0xed   :  { %v1814_v11 = vsub.s32 32, %v1813_v24  ;;  %v1816_v27 = vshll.u32 %v4134_v29, %v1813_v24  ;;  %v1819_v21 = vshll.u32 %v4135_v31, %v1813_v24  ;;  %v1822_v58 = vshll.u32 %v4136_v33, %v1813_v24 }
  0xee   :  { %v1825_v57 = vshll.u32 %v4137_v35, %v1813_v24  ;;  %v1828_v48 = vshll.u32 %v4138_v37, %v1813_v24  ;;  %vm705_vm11 = vcmp.eq.s32.totalorder %v4892_v60, 2  ;;  %v4941_v39 = vshll.u32 %v1807_v49, 8 }
  0xef   :  { %v1817_v43 = vshrl.u32 %v4135_v31, %v1814_v11  ;;  %v1820_v63 = vshrl.u32 %v4136_v33, %v1814_v11  ;;  %v2010_v7 = vmul.f32 %v4926_v51, %v1758_v62  ;;  %vm702_vm15 = vcmp.eq.s32.totalorder %v4892_v60, 0 }
  0xf0   :  { %v795_v61 = vsel %vm712_vm10, %v794_v50, %v793_v22  ;;  %v1823_v54 = vshrl.u32 %v4137_v35, %v1814_v11  ;;  %v1826_v30 = vshrl.u32 %v4138_v37, %v1814_v11  ;;  %v1829_v56 = vshrl.u32 %v4139_v45, %v1814_v11 }
  0xf1   :  { %v1815_v4 = vshrl.u32 %v4134_v29, %v1814_v11  ;;  %v1818_v23 = vor.u32 %v1817_v43, %v1816_v27  ;;  %v1821_v32 = vor.u32 %v1820_v63, %v1819_v21  ;;  %vm1831_vm2 = vcmp.lt.s32.totalorder %v1812_v38, 1  ;;  %v2266_v63 = vld [vmem:[#allocation8 + $0x10] sm:$0xff] }
  0xf2   :  { %v1824_v12 = vor.u32 %v1823_v54, %v1822_v58  ;;  %v1827_v1 = vor.u32 %v1826_v30, %v1825_v57  ;;  %v1830_v5 = vor.u32 %v1829_v56, %v1828_v48  ;;  %vm1833_vm0 = vcmp.lt.s32.totalorder %v1812_v38, 3  ;;  %v3948_v6 = vpop.eup %3947 }
  0xf3   :  { %vm1832_vm12 = vcmp.lt.s32.totalorder %v1812_v38, 2  ;;  %vm1834_vm14 = vcmp.lt.s32.totalorder %v1812_v38, 4  ;;  %v1839_v18 = vsel %vm1831_vm2, %v1818_v23, %v1821_v32  ;;  %v4953_v26 = vadd.f32 %v2010_v7, %v4848_v28  ;;  %v3950_v20 = vpop.eup %3949 }
  0xf4   :  { %vm701_vm10 = vcmp.lt.s32.totalorder %v4892_v60, 2  ;;  %v1836_v22 = vsel %vm1834_vm14, %v1824_v12, 2102212464  ;;  %v1840_v47 = vsel %vm1834_vm14, %v1827_v1, 920167782  ;;  %v1843_v2 = vsel %vm1831_vm2, %v1821_v32, %v1824_v12 }
  0xf5   :  { %v1844_v13 = vsel %vm1834_vm14, %v1830_v5, 1326507024  ;;  %v1835_v9 = vsel %vm1831_vm2, %v1815_v4, %v1818_v23  ;;  %v1837_v55 = vsel %vm1833_vm0, %v1821_v32, %v1836_v22  ;;  %v1841_v44 = vsel %vm1833_vm0, %v1824_v12, %v1840_v47  ;;  %v3952_v49 = vpop.eup %3951  ;;  %v2502_v12 = vld [vmem:[#allocation8 + $0x18] sm:$0xff] }
  0xf6   :  { %v1845_v62 = vsel %vm1833_vm0, %v1827_v1, %v1844_v13  ;;  %v706_v24 = vxor.u32 2147483648, %v3948_v6  ;;  %v1842_v50 = vsel %vm1832_vm12, %v1839_v18, %v1841_v44  ;;  %v2031_v27 = vmul.f32 0.2, %v2030_v15  ;;  %v2738_v44 = vld [vmem:[#allocation8 + $0x20] sm:$0xff] }
  0xf7   :  { %v1846_v11 = vsel %vm1832_vm12, %v1843_v2, %v1845_v62  ;;  %v3954_v21 = vpop.eup %3953  ;;  %v798_v58 = vsel %vm4853_vm3, %v4488_v19, %v795_v61  ;;  %v1745_v57 = vmul.f32 %v3950_v20, %v4801_v8  ;;  %vm698_vm6 = vweird.f32 %v4434_v52 }
  0xf8   :  { %v4968_v48 = vmul.u32.u64.low %v4941_v39, %v1846_v11  ;;  %v4969_v43 = vmul.u32.u64.high %v4941_v39, %v1846_v11, %v4968_v48  ;;  %v4971_v7 = vpop.eup %3955  ;;  %v1838_v54 = vsel %vm1832_vm12, %v1835_v9, %v1837_v55  ;;  %v2038_v19 = vand.u32 2139095040, %v4953_v26 }
  0xf9   :  { %v4976_v30 = vmul.u32.u64.low %v4941_v39, %v1842_v50  ;;  %v4977_v56 = vmul.u32.u64.high %v4941_v39, %v1842_v50, %v4976_v30  ;;  %v4981_v46 = vpop.eup %3957  ;;  %v703_v8 = vxor.u32 2147483648, %v3952_v49  ;;  %vm1528_vm3 = vcmp.eq.s32.totalorder %v4920_v10, 0 }
  0xfa   :  { %vm1531_vm7 = vcmp.eq.s32.totalorder %v4920_v10, 2  ;;  %v4986_v61 = vadd.f32 %v1784_v53, %v4928_v17  ;;  %v707_v38 = vsel %vm705_vm11, %v706_v24, %v3952_v49  ;;  %v2039_v4 = vshrl.u32 %v2038_v19, 23 }
  0xfb   :  { %v4991_v23 = vadd.f32 %v2031_v27, %v4932_v59  ;;  %v2267_v32 = vmul.f32 0.2, %v2266_v63  ;;  %v704_v1 = vsel %vm702_vm15, %v3948_v6, %v703_v8  ;;  %3959 = vcosq.f32 %v798_v58 }
  0xfc   :  { %v1854_v5 = vmul.u32 %v4941_v39, %v1838_v54  ;;  %vm1856_vm9 = vc.u32 %v4969_v43, %v4976_v30  ;;  %v1759_v17 = vmul.f32 0.1, %v1745_v57  ;;  %v1857_v53 = vadd.s32 1, %v4977_v56 }
  0xfd   :  { %v2035_v18 = vand.u32 2147483647, %v4953_v26  ;;  %v3788_v15 = vadd.s32 4294967169, %v2039_v4  ;;  %vm1527_vm13 = vcmp.lt.s32.totalorder %v4920_v10, 2  ;;  %v1530_v20 = vsel %vm1528_vm3, %v3948_v6, %v703_v8 }
  0xfe   :  { %v1533_v22 = vsel %vm1531_vm7, %v706_v24, %v3952_v49  ;;  %v2503_v47 = vmul.f32 0.2, %v2502_v12  ;;  %3961 = vsinq.f32 %v798_v58  ;;  %v1858_v39 = vsel %vm1856_vm9, %v1857_v53, %v4977_v56 }
  0xff   :  { %v2045_v2 = vadd.s32 1, %v3788_v15  ;;  %v5007_v13 = vadd.f32 %v2267_v32, %v4991_v23  ;;  %v708_v9 = vsel %vm701_vm10, %v704_v1, %v707_v38  ;;  %3963 = vrsqrt.f32 %v4986_v61 }
 0x100   :  { %v5013_v55 = vmul.f32 0.2, %v4926_v51  ;;  %v1859_v6 = vadd.s32 %v1858_v39, %v1854_v5  ;;  %v1534_v10 = vsel %vm1527_vm13, %v1530_v20, %v1533_v22  ;;  %v2042_v62 = vand.u32 8388607, %v2035_v18 }
 0x101   :  { %vm2046_vm1 = vcmp.gt.s32.totalorder %v2045_v2, 0  ;;  %v2246_v49 = vmul.f32 %v4932_v59, %v1759_v17  ;;  %v5020_v60 = vmul.f32 0.2, %v4932_v59  ;;  %v5023_v51 = vmul.f32 0.2, %v4991_v23 }
 0x102   :  { %v1860_v50 = vadd.s32 536870912, %v1859_v6  ;;  %v2047_v11 = vsel %vm2046_vm1, %v2045_v2, 0  ;;  %v5026_v58 = vadd.f32 %v2503_v47, %v5007_v13  ;;  %v5028_v57 = vmul.f32 0.2, %v2738_v44 }
 0x103   :  { %v2049_v27 = vand.u32 31, %v2047_v11  ;;  %v5032_v48 = vsel %vm698_vm6, nan, %v708_v9  ;;  %v1535_v63 = vsel %vm698_vm6, nan, %v1534_v10  ;;  %v1747_v59 = vmul.f32 %v3954_v21, %v4816_v41 }
 0x104   :  { %v5037_v54 = vshrl.u32 %v1860_v50, 30  ;;  %v2043_v56 = vor.u32 8388608, %v2042_v62  ;;  %v5039_v19 = vshrl.u32 %v2047_v11, 5  ;;  %v5042_v38 = vadd.f32 %v2246_v49, %v4953_v26 }
 0x105   :  { %v2050_v8 = vsub.s32 32, %v2049_v27  ;;  %v2052_v32 = vshll.u32 %v4134_v29, %v2049_v27  ;;  %v2055_v12 = vshll.u32 %v4135_v31, %v2049_v27  ;;  %v2061_v52 = vshll.u32 %v4137_v35, %v2049_v27 }
 0x106   :  { %v1862_v4 = vshll.u32 %v5037_v54, 30  ;;  %v2058_v21 = vshll.u32 %v4136_v33, %v2049_v27  ;;  %v2064_v15 = vshll.u32 %v4138_v37, %v2049_v27  ;;  %v5061_v47 = vmul.f32 %v4971_v7, %v4829_v42 }
 0x107   :  { %v2053_v1 = vshrl.u32 %v4135_v31, %v2050_v8  ;;  %v2056_v41 = vshrl.u32 %v4136_v33, %v2050_v8  ;;  %v2059_v5 = vshrl.u32 %v4137_v35, %v2050_v8  ;;  %v2062_v53 = vshrl.u32 %v4138_v37, %v2050_v8 }
 0x108   :  { %v5052_v17 = vsub.s32 %v1859_v6, %v1862_v4  ;;  %v2065_v20 = vshrl.u32 %v4139_v45, %v2050_v8  ;;  %v5057_v22 = vpop.eup %3959  ;;  %v5065_v39 = vmul.f32 %v4981_v46, %v4901_v14  ;;  %3965 = vrcp.f32 %v1535_v63 }
 0x109   :  { %v2051_v2 = vshrl.u32 %v4134_v29, %v2050_v8  ;;  %v2054_v6 = vor.u32 %v2053_v1, %v2052_v32  ;;  %v2057_v44 = vor.u32 %v2056_v41, %v2055_v12  ;;  %v2063_v10 = vor.u32 %v2062_v53, %v2061_v52 }
 0x10a   :  { %v1865_v9 = vsub.s32 0, %v5052_v17  ;;  %v1760_v62 = vmul.f32 0.1, %v1747_v59  ;;  %v2060_v49 = vor.u32 %v2059_v5, %v2058_v21  ;;  %vm2067_vm5 = vcmp.lt.s32.totalorder %v5039_v19, 1 }
 0x10b   :  { %v2274_v50 = vand.u32 2139095040, %v5042_v38  ;;  %v5071_v42 = vpop.eup %3961  ;;  %v6195_v7 = vxor.u32 2147483648, %v5057_v22  ;;  %vm1631_vm4 = vcmp.eq.s32.totalorder %v4924_v40, 0  ;;  %vm1634_vm8 = vcmp.eq.s32.totalorder %v4924_v40, 2 }
 0x10c   :  { %v3781_v14 = vmin.u32 %v1865_v9, %v5052_v17  ;;  %v2066_v46 = vor.u32 %v2065_v20, %v2064_v15  ;;  %v2083_v11 = vshll.u32 %v2043_v56, 8  ;;  %v3964_v27 = vpop.eup %3963  ;;  %vm2068_vm11 = vcmp.lt.s32.totalorder %v5039_v19, 2 }
 0x10d   :  { %vm2069_vm15 = vcmp.lt.s32.totalorder %v5039_v19, 3  ;;  %vm2070_vm2 = vcmp.lt.s32.totalorder %v5039_v19, 4  ;;  %v2071_v63 = vsel %vm2067_vm5, %v2051_v2, %v2054_v6  ;;  %vm1801_vm0 = vcmp.lt.s32.totalorder %v4848_v28, 0 }
 0x10e   :  { %v1867_v59 = vclz %v3781_v14  ;;  %v2072_v8 = vsel %vm2070_vm2, %v2060_v49, 2102212464  ;;  %v2075_v4 = vsel %vm2067_vm5, %v2054_v6, %v2057_v44  ;;  %v2076_v32 = vsel %vm2070_vm2, %v2063_v10, 920167782 }
 0x10f   :  { %v6194_v56 = vxor.u32 2147483648, %v5071_v42  ;;  %v2079_v12 = vsel %vm2067_vm5, %v2057_v44, %v2060_v49  ;;  %v2275_v52 = vshrl.u32 %v2274_v50, 23  ;;  %v2482_v1 = vmul.f32 %v4991_v23, %v1760_v62 }
 0x110   :  { %vm1788_vm12 = vcmp.eq.f32.partialorder %v4986_v61, inf  ;;  %v3782_v41 = vadd.s32 4294967294, %v1867_v59  ;;  %v2073_v21 = vsel %vm2069_vm15, %v2057_v44, %v2072_v8  ;;  %v2077_v5 = vsel %vm2069_vm15, %v2060_v49, %v2076_v32 }
 0x111   :  { %v2080_v53 = vsel %vm2070_vm2, %v2066_v46, 1326507024  ;;  %vm1630_vm14 = vcmp.lt.s32.totalorder %v4924_v40, 2  ;;  %vm5097_vm10 = vcmp.le.f32.partialorder %v1799_v16, 0.7853982  ;;  %v1855_v23 = vadd.s32 %v4976_v30, %v4969_v43 }
 0x112   :  { %v2074_v20 = vsel %vm2068_vm11, %v2071_v63, %v2073_v21  ;;  %v2078_v2 = vsel %vm2068_vm11, %v2075_v4, %v2077_v5  ;;  %v2081_v9 = vsel %vm2069_vm15, %v2063_v10, %v2080_v53  ;;  %vm3783_vm6 = vcmp.lt.s32.totalorder %v3782_v41, 0 }
 0x113   :  { %v2082_v6 = vsel %vm2068_vm11, %v2079_v12, %v2081_v9  ;;  %v5111_v16 = vmul.u32.u64.low %v2083_v11, %v2078_v2  ;;  %v5112_v44 = vmul.u32.u64.high %v2083_v11, %v2078_v2, %v5111_v16  ;;  %v1870_v62 = vsel %vm3783_vm6, 0, %v3782_v41 }
 0x114   :  { %v1885_v43 = vsub.s32 4, %v5037_v54  ;;  %v5116_v30 = vmul.u32.u64.low %v2083_v11, %v2082_v6  ;;  %v5117_v49 = vmul.u32.u64.high %v2083_v11, %v2082_v6, %v5116_v30  ;;  %v1871_v50 = vsub.s32 32, %v1870_v62 }
 0x115   :  { %v1872_v14 = vshll.u32 %v5052_v17, %v1870_v62  ;;  %v1875_v46 = vsub.s32 4294967266, %v1870_v62  ;;  %v3796_v63 = vadd.s32 4294967169, %v2275_v52  ;;  %v1787_v10 = vmul.f32 %v3964_v27, %v4986_v61  ;;  %v3966_v4 = vpop.eup %3965 }
 0x116   :  { %v2090_v59 = vmul.u32 %v2083_v11, %v2074_v20  ;;  %v2271_v19 = vand.u32 2147483647, %v5042_v38  ;;  %v5123_v8 = vadd.f32 %v2482_v1, %v5042_v38  ;;  %v1873_v32 = vshrl.u32 %v1855_v23, %v1871_v50 }
 0x117   :  { %v1876_v12 = vadd.s32 127, %v1875_v46  ;;  %v2093_v41 = vadd.s32 1, %v5112_v44  ;;  %v2281_v21 = vadd.s32 1, %v3796_v63  ;;  %v1633_v17 = vsel %vm1631_vm4, %v5057_v22, %v6194_v56 }
 0x118   :  { %v1636_v11 = vsel %vm1634_vm8, %v6195_v7, %v5071_v42  ;;  %v1886_v27 = vsel %vm1801_vm0, %v1885_v43, %v5037_v54  ;;  %vm2092_vm3 = vc.u32 %v5117_v49, %v5111_v16  ;;  %v1874_v52 = vor.u32 %v1873_v32, %v1872_v14 }
 0x119   :  { %v1877_v1 = vshll.u32 %v1876_v12, 23  ;;  %v2094_v5 = vsel %vm2092_vm3, %v2093_v41, %v5112_v44  ;;  %vm2282_vm7 = vcmp.gt.s32.totalorder %v2281_v21, 0  ;;  %v2278_v23 = vand.u32 8388607, %v2271_v19 }
 0x11a   :  { %v2095_v53 = vadd.s32 %v2094_v5, %v2090_v59  ;;  %v2283_v20 = vsel %vm2282_vm7, %v2281_v21, 0  ;;  %v2510_v2 = vand.u32 2139095040, %v5123_v8  ;;  %v1881_v6 = vcvt.s32.f32 %v1874_v52 }
 0x11b   :  { %v1878_v9 = vor.u32 4788187, %v1877_v1  ;;  %v1888_v54 = vsel %vm5097_vm10, 0, %v1886_v27  ;;  %v2285_v62 = vand.u32 31, %v2283_v20  ;;  %v5148_v43 = vmul.f32 0.1, %v5061_v47 }
 0x11c   :  { %v5151_v30 = vmul.f32 0.1, %v5065_v39  ;;  %v5156_v44 = vsel %vm1788_vm12, %v4986_v61, %v1787_v10  ;;  %v2096_v50 = vadd.s32 536870912, %v2095_v53  ;;  %v5160_v14 = vsel %vm1630_vm14, %v1633_v17, %v1636_v11 }
 0x11d   :  { %v5163_v46 = vmul.f32 %v3966_v4, %v5032_v48  ;;  %v1879_v63 = vand.u32 2147483647, %v1878_v9  ;;  %v2286_v59 = vsub.s32 32, %v2285_v62  ;;  %v1997_v47 = vadd.s32 3, %v1888_v54 }
 0x11e   :  { %v5165_v32 = vshrl.u32 %v2096_v50, 30  ;;  %v2279_v39 = vor.u32 8388608, %v2278_v23  ;;  %v2511_v12 = vshrl.u32 %v2510_v2, 23  ;;  %v2288_v21 = vshll.u32 %v4134_v29, %v2285_v62 }
 0x11f   :  { %v1882_v41 = vmul.f32 %v1881_v6, %v1879_v63  ;;  %v2289_v10 = vshrl.u32 %v4135_v31, %v2286_v59  ;;  %v2291_v27 = vshll.u32 %v4135_v31, %v2285_v62  ;;  %v2292_v17 = vshrl.u32 %v4136_v33, %v2286_v59 }
 0x120   :  { %v2098_v40 = vshll.u32 %v5165_v32, 30  ;;  %v2297_v48 = vshll.u32 %v4137_v35, %v2285_v62  ;;  %v2298_v4 = vshrl.u32 %v4138_v37, %v2286_v59  ;;  %v2284_v52 = vshrl.u32 %v2283_v20, 5 }
 0x121   :  { %v1883_v11 = vxor.u32 2147483648, %v1882_v41  ;;  %v2294_v1 = vshll.u32 %v4136_v33, %v2285_v62  ;;  %v2295_v5 = vshrl.u32 %v4137_v35, %v2286_v59  ;;  %v2300_v2 = vshll.u32 %v4138_v37, %v2285_v62 }
 0x122   :  { %v5176_v23 = vsub.s32 %v2095_v53, %v2098_v40  ;;  %v2301_v9 = vshrl.u32 %v4139_v45, %v2286_v59  ;;  %v3804_v6 = vadd.s32 4294967169, %v2511_v12  ;;  %v2287_v63 = vshrl.u32 %v4134_v29, %v2286_v59 }
 0x123   :  { %v1884_v50 = vsel %vm1801_vm0, %v1883_v11, %v1882_v41  ;;  %v2290_v56 = vor.u32 %v2289_v10, %v2288_v21  ;;  %v5183_v7 = vshll.u32 %v2279_v39, 8  ;;  %v2293_v40 = vor.u32 %v2292_v17, %v2291_v27 }
 0x124   :  { %v1887_v20 = vsel %vm5097_vm10, %v4848_v28, %v1884_v50  ;;  %v2101_v53 = vsub.s32 0, %v5176_v23  ;;  %v2299_v24 = vor.u32 %v2298_v4, %v2297_v48  ;;  %v2296_v62 = vor.u32 %v2295_v5, %v2294_v1 }
 0x125   :  { %3967 = vcosq.f32 %v1887_v20  ;;  %vm2303_vm9 = vcmp.lt.s32.totalorder %v2284_v52, 1  ;;  %vm2306_vm13 = vcmp.lt.s32.totalorder %v2284_v52, 4  ;;  %v2302_v41 = vor.u32 %v2301_v9, %v2300_v2 }
 0x126   :  { %3969 = vsinq.f32 %v1887_v20  ;;  %v3789_v12 = vmin.u32 %v2101_v53, %v5176_v23  ;;  %v2517_v59 = vadd.s32 1, %v3804_v6  ;;  %vm2304_vm1 = vcmp.lt.s32.totalorder %v2284_v52, 2 }
 0x127   :  { %vm2305_vm5 = vcmp.lt.s32.totalorder %v2284_v52, 3  ;;  %v2307_v39 = vsel %vm2303_vm9, %v2287_v63, %v2290_v56  ;;  %v2308_v15 = vsel %vm2306_vm13, %v2296_v62, 2102212464  ;;  %vm2037_vm4 = vcmp.lt.s32.totalorder %v4953_v26, 0 }
 0x128   :  { %v2103_v21 = vclz %v3789_v12  ;;  %v2309_v10 = vsel %vm2305_vm5, %v2293_v40, %v2308_v15  ;;  %v2311_v27 = vsel %vm2303_vm9, %v2290_v56, %v2293_v40  ;;  %v2312_v17 = vsel %vm2306_vm13, %v2299_v24, 920167782 }
 0x129   :  { %v1892_v48 = vand.u32 3, %v1888_v54  ;;  %v1998_v4 = vand.u32 3, %v1997_v47  ;;  %v2091_v11 = vadd.s32 %v5111_v16, %v5117_v49  ;;  %v2507_v1 = vand.u32 2147483647, %v5123_v8 }
 0x12a   :  { %v3790_v5 = vadd.s32 4294967294, %v2103_v21  ;;  %v2313_v2 = vsel %vm2305_vm5, %v2296_v62, %v2312_v17  ;;  %v2315_v9 = vsel %vm2303_vm9, %v2293_v40, %v2296_v62  ;;  %v2316_v6 = vsel %vm2306_vm13, %v2302_v41, 1326507024 }
 0x12b   :  { %vm5204_vm8 = vcmp.le.f32.partialorder %v2035_v18, 0.7853982  ;;  %v2310_v54 = vsel %vm2304_vm1, %v2307_v39, %v2309_v10  ;;  %v2314_v47 = vsel %vm2304_vm1, %v2311_v27, %v2313_v2  ;;  %v2317_v16 = vsel %vm2305_vm5, %v2299_v24, %v2316_v6 }
 0x12c   :  { %vm2518_vm11 = vcmp.gt.s32.totalorder %v2517_v59, 0  ;;  %vm3791_vm15 = vcmp.lt.s32.totalorder %v3790_v5, 0  ;;  %v2318_v49 = vsel %vm2304_vm1, %v2315_v9, %v2317_v16  ;;  %vm1891_vm2 = vweird.f32 %v4848_v28 }
 0x12d   :  { %v5213_v50 = vmul.u32.u64.low %v5183_v7, %v2314_v47  ;;  %v5214_v63 = vmul.u32.u64.high %v5183_v7, %v2314_v47, %v5213_v50  ;;  %v2106_v18 = vsel %vm3791_vm15, 0, %v3790_v5  ;;  %v2121_v20 = vsub.s32 4, %v5165_v32 }
 0x12e   :  { %v5220_v53 = vmul.u32.u64.low %v5183_v7, %v2318_v49  ;;  %v5221_v40 = vmul.u32.u64.high %v5183_v7, %v2318_v49, %v5220_v53  ;;  %vm1893_vm0 = vcmp.lt.s32.totalorder %v1892_v48, 2  ;;  %v2107_v24 = vsub.s32 32, %v2106_v18 }
 0x12f   :  { %v2108_v62 = vshll.u32 %v5176_v23, %v2106_v18  ;;  %v2111_v52 = vsub.s32 4294967266, %v2106_v18  ;;  %vm1894_vm12 = vcmp.eq.s32.totalorder %v1892_v48, 0  ;;  %v2326_v12 = vmul.u32 %v5183_v7, %v2310_v54 }
 0x130   :  { %v5227_v41 = vand.u32 8388607, %v2507_v1  ;;  %v2519_v39 = vsel %vm2518_vm11, %v2517_v59, 0  ;;  %vm1897_vm14 = vcmp.eq.s32.totalorder %v1892_v48, 2  ;;  %v2109_v15 = vshrl.u32 %v2091_v11, %v2107_v24 }
 0x131   :  { %v2112_v21 = vadd.s32 127, %v2111_v52  ;;  %v2329_v10 = vadd.s32 1, %v5214_v63  ;;  %vm1999_vm10 = vcmp.lt.s32.totalorder %v1998_v4, 2  ;;  %vm2003_vm6 = vcmp.eq.s32.totalorder %v1998_v4, 2 }
 0x132   :  { %v2122_v23 = vsel %vm2037_vm4, %v2121_v20, %v5165_v32  ;;  %vm2328_vm3 = vc.u32 %v5221_v40, %v5213_v50  ;;  %v3968_v7 = vpop.eup %3967  ;;  %v2110_v27 = vor.u32 %v2109_v15, %v2108_v62  ;;  %v2521_v59 = vand.u32 31, %v2519_v39 }
 0x133   :  { %v2113_v17 = vshll.u32 %v2112_v21, 23  ;;  %v2330_v5 = vsel %vm2328_vm3, %v2329_v10, %v5214_v63  ;;  %v3970_v2 = vpop.eup %3969  ;;  %v1898_v11 = vxor.u32 2147483648, %v3968_v7  ;;  %vm2000_vm7 = vcmp.eq.s32.totalorder %v1998_v4, 0 }
 0x134   :  { %v2331_v9 = vadd.s32 %v2330_v5, %v2326_v12  ;;  %v2515_v6 = vor.u32 8388608, %v5227_v41  ;;  %v1895_v54 = vxor.u32 2147483648, %v3970_v2  ;;  %v2117_v16 = vcvt.s32.f32 %v2110_v27 }
 0x135   :  { %v2114_v47 = vor.u32 4788187, %v2113_v17  ;;  %v2124_v32 = vsel %vm5204_vm8, 0, %v2122_v23  ;;  %v1899_v49 = vsel %vm1897_vm14, %v1898_v11, %v3970_v2  ;;  %v2005_v18 = vsel %vm2003_vm6, %v1898_v11, %v3970_v2 }
 0x136   :  { %v5242_v20 = vand.u32 3, %v2124_v32  ;;  %v2332_v63 = vadd.s32 536870912, %v2331_v9  ;;  %v1896_v53 = vsel %vm1894_vm12, %v3968_v7, %v1895_v54  ;;  %v2002_v24 = vsel %vm2000_vm7, %v3968_v7, %v1895_v54 }
 0x137   :  { %v2115_v62 = vand.u32 2147483647, %v2114_v47  ;;  %v2522_v52 = vsub.s32 32, %v2521_v59  ;;  %v1900_v12 = vsel %vm1893_vm0, %v1896_v53, %v1899_v49  ;;  %v2006_v41 = vsel %vm1999_vm10, %v2002_v24, %v2005_v18 }
 0x138   :  { %v5247_v15 = vshrl.u32 %v2332_v63, 30  ;;  %v5249_v21 = vshrl.u32 %v2519_v39, 5  ;;  %v1901_v10 = vsel %vm1891_vm2, nan, %v1900_v12  ;;  %v2007_v23 = vsel %vm1891_vm2, nan, %v2006_v41 }
 0x139   :  { %v2118_v27 = vmul.f32 %v2117_v16, %v2115_v62  ;;  %v2524_v17 = vshll.u32 %v4134_v29, %v2521_v59  ;;  %v1902_v7 = vmul.f32 %v1901_v10, %v5013_v55  ;;  %v2008_v48 = vmul.f32 %v2007_v23, %v5013_v55 }
 0x13a   :  { %v2334_v4 = vshll.u32 %v5247_v15, 30  ;;  %v2527_v5 = vshll.u32 %v4135_v31, %v2521_v59  ;;  %v2525_v39 = vshrl.u32 %v4135_v31, %v2522_v52  ;;  %v2528_v11 = vshrl.u32 %v4136_v33, %v2522_v52 }
 0x13b   :  { %v2119_v2 = vxor.u32 2147483648, %v2118_v27  ;;  %v2530_v54 = vshll.u32 %v4136_v33, %v2521_v59  ;;  %v5264_v28 = vadd.f32 %v1902_v7, %v4905_v34  ;;  %v5267_v47 = vadd.f32 %v2008_v48, %v4907_v3 }
 0x13c   :  { %v5269_v16 = vsub.s32 %v2331_v9, %v2334_v4  ;;  %v2531_v55 = vshrl.u32 %v4137_v35, %v2522_v52  ;;  %v2533_v18 = vshll.u32 %v4137_v35, %v2521_v59  ;;  %v2534_v63 = vshrl.u32 %v4138_v37, %v2522_v52 }
 0x13d   :  { %v2120_v49 = vsel %vm2037_vm4, %v2119_v2, %v2118_v27  ;;  %v2536_v53 = vshll.u32 %v4138_v37, %v2521_v59  ;;  %v2013_v34 = vsub.f32 %v5264_v28, %v4888_v0  ;;  %v2014_v3 = vsub.f32 %v5267_v47, %v4890_v25 }
 0x13e   :  { %v2123_v9 = vsel %vm5204_vm8, %v4953_v26, %v2120_v49  ;;  %v2337_v24 = vsub.s32 0, %v5269_v16  ;;  %v2233_v62 = vadd.s32 3, %v2124_v32  ;;  %v2537_v12 = vshrl.u32 %v4139_v45, %v2522_v52 }
 0x13f   :  { %3971 = vcosq.f32 %v2123_v9  ;;  %vm2539_vm9 = vcmp.lt.s32.totalorder %v5249_v21, 1  ;;  %v2015_v41 = vmul.f32 %v2013_v34, %v2013_v34  ;;  %v2016_v59 = vmul.f32 %v2014_v3, %v2014_v3 }
 0x140   :  { %3973 = vsinq.f32 %v2123_v9  ;;  %v3797_v10 = vmin.u32 %v2337_v24, %v5269_v16  ;;  %v2523_v23 = vshrl.u32 %v4134_v29, %v2522_v52  ;;  %v2526_v27 = vor.u32 %v2525_v39, %v2524_v17 }
 0x141   :  { %v2529_v7 = vor.u32 %v2528_v11, %v2527_v5  ;;  %v2532_v48 = vor.u32 %v2531_v55, %v2530_v54  ;;  %v5289_v56 = vadd.f32 %v2016_v59, %v2015_v41  ;;  %vm2273_vm13 = vcmp.lt.s32.totalorder %v5042_v38, 0  ;;  %v5319_v54 = vld [vmem:[#allocation9 + $0x30] sm:$0xff] }
 0x142   :  { %v2339_v4 = vclz %v3797_v10  ;;  %v2535_v32 = vor.u32 %v2534_v63, %v2533_v18  ;;  %v2538_v2 = vor.u32 %v2537_v12, %v2536_v53  ;;  %v5292_v49 = vand.u32 3, %v2233_v62 }
 0x143   :  { %v2327_v34 = vadd.s32 %v5213_v50, %v5221_v40  ;;  %v5296_v3 = vshll.u32 %v2515_v6, 8  ;;  %v2718_v52 = vmul.f32 %v5007_v13, %v5148_v43  ;;  %3975 = vrsqrt.f32 %v5289_v56 }
 0x144   :  { %v2357_v17 = vsub.s32 4, %v5247_v15  ;;  %vm2540_vm1 = vcmp.lt.s32.totalorder %v5249_v21, 2  ;;  %vm2541_vm5 = vcmp.lt.s32.totalorder %v5249_v21, 3  ;;  %vm2130_vm4 = vcmp.eq.s32.totalorder %v5242_v20, 0 }
 0x145   :  { %vm5307_vm8 = vcmp.le.f32.partialorder %v2271_v19, 0.7853982  ;;  %v3798_v50 = vadd.s32 4294967294, %v2339_v4  ;;  %vm2542_vm11 = vcmp.lt.s32.totalorder %v5249_v21, 4  ;;  %v2543_v43 = vsel %vm2539_vm9, %v2523_v23, %v2526_v27 }
 0x146   :  { %v2547_v40 = vsel %vm2539_vm9, %v2526_v27, %v2529_v7  ;;  %vm2129_vm15 = vcmp.lt.s32.totalorder %v5242_v20, 2  ;;  %v2544_v6 = vsel %vm2542_vm11, %v2532_v48, 2102212464  ;;  %v2548_v39 = vsel %vm2542_vm11, %v2535_v32, 920167782 }
 0x147   :  { %v2551_v11 = vsel %vm2539_vm9, %v2529_v7, %v2532_v48  ;;  %v2552_v19 = vsel %vm2542_vm11, %v2538_v2, 1326507024  ;;  %vm6196_vm2 = vweird.f32 %v5319_v54  ;;  %vm2127_vm0 = vweird.f32 %v4953_v26 }
 0x148   :  { %vm3799_vm12 = vcmp.lt.s32.totalorder %v3798_v50, 0  ;;  %v2545_v55 = vsel %vm2541_vm5, %v2529_v7, %v2544_v6  ;;  %v2549_v18 = vsel %vm2541_vm5, %v2532_v48, %v2548_v39  ;;  %v2553_v63 = vsel %vm2541_vm5, %v2535_v32, %v2552_v19 }
 0x149   :  { %v2342_v53 = vsel %vm3799_vm12, 0, %v3798_v50  ;;  %v2550_v9 = vsel %vm2540_vm1, %v2547_v40, %v2549_v18  ;;  %v2554_v24 = vsel %vm2540_vm1, %v2551_v11, %v2553_v63  ;;  %v5334_v62 = vadd.f32 %v2718_v52, %v5123_v8 }
 0x14a   :  { %v2343_v12 = vsub.s32 32, %v2342_v53  ;;  %v2344_v41 = vshll.u32 %v5269_v16, %v2342_v53  ;;  %v2347_v59 = vsub.s32 4294967266, %v2342_v53  ;;  %v2546_v10 = vsel %vm2540_vm1, %v2543_v43, %v2545_v55 }
 0x14b   :  { %v5340_v23 = vmul.u32.u64.low %v5296_v3, %v2554_v24  ;;  %v5341_v27 = vmul.u32.u64.high %v5296_v3, %v2554_v24, %v5340_v23  ;;  %v5344_v7 = vmul.u32.u64.low %v5296_v3, %v2550_v9  ;;  %v5345_v48 = vmul.u32.u64.high %v5296_v3, %v2550_v9, %v5344_v7 }
 0x14c   :  { %vm2133_vm14 = vcmp.eq.s32.totalorder %v5242_v20, 2  ;;  %v2345_v4 = vshrl.u32 %v2327_v34, %v2343_v12  ;;  %v2348_v32 = vadd.s32 127, %v2347_v59  ;;  %v2358_v16 = vsel %vm2273_vm13, %v2357_v17, %v5247_v15  ;;  %v3972_v2 = vpop.eup %3971 }
 0x14d   :  { %vm2235_vm10 = vcmp.lt.s32.totalorder %v5292_v49, 2  ;;  %vm2236_vm6 = vcmp.eq.s32.totalorder %v5292_v49, 0  ;;  %vm2239_vm3 = vcmp.eq.s32.totalorder %v5292_v49, 2  ;;  %v2746_v21 = vand.u32 2139095040, %v5334_v62  ;;  %v3974_v52 = vpop.eup %3973 }
 0x14e   :  { %v2134_v50 = vxor.u32 2147483648, %v3972_v2  ;;  %v2346_v43 = vor.u32 %v2345_v4, %v2344_v41  ;;  %v2349_v40 = vshll.u32 %v2348_v32, 23  ;;  %v2562_v34 = vmul.u32 %v5296_v3, %v2546_v10 }
 0x14f   :  { %v2131_v6 = vxor.u32 2147483648, %v3974_v52  ;;  %v2360_v39 = vsel %vm5307_vm8, 0, %v2358_v16  ;;  %vm2564_vm7 = vc.u32 %v5341_v27, %v5344_v7  ;;  %v2565_v15 = vadd.s32 1, %v5345_v48 }
 0x150   :  { %v2135_v17 = vsel %vm2133_vm14, %v2134_v50, %v3974_v52  ;;  %v2241_v11 = vsel %vm2239_vm3, %v2134_v50, %v3974_v52  ;;  %v2350_v19 = vor.u32 4788187, %v2349_v40  ;;  %v2353_v55 = vcvt.s32.f32 %v2346_v43  ;;  %v3976_v9 = vpop.eup %3975 }
 0x151   :  { %vm1790_vm9 = vcmp.eq.f32.partialorder %v4986_v61, 0.0  ;;  %v2132_v3 = vsel %vm2130_vm4, %v3972_v2, %v2131_v6  ;;  %v2238_v18 = vsel %vm2236_vm6, %v3972_v2, %v2131_v6  ;;  %v2566_v63 = vsel %vm2564_vm7, %v2565_v15, %v5345_v48 }
 0x152   :  { %v2747_v53 = vshrl.u32 %v2746_v21, 23  ;;  %vm809_vm1 = vcmp.eq.s32.totalorder %v4922_v36, 2  ;;  %v2136_v24 = vsel %vm2129_vm15, %v2132_v3, %v2135_v17  ;;  %v2242_v12 = vsel %vm2235_vm10, %v2238_v18, %v2241_v11 }
 0x153   :  { %v2351_v41 = vand.u32 2147483647, %v2350_v19  ;;  %v2567_v59 = vadd.s32 %v2566_v63, %v2562_v34  ;;  %v1638_v10 = vsel %vm6196_vm2, nan, %v5160_v14  ;;  %v2137_v23 = vsel %vm2127_vm0, nan, %v2136_v24 }
 0x154   :  { %v2243_v48 = vsel %vm2127_vm0, nan, %v2242_v12  ;;  %v3812_v4 = vadd.s32 4294967169, %v2747_v53  ;;  %v2138_v32 = vmul.f32 %v2137_v23, %v5020_v60  ;;  %v2019_v2 = vmul.f32 %v3976_v9, %v5289_v56 }
 0x155   :  { %v2244_v20 = vmul.f32 %v2243_v48, %v5020_v60  ;;  %v2354_v16 = vmul.f32 %v2353_v55, %v2351_v41  ;;  %v2568_v49 = vadd.s32 536870912, %v2567_v59  ;;  %v2469_v21 = vadd.s32 3, %v2360_v39 }
 0x156   :  { %v2753_v52 = vadd.s32 1, %v3812_v4  ;;  %v2954_v14 = vmul.f32 %v5026_v58, %v5151_v30  ;;  %vm2020_vm5 = vcmp.eq.f32.partialorder %v5289_v56, inf  ;;  %v5389_v50 = vadd.f32 %v2138_v32, %v5264_v28 }
 0x157   :  { %v5392_v43 = vadd.f32 %v2244_v20, %v5267_v47  ;;  %v2355_v40 = vxor.u32 2147483648, %v2354_v16  ;;  %vm2022_vm4 = vcmp.eq.f32.partialorder %v5289_v56, 0.0  ;;  %v2023_v60 = vand.u32 2147483648, %v5289_v56 }
 0x158   :  { %v5396_v34 = vshrl.u32 %v2568_v49, 30  ;;  %vm2754_vm11 = vcmp.gt.s32.totalorder %v2753_v52, 0  ;;  %v2249_v6 = vsub.f32 %v5389_v50, %v4888_v0  ;;  %v2021_v47 = vsel %vm2020_vm5, %v5289_v56, %v2019_v2 }
 0x159   :  { %v2250_v30 = vsub.f32 %v5392_v43, %v4890_v25  ;;  %v2356_v28 = vsel %vm2273_vm13, %v2355_v40, %v2354_v16  ;;  %v2755_v15 = vsel %vm2754_vm11, %v2753_v52, 0  ;;  %v2743_v19 = vand.u32 2147483647, %v5334_v62 }
 0x15a   :  { %v2359_v17 = vsel %vm5307_vm8, %v5042_v38, %v2356_v28  ;;  %v2570_v11 = vshll.u32 %v5396_v34, 30  ;;  %v2251_v55 = vmul.f32 %v2249_v6, %v2249_v6  ;;  %v2757_v0 = vand.u32 31, %v2755_v15 }
 0x15b   :  { %v2252_v3 = vmul.f32 %v2250_v30, %v2250_v30  ;;  %3977 = vcosq.f32 %v2359_v17  ;;  %v5410_v25 = vand.u32 3, %v2360_v39  ;;  %v5412_v18 = vand.u32 3, %v2469_v21 }
 0x15c   :  { %3979 = vsinq.f32 %v2359_v17  ;;  %v5414_v63 = vsub.s32 %v2567_v59, %v2570_v11  ;;  %v5417_v53 = vmul.f32 0.1, %v5163_v46  ;;  %v6218_v5 = vand.u32 2147483648, %v4986_v61 }
 0x15d   :  { %v5424_v24 = vadd.f32 %v2252_v3, %v2251_v55  ;;  %v2758_v12 = vsub.s32 32, %v2757_v0  ;;  %v6219_v39 = vxor.u32 2147483648, %v5057_v22  ;;  %3981 = vrcp.f32 %v1638_v10 }
 0x15e   :  { %v1792_v9 = vsel %vm1790_vm9, %v6218_v5, %v5156_v44  ;;  %v2024_v46 = vsel %vm2022_vm4, %v2023_v60, %v2021_v47  ;;  %v2573_v59 = vsub.s32 0, %v5414_v63  ;;  %v5439_v61 = vand.u32 8388607, %v2743_v19 }
 0x15f   :  { %v5431_v41 = vsel %vm809_vm1, %v6219_v39, %v5071_v42  ;;  %3983 = vrsqrt.f32 %v5424_v24  ;;  %v5441_v44 = vshrl.u32 %v2755_v15, 5  ;;  %v5444_v23 = vadd.f32 %v2954_v14, %v5334_v62 }
 0x160   :  { %vm2369_vm13 = vcmp.eq.s32.totalorder %v5410_v25, 2  ;;  %vm2475_vm8 = vcmp.eq.s32.totalorder %v5412_v18, 2  ;;  %v2563_v56 = vadd.s32 %v5344_v7, %v5341_v27  ;;  %v3805_v10 = vmin.u32 %v2573_v59, %v5414_v63 }
 0x161   :  { %v2760_v48 = vshll.u32 %v4134_v29, %v2757_v0  ;;  %v5454_v4 = vadd.f32 %v5028_v57, %v5026_v58  ;;  %v5456_v32 = vadd.f32 %v2024_v46, %v1792_v9  ;;  %vm2366_vm15 = vcmp.eq.s32.totalorder %v5410_v25, 0 }
 0x162   :  { %vm2472_vm0 = vcmp.eq.s32.totalorder %v5412_v18, 0  ;;  %v2761_v20 = vshrl.u32 %v4135_v31, %v2758_v12  ;;  %v2763_v16 = vshll.u32 %v4135_v31, %v2757_v0  ;;  %v2764_v27 = vshrl.u32 %v4136_v33, %v2758_v12 }
 0x163   :  { %vm2365_vm12 = vcmp.lt.s32.totalorder %v5410_v25, 2  ;;  %vm2471_vm14 = vcmp.lt.s32.totalorder %v5412_v18, 2  ;;  %v2575_v7 = vclz %v3805_v10  ;;  %v2766_v57 = vshll.u32 %v4136_v33, %v2757_v0 }
 0x164   :  { %v2767_v49 = vshrl.u32 %v4137_v35, %v2758_v12  ;;  %v2769_v2 = vshll.u32 %v4137_v35, %v2757_v0  ;;  %v2259_v21 = vand.u32 2147483648, %v5424_v24  ;;  %vm2363_vm10 = vweird.f32 %v5042_v38 }
 0x165   :  { %v2593_v52 = vsub.s32 4, %v5396_v34  ;;  %v2751_v14 = vor.u32 8388608, %v5439_v61  ;;  %vm2775_vm6 = vcmp.lt.s32.totalorder %v5441_v44, 1  ;;  %vm2256_vm3 = vcmp.eq.f32.partialorder %v5424_v24, inf }
 0x166   :  { %v3806_v40 = vadd.s32 4294967294, %v2575_v7  ;;  %v2759_v60 = vshrl.u32 %v4134_v29, %v2758_v12  ;;  %v2762_v6 = vor.u32 %v2761_v20, %v2760_v48  ;;  %v2770_v30 = vshrl.u32 %v4138_v37, %v2758_v12 }
 0x167   :  { %vm2258_vm7 = vcmp.eq.f32.partialorder %v5424_v24, 0.0  ;;  %v2765_v28 = vor.u32 %v2764_v27, %v2763_v16  ;;  %v2768_v15 = vor.u32 %v2767_v49, %v2766_v57  ;;  %v2772_v47 = vshll.u32 %v4138_v37, %v2757_v0 }
 0x168   :  { %v2773_v17 = vshrl.u32 %v4139_v45, %v2758_v12  ;;  %vm3807_vm9 = vcmp.lt.s32.totalorder %v3806_v40, 0  ;;  %v2771_v11 = vor.u32 %v2770_v30, %v2769_v2  ;;  %vm2776_vm1 = vcmp.lt.s32.totalorder %v5441_v44, 2  ;;  %v3978_v9 = vpop.eup %3977 }
 0x169   :  { %vm2778_vm5 = vcmp.lt.s32.totalorder %v5441_v44, 4  ;;  %v2578_v55 = vsel %vm3807_vm9, 0, %v3806_v40  ;;  %vm2777_vm4 = vcmp.lt.s32.totalorder %v5441_v44, 3  ;;  %vm2509_vm11 = vcmp.lt.s32.totalorder %v5123_v8, 0  ;;  %v3980_v59 = vpop.eup %3979 }
 0x16a   :  { %v2774_v3 = vor.u32 %v2773_v17, %v2772_v47  ;;  %v2780_v5 = vsel %vm2778_vm5, %v2768_v15, 2102212464  ;;  %v2579_v39 = vsub.s32 32, %v2578_v55  ;;  %v2580_v0 = vshll.u32 %v5414_v63, %v2578_v55  ;;  %v5497_v49 = vpop.eup %3981 }
 0x16b   :  { %v2583_v12 = vsub.s32 4294967266, %v2578_v55  ;;  %v2779_v46 = vsel %vm2775_vm6, %v2759_v60, %v2762_v6  ;;  %vm806_vm2 = vcmp.eq.s32.totalorder %v4922_v36, 0  ;;  %v2370_v10 = vxor.u32 2147483648, %v3978_v9 }
 0x16c   :  { %v2781_v48 = vsel %vm2777_vm4, %v2765_v28, %v2780_v5  ;;  %v2783_v20 = vsel %vm2775_vm6, %v2762_v6, %v2765_v28  ;;  %v2784_v16 = vsel %vm2778_vm5, %v2771_v11, 920167782  ;;  %v2367_v27 = vxor.u32 2147483648, %v3980_v59  ;;  %v3984_v30 = vpop.eup %3983 }
 0x16d   :  { %v2581_v7 = vshrl.u32 %v2563_v56, %v2579_v39  ;;  %v2584_v63 = vadd.s32 127, %v2583_v12  ;;  %v2787_v57 = vsel %vm2775_vm6, %v2765_v28, %v2768_v15  ;;  %v2371_v2 = vsel %vm2369_vm13, %v2370_v10, %v3980_v59 }
 0x16e   :  { %v2477_v40 = vsel %vm2475_vm8, %v2370_v10, %v3980_v59  ;;  %v2785_v60 = vsel %vm2777_vm4, %v2768_v15, %v2784_v16  ;;  %v2788_v6 = vsel %vm2778_vm5, %v2774_v3, 1326507024  ;;  %v2368_v56 = vsel %vm2366_vm15, %v3978_v9, %v2367_v27 }
 0x16f   :  { %v2474_v28 = vsel %vm2472_vm0, %v3978_v9, %v2367_v27  ;;  %v2582_v47 = vor.u32 %v2581_v7, %v2580_v0  ;;  %v2585_v17 = vshll.u32 %v2584_v63, 23  ;;  %vm805_vm13 = vcmp.lt.s32.totalorder %v4922_v36, 2 }
 0x170   :  { %v2255_v55 = vmul.f32 %v3984_v30, %v5424_v24  ;;  %v2372_v5 = vsel %vm2365_vm12, %v2368_v56, %v2371_v2  ;;  %v2478_v15 = vsel %vm2471_vm14, %v2474_v28, %v2477_v40  ;;  %v2789_v3 = vsel %vm2777_vm4, %v2771_v11, %v2788_v6 }
 0x171   :  { %v2373_v39 = vsel %vm2363_vm10, nan, %v2372_v5  ;;  %v2479_v9 = vsel %vm2363_vm10, nan, %v2478_v15  ;;  %v2586_v0 = vor.u32 4788187, %v2585_v17  ;;  %v2589_v12 = vcvt.s32.f32 %v2582_v47 }
 0x172   :  { %v2257_v59 = vsel %vm2256_vm3, %v5424_v24, %v2255_v55  ;;  %v2374_v25 = vmul.f32 %v2373_v39, %v5023_v51  ;;  %v2480_v18 = vmul.f32 %v2479_v9, %v5023_v51  ;;  %v2790_v10 = vsel %vm2776_vm1, %v2787_v57, %v2789_v3  ;;  %v2974_v39 = vld [vmem:[#allocation8 + $0x28] sm:$0xff] }
 0x173   :  { %v2260_v11 = vsel %vm2258_vm7, %v2259_v21, %v2257_v59  ;;  %v2587_v16 = vand.u32 2147483647, %v2586_v0  ;;  %v2786_v27 = vsel %vm2776_vm1, %v2783_v20, %v2785_v60  ;;  %v2791_v7 = vshll.u32 %v2751_v14, 8 }
 0x174   :  { %v5539_v63 = vadd.f32 %v2260_v11, %v5456_v32  ;;  %v5542_v51 = vadd.f32 %v2374_v25, %v5389_v50  ;;  %v5545_v57 = vadd.f32 %v2480_v18, %v5392_v43  ;;  %v2594_v24 = vsel %vm2509_vm11, %v2593_v52, %v5396_v34  ;;  %v5557_v32 = vld [vmem:[#allocation6] sm:$0xff]  ;;  %v5561_v43 = vld [vmem:[#allocation6 + $0x8] sm:$0xff] }
 0x175   :  { %v2590_v21 = vmul.f32 %v2589_v12, %v2587_v16  ;;  %v2782_v61 = vsel %vm2776_vm1, %v2779_v46, %v2781_v48  ;;  %v5554_v14 = vmul.u32.u64.low %v2791_v7, %v2790_v10  ;;  %v5555_v20 = vmul.u32.u64.high %v2791_v7, %v2790_v10, %v5554_v14 }
 0x176   :  { %v2485_v50 = vsub.f32 %v5542_v51, %v5557_v32  ;;  %v2486_v2 = vsub.f32 %v5545_v57, %v5561_v43  ;;  %v5565_v40 = vmul.u32.u64.low %v2791_v7, %v2786_v27  ;;  %v5566_v60 = vmul.u32.u64.high %v2791_v7, %v2786_v27, %v5565_v40 }
 0x177   :  { %v6220_v34 = vxor.u32 2147483648, %v5071_v42  ;;  %vm2508_vm8 = vcmp.le.f32.partialorder %v2507_v1, 0.7853982  ;;  %v2591_v52 = vxor.u32 2147483648, %v2590_v21  ;;  %v2982_v46 = vand.u32 2139095040, %v5444_v23 }
 0x178   :  { %v2487_v48 = vmul.f32 %v2485_v50, %v2485_v50  ;;  %v2488_v6 = vmul.f32 %v2486_v2, %v2486_v2  ;;  %v2596_v30 = vsel %vm2508_vm8, 0, %v2594_v24  ;;  %v2979_v56 = vand.u32 2147483647, %v5444_v23 }
 0x179   :  { %v808_v44 = vsel %vm806_vm2, %v5057_v22, %v6220_v34  ;;  %v2592_v28 = vsel %vm2509_vm11, %v2591_v52, %v2590_v21  ;;  %v2798_v47 = vmul.u32 %v2791_v7, %v2782_v61  ;;  %v2983_v42 = vshrl.u32 %v2982_v46, 23 }
 0x17a   :  { %v3190_v17 = vmul.f32 %v5454_v4, %v5417_v53  ;;  %v5581_v22 = vadd.f32 %v2488_v6, %v2487_v48  ;;  %v2595_v1 = vsel %vm2508_vm8, %v5123_v8, %v2592_v28  ;;  %vm2800_vm2 = vc.u32 %v5555_v20, %v5565_v40 }
 0x17b   :  { %v2801_v55 = vadd.s32 1, %v5566_v60  ;;  %v812_v5 = vsel %vm805_vm13, %v808_v44, %v5431_v41  ;;  %3985 = vcosq.f32 %v2595_v1  ;;  %v2705_v15 = vadd.s32 3, %v2596_v30 }
 0x17c   :  { %v3820_v3 = vadd.s32 4294967169, %v2983_v42  ;;  %3987 = vrsqrt.f32 %v5581_v22  ;;  %v2986_v9 = vand.u32 8388607, %v2979_v56  ;;  %vm6221_vm15 = vweird.f32 %v5319_v54 }
 0x17d   :  { %3989 = vsinq.f32 %v2595_v1  ;;  %v2802_v53 = vsel %vm2800_vm2, %v2801_v55, %v5566_v60  ;;  %v813_v12 = vsel %vm6221_vm15, nan, %v812_v5  ;;  %v5595_v59 = vand.u32 3, %v2596_v30 }
 0x17e   :  { %v2989_v0 = vadd.s32 1, %v3820_v3  ;;  %v2803_v36 = vadd.s32 %v2802_v53, %v2798_v47  ;;  %v5598_v41 = vadd.f32 %v3190_v17, %v5444_v23  ;;  %v5600_v25 = vand.u32 3, %v2705_v15 }
 0x17f   :  { %v5602_v10 = vmul.f32 0.2, %v2974_v39  ;;  %v5605_v16 = vmul.f32 %v5497_v49, %v813_v12  ;;  %v5608_v27 = vmul.f32 0.2, %v5007_v13  ;;  %v2987_v54 = vor.u32 8388608, %v2986_v9 }
 0x180   :  { %vm2990_vm0 = vcmp.gt.s32.totalorder %v2989_v0, 0  ;;  %v2804_v18 = vadd.s32 536870912, %v2803_v36  ;;  %vm2602_vm12 = vcmp.eq.s32.totalorder %v5595_v59, 0  ;;  %vm2745_vm14 = vcmp.lt.s32.totalorder %v5334_v62, 0 }
 0x181   :  { %v2991_v11 = vsel %vm2990_vm0, %v2989_v0, 0  ;;  %v3218_v21 = vand.u32 2139095040, %v5598_v41  ;;  %vm2601_vm10 = vcmp.lt.s32.totalorder %v5595_v59, 2  ;;  %vm2605_vm6 = vcmp.eq.s32.totalorder %v5595_v59, 2 }
 0x182   :  { %v2993_v7 = vand.u32 31, %v2991_v11  ;;  %v2805_v24 = vshrl.u32 %v2804_v18, 30  ;;  %vm2707_vm3 = vcmp.lt.s32.totalorder %v5600_v25, 2  ;;  %vm2708_vm7 = vcmp.eq.s32.totalorder %v5600_v25, 0 }
 0x183   :  { %vm2492_vm9 = vcmp.eq.f32.partialorder %v5581_v22, inf  ;;  %vm2599_vm1 = vweird.f32 %v5123_v8  ;;  %vm2711_vm5 = vcmp.eq.s32.totalorder %v5600_v25, 2  ;;  %v5621_v13 = vadd.s32 %v5565_v40, %v5555_v20 }
 0x184   :  { %v2994_v49 = vsub.s32 32, %v2993_v7  ;;  %v2806_v61 = vshll.u32 %v2805_v24, 30  ;;  %vm2494_vm4 = vcmp.eq.f32.partialorder %v5581_v22, 0.0  ;;  %v2495_v14 = vand.u32 2147483648, %v5581_v22 }
 0x185   :  { %v5625_v50 = vshll.u32 %v2987_v54, 8  ;;  %v3215_v2 = vand.u32 2147483647, %v5598_v41  ;;  %v2829_v34 = vsub.s32 4, %v2805_v24  ;;  %v5630_v44 = vshrl.u32 %v2991_v11, 5 }
 0x186   :  { %v5628_v60 = vsub.s32 %v2803_v36, %v2806_v61  ;;  %v5632_v52 = vshrl.u32 %v3218_v21, 23  ;;  %v2996_v46 = vshll.u32 %v4134_v29, %v2993_v7  ;;  %v2997_v20 = vshrl.u32 %v4135_v31, %v2994_v49 }
 0x187   :  { %v2999_v40 = vshll.u32 %v4135_v31, %v2993_v7  ;;  %v3002_v48 = vshll.u32 %v4136_v33, %v2993_v7  ;;  %v3000_v28 = vshrl.u32 %v4136_v33, %v2994_v49  ;;  %v3003_v47 = vshrl.u32 %v4137_v35, %v2994_v49 }
 0x188   :  { %v3986_v6 = vpop.eup %3985  ;;  %v2809_v30 = vsub.s32 0, %v5628_v60  ;;  %v3005_v42 = vshll.u32 %v4137_v35, %v2993_v7  ;;  %v2995_v55 = vshrl.u32 %v4134_v29, %v2994_v49  ;;  %v3006_v5 = vshrl.u32 %v4138_v37, %v2994_v49 }
 0x189   :  { %v3988_v17 = vpop.eup %3987  ;;  %v2606_v1 = vxor.u32 2147483648, %v3986_v6  ;;  %v3008_v15 = vshll.u32 %v4138_v37, %v2993_v7  ;;  %v5649_v9 = vsel %vm2745_vm14, %v2829_v34, %v2805_v24  ;;  %v3009_v0 = vshrl.u32 %v4139_v45, %v2994_v49 }
 0x18a   :  { %v3990_v3 = vpop.eup %3989  ;;  %v2491_v53 = vmul.f32 %v3988_v17, %v5581_v22  ;;  %v3813_v39 = vmin.u32 %v2809_v30, %v5628_v60  ;;  %v2998_v11 = vor.u32 %v2997_v20, %v2996_v46  ;;  %v3001_v21 = vor.u32 %v3000_v28, %v2999_v40 }
 0x18b   :  { %v2603_v12 = vxor.u32 2147483648, %v3990_v3  ;;  %v2607_v36 = vsel %vm2605_vm6, %v2606_v1, %v3990_v3  ;;  %v2713_v18 = vsel %vm2711_vm5, %v2606_v1, %v3990_v3  ;;  %v3004_v61 = vor.u32 %v3003_v47, %v3002_v48 }
 0x18c   :  { %v2493_v54 = vsel %vm2492_vm9, %v5581_v22, %v2491_v53  ;;  %v2811_v7 = vclz %v3813_v39  ;;  %v3007_v30 = vor.u32 %v3006_v5, %v3005_v42  ;;  %v3010_v48 = vor.u32 %v3009_v0, %v3008_v15 }
 0x18d   :  { %v2496_v24 = vsel %vm2494_vm4, %v2495_v14, %v2493_v54  ;;  %v2604_v49 = vsel %vm2602_vm12, %v3986_v6, %v2603_v12  ;;  %v2710_v34 = vsel %vm2708_vm7, %v3986_v6, %v2603_v12  ;;  %vm3011_vm11 = vcmp.lt.s32.totalorder %v5630_v44, 1 }
 0x18e   :  { %v5666_v17 = vadd.f32 %v2496_v24, %v5539_v63  ;;  %v2608_v46 = vsel %vm2601_vm10, %v2604_v49, %v2607_v36  ;;  %v2714_v20 = vsel %vm2707_vm3, %v2710_v34, %v2713_v18  ;;  %v3814_v40 = vadd.s32 4294967294, %v2811_v7 }
 0x18f   :  { %v2609_v22 = vsel %vm2599_vm1, nan, %v2608_v46  ;;  %v2715_v14 = vsel %vm2599_vm1, nan, %v2714_v20  ;;  %vm3014_vm8 = vcmp.lt.s32.totalorder %v5630_v44, 4  ;;  %vm5682_vm2 = vcmp.le.f32.partialorder %v2743_v19, 0.7853982 }
 0x190   :  { %v2610_v6 = vmul.f32 %v2609_v22, %v5608_v27  ;;  %v2716_v63 = vmul.f32 %v2715_v14, %v5608_v27  ;;  %vm3815_vm13 = vcmp.lt.s32.totalorder %v3814_v40, 0  ;;  %vm3012_vm15 = vcmp.lt.s32.totalorder %v5630_v44, 2 }
 0x191   :  { %v2814_v25 = vsel %vm3815_vm13, 0, %v3814_v40  ;;  %vm3013_vm0 = vcmp.lt.s32.totalorder %v5630_v44, 3  ;;  %v3016_v28 = vsel %vm3014_vm8, %v3004_v61, 2102212464  ;;  %v3015_v5 = vsel %vm3011_vm11, %v2995_v55, %v2998_v11 }
 0x192   :  { %v5691_v47 = vadd.f32 %v2610_v6, %v5542_v51  ;;  %v5694_v27 = vadd.f32 %v2716_v63, %v5545_v57  ;;  %v2815_v42 = vsub.s32 32, %v2814_v25  ;;  %v2816_v19 = vshll.u32 %v5628_v60, %v2814_v25 }
 0x193   :  { %v2819_v1 = vsub.s32 4294967266, %v2814_v25  ;;  %v3019_v15 = vsel %vm3011_vm11, %v2998_v11, %v3001_v21  ;;  %v3020_v3 = vsel %vm3014_vm8, %v3007_v30, 920167782  ;;  %v3017_v60 = vsel %vm3013_vm0, %v3001_v21, %v3016_v28 }
 0x194   :  { %v2721_v51 = vsub.f32 %v5691_v47, %v5557_v32  ;;  %v2722_v57 = vsub.f32 %v5694_v27, %v5561_v43  ;;  %v2817_v53 = vshrl.u32 %v5621_v13, %v2815_v42  ;;  %v3021_v55 = vsel %vm3013_vm0, %v3004_v61, %v3020_v3 }
 0x195   :  { %v2820_v39 = vadd.s32 127, %v2819_v1  ;;  %v3023_v0 = vsel %vm3011_vm11, %v3001_v21, %v3004_v61  ;;  %v3024_v12 = vsel %vm3014_vm8, %v3010_v48, 1326507024  ;;  %v3022_v54 = vsel %vm3012_vm15, %v3019_v15, %v3021_v55 }
 0x196   :  { %v2723_v36 = vmul.f32 %v2721_v51, %v2721_v51  ;;  %v2724_v18 = vmul.f32 %v2722_v57, %v2722_v57  ;;  %v2818_v11 = vor.u32 %v2817_v53, %v2816_v19  ;;  %v3025_v7 = vsel %vm3013_vm0, %v3007_v30, %v3024_v12 }
 0x197   :  { %v2821_v13 = vshll.u32 %v2820_v39, 23  ;;  %v5721_v24 = vmul.u32.u64.low %v5625_v50, %v3022_v54  ;;  %v5722_v49 = vmul.u32.u64.high %v5625_v50, %v3022_v54, %v5721_v24  ;;  %v3018_v21 = vsel %vm3012_vm15, %v3015_v5, %v3017_v60 }
 0x198   :  { %v5725_v34 = vadd.f32 %v2724_v18, %v2723_v36  ;;  %v3026_v61 = vsel %vm3012_vm15, %v3023_v0, %v3025_v7  ;;  %v3828_v46 = vadd.s32 4294967169, %v5632_v52  ;;  %v2825_v40 = vcvt.s32.f32 %v2818_v11 }
 0x199   :  { %v2822_v20 = vor.u32 4788187, %v2821_v13  ;;  %v5733_v22 = vmul.u32.u64.low %v5625_v50, %v3026_v61  ;;  %v5734_v30 = vmul.u32.u64.high %v5625_v50, %v3026_v61, %v5733_v22  ;;  %v2832_v14 = vsel %vm5682_vm2, 0, %v5649_v9 }
 0x19a   :  { %3991 = vrsqrt.f32 %v5725_v34  ;;  %v3034_v6 = vmul.u32 %v5625_v50, %v3018_v21  ;;  %v3037_v44 = vadd.s32 1, %v5722_v49  ;;  %v3225_v63 = vadd.s32 1, %v3828_v46 }
 0x19b   :  { %v2823_v48 = vand.u32 2147483647, %v2822_v20  ;;  %v1764_v52 = vmul.f32 0.1, %v5605_v16  ;;  %v5745_v25 = vadd.f32 %v5602_v10, %v5454_v4  ;;  %vm3036_vm12 = vc.u32 %v5734_v30, %v5721_v24 }
 0x19c   :  { %v3222_v42 = vand.u32 8388607, %v3215_v2  ;;  %vm3226_vm10 = vcmp.gt.s32.totalorder %v3225_v63, 0  ;;  %v2941_v9 = vadd.s32 3, %v2832_v14  ;;  %v3038_v50 = vsel %vm3036_vm12, %v3037_v44, %v5722_v49 }
 0x19d   :  { %v2826_v28 = vmul.f32 %v2825_v40, %v2823_v48  ;;  %v3227_v19 = vsel %vm3226_vm10, %v3225_v63, 0  ;;  %v3039_v5 = vadd.s32 %v3038_v50, %v3034_v6  ;;  %v5753_v16 = vmul.f32 0.2, %v5026_v58 }
 0x19e   :  { %v3229_v15 = vand.u32 31, %v3227_v19  ;;  %v3426_v10 = vmul.f32 %v5745_v25, %v1764_v52  ;;  %v3223_v57 = vor.u32 8388608, %v3222_v42  ;;  %v5761_v39 = vand.u32 3, %v2832_v14 }
 0x19f   :  { %v2827_v1 = vxor.u32 2147483648, %v2826_v28  ;;  %v3040_v51 = vadd.s32 536870912, %v3039_v5  ;;  %v5763_v55 = vand.u32 3, %v2941_v9  ;;  %v3228_v13 = vshrl.u32 %v3227_v19, 5 }
 0x1a0   :  { %v3230_v53 = vsub.s32 32, %v3229_v15  ;;  %v3232_v0 = vshll.u32 %v4134_v29, %v3229_v15  ;;  %v3235_v12 = vshll.u32 %v4135_v31, %v3229_v15  ;;  %v3238_v36 = vshll.u32 %v4136_v33, %v3229_v15 }
 0x1a1   :  { %v2828_v3 = vsel %vm2745_vm14, %v2827_v1, %v2826_v28  ;;  %v5766_v58 = vshrl.u32 %v3040_v51, 30  ;;  %v3241_v7 = vshll.u32 %v4137_v35, %v3229_v15  ;;  %vm2728_vm14 = vcmp.eq.f32.partialorder %v5725_v34, inf }
 0x1a2   :  { %v2831_v60 = vsel %vm5682_vm2, %v5334_v62, %v2828_v3  ;;  %v3233_v18 = vshrl.u32 %v4135_v31, %v3230_v53  ;;  %v3236_v11 = vshrl.u32 %v4136_v33, %v3230_v53  ;;  %v3239_v59 = vshrl.u32 %v4137_v35, %v3230_v53 }
 0x1a3   :  { %3993 = vcosq.f32 %v2831_v60  ;;  %v3042_v54 = vshll.u32 %v5766_v58, 30  ;;  %v3242_v49 = vshrl.u32 %v4138_v37, %v3230_v53  ;;  %vm2730_vm6 = vcmp.eq.f32.partialorder %v5725_v34, 0.0 }
 0x1a4   :  { %3995 = vsinq.f32 %v2831_v60  ;;  %v2731_v21 = vand.u32 2147483648, %v5725_v34  ;;  %v3231_v61 = vshrl.u32 %v4134_v29, %v3230_v53  ;;  %v3244_v40 = vshll.u32 %v4138_v37, %v3229_v15 }
 0x1a5   :  { %v5780_v20 = vsub.s32 %v3039_v5, %v3042_v54  ;;  %v3245_v22 = vshrl.u32 %v4139_v45, %v3230_v53  ;;  %v5785_v14 = vadd.f32 %v3426_v10, %v5598_v41  ;;  %vm2841_vm3 = vcmp.eq.s32.totalorder %v5761_v39, 2 }
 0x1a6   :  { %v3234_v6 = vor.u32 %v3233_v18, %v3232_v0  ;;  %v3237_v44 = vor.u32 %v3236_v11, %v3235_v12  ;;  %v3240_v63 = vor.u32 %v3239_v59, %v3238_v36  ;;  %vm2838_vm7 = vcmp.eq.s32.totalorder %v5761_v39, 0 }
 0x1a7   :  { %v3992_v46 = vpop.eup %3991  ;;  %vm2944_vm9 = vcmp.eq.s32.totalorder %v5763_v55, 0  ;;  %v3045_v52 = vsub.s32 0, %v5780_v20  ;;  %v3243_v28 = vor.u32 %v3242_v49, %v3241_v7  ;;  %vm3247_vm1 = vcmp.lt.s32.totalorder %v3228_v13, 1 }
 0x1a8   :  { %v2727_v48 = vmul.f32 %v3992_v46, %v5725_v34  ;;  %vm3250_vm5 = vcmp.lt.s32.totalorder %v3228_v13, 4  ;;  %vm2837_vm4 = vcmp.lt.s32.totalorder %v5761_v39, 2  ;;  %vm2943_vm11 = vcmp.lt.s32.totalorder %v5763_v55, 2 }
 0x1a9   :  { %v3251_v9 = vsel %vm3247_vm1, %v3231_v61, %v3234_v6  ;;  %v3252_v50 = vsel %vm3250_vm5, %v3240_v63, 2102212464  ;;  %v5799_v19 = vshll.u32 %v3223_v57, 8  ;;  %vm2835_vm13 = vweird.f32 %v5334_v62 }
 0x1aa   :  { %v2729_v42 = vsel %vm2728_vm14, %v5725_v34, %v2727_v48  ;;  %v3821_v5 = vmin.u32 %v3045_v52, %v5780_v20  ;;  %v3246_v15 = vor.u32 %v3245_v22, %v3244_v40  ;;  %vm3249_vm8 = vcmp.lt.s32.totalorder %v3228_v13, 3 }
 0x1ab   :  { %v2732_v1 = vsel %vm2730_vm6, %v2731_v21, %v2729_v42  ;;  %vm3248_vm2 = vcmp.lt.s32.totalorder %v3228_v13, 2  ;;  %v3253_v3 = vsel %vm3249_vm8, %v3237_v44, %v3252_v50  ;;  %v3255_v51 = vsel %vm3247_vm1, %v3234_v6, %v3237_v44 }
 0x1ac   :  { %v5806_v10 = vadd.f32 %v2732_v1, %v5666_v17  ;;  %vm2981_vm15 = vcmp.lt.s32.totalorder %v5444_v23, 0  ;;  %v3047_v57 = vclz %v3821_v5  ;;  %v3254_v34 = vsel %vm3248_vm2, %v3251_v9, %v3253_v3 }
 0x1ad   :  { %v3256_v53 = vsel %vm3250_vm5, %v3243_v28, 920167782  ;;  %v3451_v60 = vand.u32 2139095040, %v5785_v14  ;;  %vm2947_vm0 = vcmp.eq.s32.totalorder %v5763_v55, 2  ;;  %v3035_v17 = vadd.s32 %v5721_v24, %v5734_v30 }
 0x1ae   :  { %v3257_v0 = vsel %vm3249_vm8, %v3240_v63, %v3256_v53  ;;  %v3259_v12 = vsel %vm3247_vm1, %v3237_v44, %v3240_v63  ;;  %v3822_v36 = vadd.s32 4294967294, %v3047_v57  ;;  %v3065_v18 = vsub.s32 4, %v5766_v58 }
 0x1af   :  { %v3258_v11 = vsel %vm3248_vm2, %v3255_v51, %v3257_v0  ;;  %v3260_v59 = vsel %vm3250_vm5, %v3246_v15, 1326507024  ;;  %vm5824_vm12 = vcmp.le.f32.partialorder %v2979_v56, 0.7853982  ;;  %v3270_v21 = vmul.u32 %v5799_v19, %v3254_v34 }
 0x1b0   :  { %v3994_v54 = vpop.eup %3993  ;;  %v3261_v24 = vsel %vm3249_vm8, %v3243_v28, %v3260_v59  ;;  %v5830_v30 = vmul.u32.u64.low %v5799_v19, %v3258_v11  ;;  %v5831_v49 = vmul.u32.u64.high %v5799_v19, %v3258_v11, %v5830_v30  ;;  %vm3823_vm10 = vcmp.lt.s32.totalorder %v3822_v36, 0 }
 0x1b1   :  { %v3996_v61 = vpop.eup %3995  ;;  %v2842_v46 = vxor.u32 2147483648, %v3994_v54  ;;  %v3262_v40 = vsel %vm3248_vm2, %v3259_v12, %v3261_v24  ;;  %v3452_v22 = vshrl.u32 %v3451_v60, 23  ;;  %v3050_v56 = vsel %vm3823_vm10, 0, %v3822_v36 }
 0x1b2   :  { %v2839_v48 = vxor.u32 2147483648, %v3996_v61  ;;  %v5837_v6 = vmul.u32.u64.low %v5799_v19, %v3262_v40  ;;  %v5838_v44 = vmul.u32.u64.high %v5799_v19, %v3262_v40, %v5837_v6  ;;  %v3051_v28 = vsub.s32 32, %v3050_v56 }
 0x1b3   :  { %v2843_v63 = vsel %vm2841_vm3, %v2842_v46, %v3996_v61  ;;  %v2949_v52 = vsel %vm2947_vm0, %v2842_v46, %v3996_v61  ;;  %v3052_v42 = vshll.u32 %v5780_v20, %v3050_v56  ;;  %v3055_v50 = vsub.s32 4294967266, %v3050_v56 }
 0x1b4   :  { %v2840_v13 = vsel %vm2838_vm7, %v3994_v54, %v2839_v48  ;;  %v2946_v9 = vsel %vm2944_vm9, %v3994_v54, %v2839_v48  ;;  %v3273_v1 = vadd.s32 1, %v5831_v49  ;;  %v3053_v15 = vshrl.u32 %v3035_v17, %v3051_v28  ;;  %v5875_v54 = vld [vmem:[#allocation9 + $0x38] sm:$0xff] }
 0x1b5   :  { %v2844_v19 = vsel %vm2837_vm4, %v2840_v13, %v2843_v63  ;;  %v2950_v5 = vsel %vm2943_vm11, %v2946_v9, %v2949_v52  ;;  %v3836_v3 = vadd.s32 4294967169, %v3452_v22  ;;  %v3056_v57 = vadd.s32 127, %v3055_v50 }
 0x1b6   :  { %v2845_v20 = vsel %vm2835_vm13, nan, %v2844_v19  ;;  %v2951_v51 = vsel %vm2835_vm13, nan, %v2950_v5  ;;  %v3066_v34 = vsel %vm2981_vm15, %v3065_v18, %v5766_v58  ;;  %v3054_v60 = vor.u32 %v3053_v15, %v3052_v42 }
 0x1b7   :  { %v2846_v53 = vmul.f32 %v2845_v20, %v5753_v16  ;;  %v2952_v39 = vmul.f32 %v2951_v51, %v5753_v16  ;;  %vm3272_vm14 = vc.u32 %v5838_v44, %v5830_v30  ;;  %v3057_v55 = vshll.u32 %v3056_v57, 23 }
 0x1b8   :  { %v3274_v17 = vsel %vm3272_vm14, %v3273_v1, %v5831_v49  ;;  %v3448_v0 = vand.u32 2147483647, %v5785_v14  ;;  %v3458_v12 = vadd.s32 1, %v3836_v3  ;;  %v3068_v58 = vsel %vm5824_vm12, 0, %v3066_v34 }
 0x1b9   :  { %v5868_v36 = vadd.f32 %v2846_v53, %v5691_v47  ;;  %v5871_v11 = vadd.f32 %v2952_v39, %v5694_v27  ;;  %v3275_v16 = vadd.s32 %v3274_v17, %v3270_v21  ;;  %v3058_v18 = vor.u32 4788187, %v3057_v55 }
 0x1ba   :  { %v3061_v59 = vcvt.s32.f32 %v3054_v60  ;;  %vm3459_vm6 = vcmp.gt.s32.totalorder %v3458_v12, 0  ;;  %v3177_v27 = vadd.s32 3, %v3068_v58  ;;  %v3455_v40 = vand.u32 8388607, %v3448_v0 }
 0x1bb   :  { %v2957_v24 = vsub.f32 %v5868_v36, %v5557_v32  ;;  %v2958_v49 = vsub.f32 %v5871_v11, %v5561_v43  ;;  %v3276_v47 = vadd.s32 536870912, %v3275_v16  ;;  %v3460_v61 = vsel %vm3459_vm6, %v3458_v12, 0 }
 0x1bc   :  { %v3059_v46 = vand.u32 2147483647, %v3058_v18  ;;  %v3462_v22 = vand.u32 31, %v3460_v61  ;;  %v817_v6 = vand.u32 2139095040, %v5875_v54  ;;  %v5889_v42 = vmul.f32 0.2, %v5454_v4 }
 0x1bd   :  { %v2959_v21 = vmul.f32 %v2957_v24, %v2957_v24  ;;  %v2960_v48 = vmul.f32 %v2958_v49, %v2958_v49  ;;  %v5883_v56 = vshrl.u32 %v3276_v47, 30  ;;  %v814_v9 = vand.u32 2147483647, %v5875_v54 }
 0x1be   :  { %v3062_v63 = vmul.f32 %v3061_v59, %v3059_v46  ;;  %v3463_v52 = vsub.s32 32, %v3462_v22  ;;  %v5893_v1 = vand.u32 3, %v3068_v58  ;;  %v5895_v19 = vand.u32 3, %v3177_v27 }
 0x1bf   :  { %v5886_v28 = vadd.f32 %v2960_v48, %v2959_v21  ;;  %v3278_v13 = vshll.u32 %v5883_v56, 30  ;;  %v3456_v5 = vor.u32 8388608, %v3455_v40  ;;  %v3465_v15 = vshll.u32 %v4134_v29, %v3462_v22 }
 0x1c0   :  { %v3063_v50 = vxor.u32 2147483648, %v3062_v63  ;;  %v3468_v3 = vshll.u32 %v4135_v31, %v3462_v22  ;;  %v818_v20 = vshrl.u32 %v817_v6, 23  ;;  %v3466_v57 = vshrl.u32 %v4135_v31, %v3463_v52 }
 0x1c1   :  { %3997 = vrsqrt.f32 %v5886_v28  ;;  %v5902_v51 = vsub.s32 %v3275_v16, %v3278_v13  ;;  %v3469_v34 = vshrl.u32 %v4136_v33, %v3463_v52  ;;  %v3271_v39 = vadd.s32 %v5830_v30, %v5838_v44 }
 0x1c2   :  { %v3064_v4 = vsel %vm2981_vm15, %v3063_v50, %v3062_v63  ;;  %v3471_v60 = vshll.u32 %v4136_v33, %v3462_v22  ;;  %v3472_v55 = vshrl.u32 %v4137_v35, %v3463_v52  ;;  %v3461_v12 = vshrl.u32 %v3460_v61, 5 }
 0x1c3   :  { %v3067_v53 = vsel %vm5824_vm12, %v5444_v23, %v3064_v4  ;;  %v3281_v17 = vsub.s32 0, %v5902_v51  ;;  %v5914_v58 = vshll.u32 %v3456_v5, 8  ;;  %v3474_v16 = vshll.u32 %v4137_v35, %v3462_v22 }
 0x1c4   :  { %3999 = vcosq.f32 %v3067_v53  ;;  %v3475_v18 = vshrl.u32 %v4138_v37, %v3463_v52  ;;  %v3744_v7 = vadd.s32 4294967169, %v818_v20  ;;  %v3464_v30 = vshrl.u32 %v4134_v29, %v3463_v52 }
 0x1c5   :  { %4001 = vsinq.f32 %v3067_v53  ;;  %v3829_v59 = vmin.u32 %v3281_v17, %v5902_v51  ;;  %v3467_v44 = vor.u32 %v3466_v57, %v3465_v15  ;;  %v3470_v24 = vor.u32 %v3469_v34, %v3468_v3 }
 0x1c6   :  { %v3473_v49 = vor.u32 %v3472_v55, %v3471_v60  ;;  %v3476_v47 = vor.u32 %v3475_v18, %v3474_v16  ;;  %v3477_v46 = vshll.u32 %v4138_v37, %v3462_v22  ;;  %v3478_v61 = vshrl.u32 %v4139_v45, %v3463_v52 }
 0x1c7   :  { %vm2964_vm3 = vcmp.eq.f32.partialorder %v5886_v28, inf  ;;  %vm3217_vm7 = vcmp.lt.s32.totalorder %v5598_v41, 0  ;;  %v3283_v27 = vclz %v3829_v59  ;;  %v3301_v40 = vsub.s32 4, %v5883_v56 }
 0x1c8   :  { %vm3480_vm9 = vcmp.lt.s32.totalorder %v3461_v12, 1  ;;  %vm2966_vm1 = vcmp.eq.f32.partialorder %v5886_v28, 0.0  ;;  %vm3077_vm5 = vcmp.eq.s32.totalorder %v5893_v1, 2  ;;  %v3479_v21 = vor.u32 %v3478_v61, %v3477_v46 }
 0x1c9   :  { %vm3481_vm4 = vcmp.lt.s32.totalorder %v3461_v12, 2  ;;  %vm3482_vm11 = vcmp.lt.s32.totalorder %v3461_v12, 3  ;;  %vm3074_vm13 = vcmp.eq.s32.totalorder %v5893_v1, 0  ;;  %vm3180_vm8 = vcmp.eq.s32.totalorder %v5895_v19, 0 }
 0x1ca   :  { %v3830_v22 = vadd.s32 4294967294, %v3283_v27  ;;  %vm3483_vm2 = vcmp.lt.s32.totalorder %v3461_v12, 4  ;;  %v3484_v48 = vsel %vm3480_vm9, %v3464_v30, %v3467_v44  ;;  %v3488_v6 = vsel %vm3480_vm9, %v3467_v44, %v3470_v24 }
 0x1cb   :  { %vm3073_vm15 = vcmp.lt.s32.totalorder %v5893_v1, 2  ;;  %vm3179_vm0 = vcmp.lt.s32.totalorder %v5895_v19, 2  ;;  %v3485_v63 = vsel %vm3483_vm2, %v3473_v49, 2102212464  ;;  %v3489_v52 = vsel %vm3483_vm2, %v3476_v47, 920167782 }
 0x1cc   :  { %v3492_v13 = vsel %vm3480_vm9, %v3470_v24, %v3473_v49  ;;  %v3493_v50 = vsel %vm3483_vm2, %v3479_v21, 1326507024  ;;  %vm3071_vm12 = vweird.f32 %v5444_v23  ;;  %vm3831_vm10 = vcmp.lt.s32.totalorder %v3830_v22, 0 }
 0x1cd   :  { %v3486_v5 = vsel %vm3482_vm11, %v3470_v24, %v3485_v63  ;;  %v3490_v15 = vsel %vm3482_vm11, %v3473_v49, %v3489_v52  ;;  %v3494_v3 = vsel %vm3482_vm11, %v3476_v47, %v3493_v50  ;;  %v2967_v20 = vand.u32 2147483648, %v5886_v28 }
 0x1ce   :  { %vm5941_vm14 = vcmp.le.f32.partialorder %v3215_v2, 0.7853982  ;;  %v3286_v57 = vsel %vm3831_vm10, 0, %v3830_v22  ;;  %v3491_v34 = vsel %vm3481_vm4, %v3488_v6, %v3490_v15  ;;  %v3495_v53 = vsel %vm3481_vm4, %v3492_v13, %v3494_v3  ;;  %v3998_v60 = vpop.eup %3997 }
 0x1cf   :  { %v3287_v55 = vsub.s32 32, %v3286_v57  ;;  %v3288_v17 = vshll.u32 %v5902_v51, %v3286_v57  ;;  %v3291_v16 = vsub.s32 4294967266, %v3286_v57  ;;  %v3487_v18 = vsel %vm3481_vm4, %v3484_v48, %v3486_v5 }
 0x1d0   :  { %v2963_v59 = vmul.f32 %v3998_v60, %v5886_v28  ;;  %v5951_v30 = vmul.u32.u64.low %v5914_v58, %v3495_v53  ;;  %v5952_v2 = vmul.u32.u64.high %v5914_v58, %v3495_v53, %v5951_v30  ;;  %v824_v44 = vadd.s32 1, %v3744_v7 }
 0x1d1   :  { %v3289_v24 = vshrl.u32 %v3271_v39, %v3287_v55  ;;  %v3292_v49 = vadd.s32 127, %v3291_v16  ;;  %v5955_v47 = vmul.u32.u64.low %v5914_v58, %v3491_v34  ;;  %v5956_v46 = vmul.u32.u64.high %v5914_v58, %v3491_v34, %v5955_v47  ;;  %v4000_v61 = vpop.eup %3999 }
 0x1d2   :  { %v2965_v51 = vsel %vm2964_vm3, %v5886_v28, %v2963_v59  ;;  %vm3183_vm6 = vcmp.eq.s32.totalorder %v5895_v19, 2  ;;  %v3302_v12 = vsel %vm3217_vm7, %v3301_v40, %v5883_v56  ;;  %vm825_vm9 = vcmp.gt.s32.totalorder %v824_v44, 0  ;;  %v4002_v7 = vpop.eup %4001 }
 0x1d3   :  { %v2968_v39 = vsel %vm2966_vm1, %v2967_v20, %v2965_v51  ;;  %v3078_v27 = vxor.u32 2147483648, %v4000_v61  ;;  %v3290_v21 = vor.u32 %v3289_v24, %v3288_v17  ;;  %v3293_v22 = vshll.u32 %v3292_v49, 23 }
 0x1d4   :  { %v5969_v48 = vadd.f32 %v2968_v39, %v5806_v10  ;;  %v3075_v6 = vxor.u32 2147483648, %v4002_v7  ;;  %v3503_v63 = vmul.u32 %v5914_v58, %v3487_v18  ;;  %vm3505_vm3 = vc.u32 %v5952_v2, %v5955_v47 }
 0x1d5   :  { %v3079_v56 = vsel %vm3077_vm5, %v3078_v27, %v4002_v7  ;;  %v3185_v40 = vsel %vm3183_vm6, %v3078_v27, %v4002_v7  ;;  %v3294_v52 = vor.u32 4788187, %v3293_v22  ;;  %v3297_v13 = vcvt.s32.f32 %v3290_v21 }
 0x1d6   :  { %v3076_v28 = vsel %vm3074_vm13, %v4000_v61, %v3075_v6  ;;  %v3182_v50 = vsel %vm3180_vm8, %v4000_v61, %v3075_v6  ;;  %v3506_v10 = vadd.s32 1, %v5956_v46  ;;  %v826_v5 = vsel %vm825_vm9, %v824_v44, 0 }
 0x1d7   :  { %v3080_v58 = vsel %vm3073_vm15, %v3076_v28, %v3079_v56  ;;  %v3186_v15 = vsel %vm3179_vm0, %v3182_v50, %v3185_v40  ;;  %v3295_v3 = vand.u32 2147483647, %v3294_v52  ;;  %v3304_v20 = vsel %vm5941_vm14, 0, %v3302_v12 }
 0x1d8   :  { %v3081_v57 = vsel %vm3071_vm12, nan, %v3080_v58  ;;  %v3187_v34 = vsel %vm3071_vm12, nan, %v3186_v15  ;;  %v3507_v53 = vsel %vm3505_vm3, %v3506_v10, %v5956_v46  ;;  %v828_v60 = vand.u32 31, %v826_v5 }
 0x1d9   :  { %v3082_v55 = vmul.f32 %v3081_v57, %v5889_v42  ;;  %v3188_v1 = vmul.f32 %v3187_v34, %v5889_v42  ;;  %v3298_v17 = vmul.f32 %v3297_v13, %v3295_v3  ;;  %v3508_v19 = vadd.s32 %v3507_v53, %v3503_v63 }
 0x1da   :  { %v821_v16 = vand.u32 8388607, %v814_v9  ;;  %v829_v18 = vsub.s32 32, %v828_v60  ;;  %v3413_v49 = vadd.s32 3, %v3304_v20  ;;  %v6003_v46 = vshrl.u32 %v826_v5, 5 }
 0x1db   :  { %v5998_v59 = vadd.f32 %v3082_v55, %v5868_v36  ;;  %v6001_v30 = vadd.f32 %v3188_v1, %v5871_v11  ;;  %v3299_v44 = vxor.u32 2147483648, %v3298_v17  ;;  %v3509_v24 = vadd.s32 536870912, %v3508_v19 }
 0x1dc   :  { %v831_v61 = vshll.u32 %v4134_v29, %v828_v60  ;;  %v834_v42 = vshll.u32 %v4135_v31, %v828_v60  ;;  %v832_v39 = vshrl.u32 %v4135_v31, %v829_v18  ;;  %v835_v27 = vshrl.u32 %v4136_v33, %v829_v18 }
 0x1dd   :  { %v3193_v51 = vsub.f32 %v5998_v59, %v5557_v32  ;;  %v3194_v12 = vsub.f32 %v6001_v30, %v5561_v43  ;;  %v3300_v36 = vsel %vm3217_vm7, %v3299_v44, %v3298_v17  ;;  %v6013_v11 = vshrl.u32 %v3509_v24, 30 }
 0x1de   :  { %v3303_v7 = vsel %vm5941_vm14, %v5598_v41, %v3300_v36  ;;  %v837_v21 = vshll.u32 %v4136_v33, %v828_v60  ;;  %v838_v6 = vshrl.u32 %v4137_v35, %v829_v18  ;;  %v840_v63 = vshll.u32 %v4137_v35, %v828_v60 }
 0x1df   :  { %v3195_v22 = vmul.f32 %v3193_v51, %v3193_v51  ;;  %v3196_v32 = vmul.f32 %v3194_v12, %v3194_v12  ;;  %4003 = vcosq.f32 %v3303_v7  ;;  %v3511_v43 = vshll.u32 %v6013_v11, 30 }
 0x1e0   :  { %4005 = vsinq.f32 %v3303_v7  ;;  %v841_v56 = vshrl.u32 %v4138_v37, %v829_v18  ;;  %v6027_v40 = vand.u32 3, %v3304_v20  ;;  %v6032_v33 = vmul.f32 0.2, %v5745_v25 }
 0x1e1   :  { %v6025_v4 = vadd.f32 %v3196_v32, %v3195_v22  ;;  %v6029_v31 = vsub.s32 %v3508_v19, %v3511_v43  ;;  %v843_v13 = vshll.u32 %v4138_v37, %v828_v60  ;;  %v844_v28 = vshrl.u32 %v4139_v45, %v829_v18 }
 0x1e2   :  { %v842_v52 = vor.u32 %v841_v56, %v840_v63  ;;  %v822_v50 = vor.u32 8388608, %v821_v16  ;;  %v833_v35 = vor.u32 %v832_v39, %v831_v61  ;;  %v836_v10 = vor.u32 %v835_v27, %v834_v42 }
 0x1e3   :  { %4007 = vrsqrt.f32 %v6025_v4  ;;  %v3414_v5 = vand.u32 3, %v3413_v49  ;;  %v3514_v58 = vsub.s32 0, %v6029_v31  ;;  %v839_v15 = vor.u32 %v838_v6, %v837_v21 }
 0x1e4   :  { %vm846_vm7 = vcmp.lt.s32.totalorder %v6003_v46, 1  ;;  %vm3310_vm1 = vcmp.eq.s32.totalorder %v6027_v40, 0  ;;  %v830_v3 = vshrl.u32 %v4134_v29, %v829_v18  ;;  %vm848_vm5 = vcmp.lt.s32.totalorder %v6003_v46, 3 }
 0x1e5   :  { %vm849_vm4 = vcmp.lt.s32.totalorder %v6003_v46, 4  ;;  %vm3309_vm11 = vcmp.lt.s32.totalorder %v6027_v40, 2  ;;  %v3837_v37 = vmin.u32 %v3514_v58, %v6029_v31  ;;  %v845_v45 = vor.u32 %v844_v28, %v843_v13 }
 0x1e6   :  { %v851_v20 = vsel %vm849_vm4, %v839_v15, 2102212464  ;;  %v855_v57 = vsel %vm849_vm4, %v842_v52, 920167782  ;;  %vm3307_vm13 = vweird.f32 %v5598_v41  ;;  %vm3313_vm8 = vcmp.eq.s32.totalorder %v6027_v40, 2 }
 0x1e7   :  { %vm847_vm2 = vcmp.lt.s32.totalorder %v6003_v46, 2  ;;  %v854_v29 = vsel %vm846_vm7, %v833_v35, %v836_v10  ;;  %v862_v34 = vshll.u32 %v822_v50, 8  ;;  %vm3415_vm15 = vcmp.lt.s32.totalorder %v3414_v5, 2 }
 0x1e8   :  { %vm3416_vm0 = vcmp.eq.s32.totalorder %v3414_v5, 0  ;;  %v3516_v53 = vclz %v3837_v37  ;;  %v856_v60 = vsel %vm848_vm5, %v839_v15, %v855_v57  ;;  %vm3419_vm12 = vcmp.eq.s32.totalorder %v3414_v5, 2 }
 0x1e9   :  { %v850_v55 = vsel %vm846_vm7, %v830_v3, %v833_v35  ;;  %v852_v1 = vsel %vm848_vm5, %v836_v10, %v851_v20  ;;  %v858_v17 = vsel %vm846_vm7, %v836_v10, %v839_v15  ;;  %v3504_v19 = vadd.s32 %v5955_v47, %v5952_v2 }
 0x1ea   :  { %v3838_v16 = vadd.s32 4294967294, %v3516_v53  ;;  %v857_v18 = vsel %vm847_vm2, %v854_v29, %v856_v60  ;;  %v859_v44 = vsel %vm849_vm4, %v845_v45, 1326507024  ;;  %vm3200_vm10 = vcmp.eq.f32.partialorder %v6025_v4, inf }
 0x1eb   :  { %v860_v24 = vsel %vm848_vm5, %v842_v52, %v859_v44  ;;  %v6071_v49 = vmul.u32.u64.low %v862_v34, %v857_v18  ;;  %v6072_v61 = vmul.u32.u64.high %v862_v34, %v857_v18, %v6071_v49  ;;  %vm3202_vm14 = vcmp.eq.f32.partialorder %v6025_v4, 0.0 }
 0x1ec   :  { %v4004_v42 = vpop.eup %4003  ;;  %vm3839_vm6 = vcmp.lt.s32.totalorder %v3838_v16, 0  ;;  %v853_v2 = vsel %vm847_vm2, %v850_v55, %v852_v1  ;;  %v861_v47 = vsel %vm847_vm2, %v858_v17, %v860_v24  ;;  %v3203_v43 = vand.u32 2147483648, %v6025_v4 }
 0x1ed   :  { %v4006_v51 = vpop.eup %4005  ;;  %v3314_v12 = vxor.u32 2147483648, %v4004_v42  ;;  %v3519_v36 = vsel %vm3839_vm6, 0, %v3838_v16  ;;  %v6080_v7 = vmul.u32.u64.low %v862_v34, %v861_v47  ;;  %v6081_v39 = vmul.u32.u64.high %v862_v34, %v861_v47, %v6080_v7  ;;  %v6123_v16 = vld [vmem:[#allocation6 + $0x8] sm:$0xff] }
 0x1ee   :  { %v3311_v27 = vxor.u32 2147483648, %v4006_v51  ;;  %v3520_v21 = vsub.s32 32, %v3519_v36  ;;  %v3521_v22 = vshll.u32 %v6029_v31, %v3519_v36  ;;  %v3524_v32 = vsub.s32 4294967266, %v3519_v36 }
 0x1ef   :  { %v3315_v6 = vsel %vm3313_vm8, %v3314_v12, %v4006_v51  ;;  %v3421_v63 = vsel %vm3419_vm12, %v3314_v12, %v4006_v51  ;;  %v872_v46 = vadd.s32 1, %v6072_v61  ;;  %v869_v58 = vmul.u32 %v862_v34, %v853_v2  ;;  %v3210_v12 = vld [vmem:[#allocation8 + $0x30] sm:$0xff] }
 0x1f0   :  { %v4008_v56 = vpop.eup %4007  ;;  %v3312_v52 = vsel %vm3310_vm1, %v4004_v42, %v3311_v27  ;;  %v3418_v13 = vsel %vm3416_vm0, %v4004_v42, %v3311_v27  ;;  %v3522_v28 = vshrl.u32 %v3504_v19, %v3520_v21  ;;  %v3525_v50 = vadd.s32 127, %v3524_v32  ;;  %v6119_v19 = vld [vmem:[#allocation6] sm:$0xff] }
 0x1f1   :  { %v3199_v31 = vmul.f32 %v4008_v56, %v6025_v4  ;;  %v3316_v35 = vsel %vm3309_vm11, %v3312_v52, %v3315_v6  ;;  %v3422_v10 = vsel %vm3415_vm15, %v3418_v13, %v3421_v63  ;;  %vm871_vm9 = vc.u32 %v6081_v39, %v6071_v49 }
 0x1f2   :  { %v3317_v15 = vsel %vm3307_vm13, nan, %v3316_v35  ;;  %v3423_v3 = vsel %vm3307_vm13, nan, %v3422_v10  ;;  %v3523_v37 = vor.u32 %v3522_v28, %v3521_v22  ;;  %v3526_v45 = vshll.u32 %v3525_v50, 23 }
 0x1f3   :  { %v3201_v20 = vsel %vm3200_vm10, %v6025_v4, %v3199_v31  ;;  %v3318_v57 = vmul.f32 %v3317_v15, %v6032_v33  ;;  %v3424_v40 = vmul.f32 %v3423_v3, %v6032_v33  ;;  %v873_v53 = vsel %vm871_vm9, %v872_v46, %v6072_v61 }
 0x1f4   :  { %v3204_v5 = vsel %vm3202_vm14, %v3203_v43, %v3201_v20  ;;  %v3527_v29 = vor.u32 4788187, %v3526_v45  ;;  %v3530_v34 = vcvt.s32.f32 %v3523_v37  ;;  %v874_v33 = vadd.s32 %v873_v53, %v869_v58 }
 0x1f5   :  { %v6111_v60 = vadd.f32 %v3204_v5, %v5969_v48  ;;  %v6114_v55 = vadd.f32 %v3318_v57, %v5998_v59  ;;  %v6117_v1 = vadd.f32 %v3424_v40, %v6001_v30  ;;  %vm3450_vm3 = vcmp.lt.s32.totalorder %v5785_v14, 0 }
 0x1f6   :  { %v3528_v17 = vand.u32 2147483647, %v3527_v29  ;;  %v875_v48 = vadd.s32 536870912, %v874_v33  ;;  %v3534_v42 = vsub.s32 4, %v6013_v11  ;;  %vm3449_vm7 = vcmp.le.f32.partialorder %v3448_v0, 0.7853982 }
 0x1f7   :  { %v3429_v4 = vsub.f32 %v6114_v55, %v6119_v19  ;;  %v3430_v18 = vsub.f32 %v6117_v1, %v6123_v16  ;;  %v3211_v22 = vmul.f32 0.2, %v3210_v12  ;;  %vm3540_vm12 = vweird.f32 %v5785_v14 }
 0x1f8   :  { %v3531_v44 = vmul.f32 %v3530_v34, %v3528_v17  ;;  %v6128_v30 = vshrl.u32 %v875_v48, 30  ;;  %v3535_v36 = vsel %vm3450_vm3, %v3534_v42, %v6013_v11  ;;  %v870_v11 = vadd.s32 %v6071_v49, %v6081_v39 }
 0x1f9   :  { %v3431_v24 = vmul.f32 %v3429_v4, %v3429_v4  ;;  %v3432_v59 = vmul.f32 %v3430_v18, %v3430_v18  ;;  %v3537_v32 = vsel %vm3449_vm7, 0, %v3535_v36  ;;  %v6137_v0 = vadd.f32 %v3211_v22, %v5745_v25 }
 0x1fa   :  { %v3532_v61 = vxor.u32 2147483648, %v3531_v44  ;;  %v877_v47 = vshll.u32 %v6128_v30, 30  ;;  %v3646_v6 = vadd.s32 3, %v3537_v32  ;;  %v3541_v56 = vand.u32 3, %v3537_v32 }
 0x1fb   :  { %v3433_v2 = vadd.f32 %v3432_v59, %v3431_v24  ;;  %v3447_v13 = vmul.f32 0.2, %v6137_v0  ;;  %vm816_vm10 = vcmp.lt.s32.totalorder %v5875_v54, 0  ;;  %vm815_vm14 = vcmp.le.f32.partialorder %v814_v9, 0.7853982 }
 0x1fc   :  { %v3533_v51 = vsel %vm3450_vm3, %v3532_v61, %v3531_v44  ;;  %v878_v27 = vsub.s32 %v874_v33, %v877_v47  ;;  %v3647_v52 = vand.u32 3, %v3646_v6  ;;  %vm3542_vm11 = vcmp.lt.s32.totalorder %v3541_v56, 2  ;;  %v6159_v6 = vld [vmem:[#allocation6 + $0x10] sm:$0xff] }
 0x1fd   :  { %4009 = vrsqrt.f32 %v3433_v2  ;;  %v3536_v7 = vsel %vm3449_vm7, %v5785_v14, %v3533_v51  ;;  %vm3436_vm5 = vcmp.eq.f32.partialorder %v3433_v2, inf  ;;  %v3439_v31 = vand.u32 2147483648, %v3433_v2 }
 0x1fe   :  { %4011 = vcosq.f32 %v3536_v7  ;;  %v880_v21 = vsub.s32 0, %v878_v27  ;;  %vm3438_vm4 = vcmp.eq.f32.partialorder %v3433_v2, 0.0  ;;  %vm3543_vm13 = vcmp.eq.s32.totalorder %v3541_v56, 0 }
 0x1ff   :  { %4013 = vsinq.f32 %v3536_v7  ;;  %vm3546_vm8 = vcmp.eq.s32.totalorder %v3541_v56, 2  ;;  %vm3652_vm2 = vcmp.eq.s32.totalorder %v3647_v52, 2  ;;  %vm3648_vm15 = vcmp.lt.s32.totalorder %v3647_v52, 2 }
 0x200   :  { %v3745_v43 = vmin.u32 %v880_v21, %v878_v27  ;;  %vm3649_vm0 = vcmp.eq.s32.totalorder %v3647_v52, 0  ;;  %v900_v32 = vsub.s32 4, %v6128_v30 }
 0x202   :  { %v882_v63 = vclz %v3745_v43 }
 0x204   :  { %v3746_v46 = vadd.s32 4294967294, %v882_v63 }
 0x206   :  { %vm3747_vm1 = vcmp.lt.s32.totalorder %v3746_v46, 0 }
 0x207   :  { %v885_v28 = vsel %vm3747_vm1, 0, %v3746_v46  ;;  %v2026_v46 = vsub.f32 %v4953_v26, %v6159_v6  ;;  %vm906_vm1 = vweird.f32 %v5875_v54 }
 0x208   :  { %v886_v35 = vsub.s32 32, %v885_v28  ;;  %v887_v10 = vshll.u32 %v878_v27, %v885_v28  ;;  %v890_v58 = vsub.s32 4294967266, %v885_v28 }
 0x20a   :  { %v4010_v50 = vpop.eup %4009  ;;  %v888_v3 = vshrl.u32 %v870_v11, %v886_v35  ;;  %v891_v37 = vadd.s32 127, %v890_v58  ;;  %v2262_v11 = vsub.f32 %v5042_v38, %v6159_v6 }
 0x20b   :  { %v3435_v15 = vmul.f32 %v4010_v50, %v3433_v2  ;;  %v4012_v25 = vpop.eup %4011 }
 0x20c   :  { %v4014_v49 = vpop.eup %4013  ;;  %v3547_v45 = vxor.u32 2147483648, %v4012_v25  ;;  %v889_v40 = vor.u32 %v888_v3, %v887_v10  ;;  %v892_v5 = vshll.u32 %v891_v37, 23 }
 0x20d   :  { %v3437_v39 = vsel %vm3436_vm5, %v3433_v2, %v3435_v15  ;;  %v3544_v57 = vxor.u32 2147483648, %v4014_v49 }
 0x20e   :  { %v3440_v20 = vsel %vm3438_vm4, %v3439_v31, %v3437_v39  ;;  %v3548_v34 = vsel %vm3546_vm8, %v3547_v45, %v4014_v49  ;;  %v3654_v53 = vsel %vm3652_vm2, %v3547_v45, %v4014_v49  ;;  %v893_v4 = vor.u32 4788187, %v892_v5 }
 0x20f   :  { %v6144_v29 = vadd.f32 %v3440_v20, %v6111_v60  ;;  %v3545_v33 = vsel %vm3543_vm13, %v4012_v25, %v3544_v57  ;;  %v3651_v17 = vsel %vm3649_vm0, %v4012_v25, %v3544_v57  ;;  %v896_v18 = vcvt.s32.f32 %v889_v40 }
 0x210   :  { %v3549_v48 = vsel %vm3542_vm11, %v3545_v33, %v3548_v34  ;;  %v3655_v44 = vsel %vm3648_vm15, %v3651_v17, %v3654_v53  ;;  %v894_v61 = vand.u32 2147483647, %v893_v4  ;;  %v2263_v25 = vand.u32 2147483647, %v2262_v11 }
 0x211   :  { %v3550_v24 = vsel %vm3540_vm12, nan, %v3549_v48  ;;  %v3656_v59 = vsel %vm3540_vm12, nan, %v3655_v44  ;;  %v2498_v49 = vsub.f32 %v5123_v8, %v6159_v6  ;;  %v2734_v40 = vsub.f32 %v5334_v62, %v6159_v6 }
 0x212   :  { %v3551_v42 = vmul.f32 %v3550_v24, %v3447_v13  ;;  %v3657_v2 = vmul.f32 %v3656_v59, %v3447_v13  ;;  %v897_v47 = vmul.f32 %v896_v18, %v894_v61  ;;  %v2970_v4 = vsub.f32 %v5444_v23, %v6159_v6 }
 0x213   :  { %v2499_v34 = vand.u32 2147483647, %v2498_v49  ;;  %v2735_v17 = vand.u32 2147483647, %v2734_v40 }
 0x214   :  { %v3552_v60 = vadd.f32 %v3551_v42, %v6114_v55  ;;  %v3658_v51 = vadd.f32 %v3657_v2, %v6117_v1  ;;  %v898_v12 = vxor.u32 2147483648, %v897_v47  ;;  %v901_v1 = vsel %vm816_vm10, %v900_v32, %v6128_v30 }
 0x215   :  { %v903_v9 = vsel %vm815_vm14, 0, %v901_v1  ;;  %v2027_v30 = vand.u32 2147483647, %v2026_v46  ;;  %v2971_v44 = vand.u32 2147483647, %v2970_v4  ;;  %v3442_v2 = vsub.f32 %v5785_v14, %v6159_v6 }
 0x216   :  { %v3661_v36 = vsub.f32 %v3552_v60, %v6119_v19  ;;  %v3662_v7 = vsub.f32 %v3658_v51, %v6123_v16  ;;  %v899_v27 = vsel %vm816_vm10, %v898_v12, %v897_v47  ;;  %v1732_v63 = vand.u32 3, %v903_v9  ;;  %v4031_v19 = vld [vmem:[#allocation3 + $0x10] sm:$0xff] }
 0x217   :  { %v902_v43 = vsel %vm815_vm14, %v5875_v54, %v899_v27  ;;  %v1793_v16 = vsub.f32 %v4031_v19, %v6159_v6  ;;  %v907_v28 = vadd.s32 3, %v903_v9  ;;  %v3443_v51 = vand.u32 2147483647, %v3442_v2 }
 0x218   :  { %v3663_v21 = vmul.f32 %v3661_v36, %v3661_v36  ;;  %v3664_v22 = vmul.f32 %v3662_v7, %v3662_v7  ;;  %4015 = vcosq.f32 %v902_v43  ;;  %vm1737_vm6 = vcmp.eq.s32.totalorder %v1732_v63, 2 }
 0x219   :  { %4017 = vsinq.f32 %v902_v43  ;;  %v1794_v52 = vand.u32 2147483647, %v1793_v16  ;;  %vm1734_vm9 = vcmp.eq.s32.totalorder %v1732_v63, 0  ;;  %vm1733_vm3 = vcmp.lt.s32.totalorder %v1732_v63, 2 }
 0x21a   :  { %v3665_v55 = vadd.f32 %v3664_v22, %v3663_v21  ;;  %v908_v3 = vand.u32 3, %v907_v28 }
 0x21b   :  { %v2028_v38 = vadd.f32 %v2027_v30, %v1794_v52 }
 0x21c   :  { %4019 = vrsqrt.f32 %v3665_v55  ;;  %vm3668_vm7 = vcmp.eq.f32.partialorder %v3665_v55, inf  ;;  %v3671_v10 = vand.u32 2147483648, %v3665_v55  ;;  %vm3670_vm5 = vcmp.eq.f32.partialorder %v3665_v55, 0.0 }
 0x21d   :  { %vm910_vm4 = vcmp.eq.s32.totalorder %v908_v3, 0  ;;  %vm913_vm11 = vcmp.eq.s32.totalorder %v908_v3, 2  ;;  %v2264_v5 = vadd.f32 %v2263_v25, %v2028_v38  ;;  %vm909_vm13 = vcmp.lt.s32.totalorder %v908_v3, 2 }
 0x21f   :  { %v2500_v8 = vadd.f32 %v2499_v34, %v2264_v5 }
 0x221   :  { %v2736_v48 = vadd.f32 %v2735_v17, %v2500_v8 }
 0x223   :  { %v2972_v61 = vadd.f32 %v2971_v44, %v2736_v48 }
 0x225   :  { %v4016_v56 = vpop.eup %4015 }
 0x226   :  { %v4018_v13 = vpop.eup %4017  ;;  %v914_v50 = vxor.u32 2147483648, %v4016_v56 }
 0x227   :  { %v911_v31 = vxor.u32 2147483648, %v4018_v13 }
 0x228   :  { %v1739_v58 = vsel %vm1737_vm6, %v914_v50, %v4018_v13  ;;  %v915_v33 = vsel %vm913_vm11, %v914_v50, %v4018_v13 }
 0x229   :  { %v4020_v35 = vpop.eup %4019  ;;  %v1736_v15 = vsel %vm1734_vm9, %v4016_v56, %v911_v31  ;;  %v912_v53 = vsel %vm910_vm4, %v4016_v56, %v911_v31 }
 0x22a   :  { %v3667_v26 = vmul.f32 %v4020_v35, %v3665_v55  ;;  %v1740_v37 = vsel %vm1733_vm3, %v1736_v15, %v1739_v58  ;;  %v916_v18 = vsel %vm909_vm13, %v912_v53, %v915_v33 }
 0x22b   :  { %v1741_v45 = vsel %vm906_vm1, nan, %v1740_v37  ;;  %v917_v62 = vsel %vm906_vm1, nan, %v916_v18 }
 0x22c   :  { %v3669_v39 = vsel %vm3668_vm7, %v3665_v55, %v3667_v26  ;;  %4021 = vrcp.f32 %v1741_v45 }
 0x22d   :  { %v3672_v20 = vsel %vm3670_vm5, %v3671_v10, %v3669_v39 }
 0x22e   :  { %v3673_v57 = vadd.f32 %v3672_v20, %v6144_v29  ;;  %v3206_v29 = vsub.f32 %v5598_v41, %v6159_v6 }
 0x230   :  { %3677 = vadd.xlane.f32.xlu0 %v3673_v57  ;;  %v3207_v42 = vand.u32 2147483647, %v3206_v29 }
 0x232   :  { %v3208_v60 = vadd.f32 %v3207_v42, %v2972_v61 }
 0x234   :  { %v3444_v36 = vadd.f32 %v3443_v51, %v3208_v60 }
 0x239   :  { %v4022_v24 = vpop.eup %4021 }
 0x23a   :  { %v1757_v59 = vmul.f32 %v4022_v24, %v917_v62 }
 0x23c   :  { %v1765_v47 = vmul.f32 0.1, %v1757_v59 }
 0x23e   :  { %v3659_v23 = vmul.f32 %v6137_v0, %v1765_v47 }
 0x240   :  { %v3660_v12 = vadd.f32 %v3659_v23, %v5785_v14 }
 0x242   :  { %v3674_v41 = vsub.f32 %v3660_v12, %v6159_v6 }
 0x244   :  { %v3675_v7 = vand.u32 2147483647, %v3674_v41 }
 0x246   :  { %v3676_v54 = vadd.f32 %v3675_v7, %v3444_v36 }
 0x248   :  { %3687 = vadd.xlane.f32.xlu0 %v3676_v54 }
 0x2b9   :  { %v3678_v27 = vpop.xlane.xlu0 %3677 }
 0x2ba   :  { %v3679_v21 = vrot.slane %v3678_v27, 4 }
 0x2bc   :  { %v3680_v22 = vadd.f32 %v3679_v21, %v3678_v27 }
 0x2be   :  { %v3681_v32 = vrot.slane %v3680_v22, 2 }
 0x2c0   :  { %v3682_v43 = vadd.f32 %v3681_v32, %v3680_v22 }
 0x2c2   :  { %v3683_v55 = vrot.slane %v3682_v43, 1 }
 0x2c4   :  { %v3684_v1 = vadd.f32 %v3683_v55, %v3682_v43 }
 0x2c6   :  { %3908 = vpush %v3684_v1 }
 0x2d1   :  { %v3688_v9 = vpop.xlane.xlu0 %3687 }
 0x2d2   :  { %v3689_v63 = vrot.slane %v3688_v9, 4 }
 0x2d4   :  { %v3690_v19 = vadd.f32 %v3689_v63, %v3688_v9 }
 0x2d6   :  { %v3691_v0 = vrot.slane %v3690_v19, 2 }
 0x2d8   :  { %v3692_v16 = vadd.f32 %v3691_v0, %v3690_v19 }
 0x2da   :  { %v3693_v14 = vrot.slane %v3692_v16, 1 }
 0x2dc   :  { %v3694_v46 = vadd.f32 %v3693_v14, %v3692_v16 }
 0x2de   :  { %3910 = vpush %v3694_v46 }
 0x2f7   :  { %s3909_s2 = spop %3908 }
 0x2f8   :  { %s3686_s3 = smul.f32 0.1388889, %s3909_s2 }
 0x30f   :  { %s3911_s9 = spop %3910 }
 0x310   :  { %s3696_s10 = smul.f32 0.06944445, %s3911_s9 }
 0x312   :  { %s3697_s11 = sadd.f32 %s3696_s10, %s3686_s3 }
 0x314   :  { %3699 = sst [smem:[#allocation11]] %s3697_s11 }
 0x315   :  { %3707 = dma.smem_to_hbm %s4140_s12, 16, %s6192_s4, [#allocation5]  }
 0x316   :  { %4126 = dma.done.wait [#allocation5], 16  }
 0x317   :  { %4127 = vsyncadd [#allocation5], 4294967280 }
 0x318   :  { %3711 = sfence }
 0x319   :  { %3712 = vsyncpa [#allocation4], 1 }
 0x31a   :  { %3713 = vsyncpa [#allocation7], 1 }
 0x31b   :  { %3714 = vsyncpa [#allocation10], 1 }
 0x31c   :  { %3715 = vsyncpa [#allocation5], 1 }

</bundles_post_ra>
